<compile_context>
chip_gen: v5e
topology: v5e:2x2
jax: 0.10.0
libtpu: 0.0.40
codegen_flags: <defaults>
</compile_context>

<pallas_src>
import functools

import jax
import jax.numpy as jnp
from jax import lax
from jax.experimental import pallas as pl
from jax.experimental.pallas import tpu as pltpu

N_OPS = 8  # is_rotation_only=False, is_2d_frame=False -> 8 sign flips
OPS = jnp.array([[1, 1, 1], [1, 1, -1], [1, -1, 1], [1, -1, -1],
                 [-1, 1, 1], [-1, 1, -1], [-1, -1, 1], [-1, -1, -1]],
                dtype=jnp.float32)                       # (8, 3)


def _fs(a, b):
    return a + 3 * b


def _round_up(x, m):
    return ((x + m - 1) // m) * m


# --------------------------------------------------------------------------
# Pallas kernel: fused per-point MLP + fused weighted sum-pooling + second MLP
# (feature-major: features on sublanes, rows on lanes; bf16 MXU, f32 accum)
# --------------------------------------------------------------------------
def apen_mlp_kernel(x_ref, aux_ref, pool_ref, bcast_ref,
                    w1, b1, w2, b2, w3, b3, w4, b4, w5, b5,
                    ws1, bs1, ws2, bs2, ws3, bs3, ws4, bs4,
                    o_ref, cat_ref, *, d5):
    # x_ref   : (1, D_IN_P, R) bf16 -- R lanes, ordered (group-in-step, point);
    #           one pooling group = one (batch, group, frame-op).
    # aux_ref : (1, 2, R) f32  -- row0 = weight*(weight>=threshold), row1 = mask.
    # pool_ref: (R, Gp) bf16 one-hot lane->group (hoisted, exact in bf16).
    # bcast_ref: (Gp, R) bf16 one-hot group->lane.
    # cat_ref : (d_cat, R) bf16 scratch holding [h1|h2|h3|h4|h5|pooled].
    x = x_ref[0]                      # (D_IN_P, R) bf16
    aux = aux_ref[0]                  # (2, R)      f32
    wm = aux[0:1, :]                  # (1, R)
    msk = aux[1:2, :]                 # (1, R)

    def lin(w_r, b_r, a_bf16):
        # weights pre-transposed (D_out, D_in) bf16; bias (D_out, 1) f32;
        # bf16 matmul with f32 accumulation, bias added in f32.
        return jnp.dot(w_r[...], a_bf16, preferred_element_type=jnp.float32) + b_r[...]

    def relu_bf16(t):
        # ReLU in f32 (v5e VPU has no bf16 ALU); single cast feeds both the
        # next matmul input and the cat scratch store.
        return jnp.maximum(t, 0.0).astype(jnp.bfloat16)

    # conv1..conv5 (MinkowskiLinear; with_bn=False path, conv5 has no ReLU).
    h1 = relu_bf16(lin(w1, b1, x))
    h2 = relu_bf16(lin(w2, b2, h1))
    h3 = relu_bf16(lin(w3, b3, h2))
    h4 = relu_bf16(lin(w4, b4, h3))
    # conv5 is augmented with 8 extra output rows (row d5 has zero weights and
    # bias 1.0) so that wm*h5a simultaneously carries the pooling numerator
    # rows and the denominator row -> ONE fused matmul below.
    h5a = lin(w5, b5, h4)                                     # (d5+8, R) f32

    d1, d2, d3, d4 = w1.shape[0], w2.shape[0], w3.shape[0], w4.shape[0]
    o2 = d1; o3 = o2 + d2; o4 = o3 + d3; o5 = o4 + d4; o6 = o5 + d5
    # Static row offsets (0/32/80/144/224/320 for the default config) are all
    # multiples of 16 -> bf16 sublane packing stays tile-aligned.
    cat_ref[0:o2, :] = h1
    cat_ref[o2:o3, :] = h2
    cat_ref[o3:o4, :] = h3
    cat_ref[o4:o5, :] = h4
    cat_ref[o5:o6, :] = h5a[0:d5, :].astype(jnp.bfloat16)

    # MinkowskiSumPooling over the point axis within each (batch, group,
    # frame-op), weighted by the sparse weights:
    #   pooled[g] = sum_n wm*h5 / (sum_n wm + 1e-5)
    # Single bf16 matmul against the hoisted one-hot pool matrix gives both
    # numerator (rows 0..d5-1) and denominator (row d5).
    wm_h5 = (wm * h5a).astype(jnp.bfloat16)                   # (d5+8, R)
    pooled_all = jnp.dot(wm_h5, pool_ref[...],
                         preferred_element_type=jnp.float32)  # (d5+8, Gp)
    nom = pooled_all[0:d5, :]
    den = pooled_all[d5:d5 + 1, :] + 1e-5
    pooled = nom * pl.reciprocal(den, approx=True)            # (d5, Gp) f32
    # MinkowskiBroadcastConcatenation: broadcast pooled group features back to
    # every lane of the group via the hoisted one-hot broadcast matrix.
    cat_ref[o6:o6 + d5, :] = jnp.dot(
        pooled.astype(jnp.bfloat16), bcast_ref[...],
        preferred_element_type=jnp.float32).astype(jnp.bfloat16)

    # convs1..convs4 (with_bn=False path): single K=d_cat matmul from the
    # bf16 cat scratch, then the small chain; convs4 has no ReLU.
    cat = cat_ref[...]                                        # (d_cat, R) bf16
    s1 = relu_bf16(lin(ws1, bs1, cat))
    s2 = relu_bf16(lin(ws2, bs2, s1))
    s3 = relu_bf16(lin(ws3, bs3, s2))
    s4 = lin(ws4, bs4, s3)                                    # (D_OUT_P, R) f32

    # sparse -> dense: rows filtered out by the weight threshold (and lane
    # padding) become zero.
    o_ref[0] = s4 * msk


# --------------------------------------------------------------------------
# VMEM budgeting / tiling choice (generation-safe: budget fits v7x's 64 MiB)
# --------------------------------------------------------------------------
def _vmem_step_bytes(r_lane, d_cat):
    # generous per-step peak: bf16 cat scratch + f32 transient activations
    # (h-chain / pooled / s4) + bf16 s-chain + double-buffered I/O tiles.
    per_lane = 2 * d_cat + 4 * d_cat + 2 * (256 + 256 + 128) + 4 * 64
    return r_lane * per_lane


def _params_bytes(flat):
    return sum(int(a.size) * a.dtype.itemsize for a in flat)


def _pick_groups_per_step(n_groups_total, n_pts, d_cat, lane_target, vmem_budget):
    # Each grid step processes `gps` whole pooling groups -> lane width
    # round_up(gps*n_pts, 128).  Prefer even step counts >= 2 so the
    # "parallel" grid axis shards across v7x's two TensorCores.
    def ok(g):
        r = _round_up(g * n_pts, 128)
        return g * n_pts <= lane_target and _vmem_step_bytes(r, d_cat) <= vmem_budget
    cands = [g for g in range(1, n_groups_total + 1)
             if n_groups_total % g == 0 and ok(g)]
    if not cands:
        # TODO(synk): very large N needs an in-kernel two-pass (lane-chunked)
        # pooling to stay inside v7x's 64 MiB VMEM; single-group step for now.
        return 1
    even = [g for g in cands
            if (n_groups_total // g) >= 2 and (n_groups_total // g) % 2 == 0]
    multi = [g for g in cands if (n_groups_total // g) >= 2]
    return max(even or multi or cands)


def _prep_params(params, d_in_pad, d_out_pad):
    # Transpose to (D_out, D_in) for the feature-major kernel, pad conv1's
    # input dim and convs4's output dim to sublane multiples, augment conv5's
    # output with 8 rows (bias [1,0,...,0]) for the fused nom/den pooling
    # matmul, and cast weights to bf16 (biases stay f32, added post-accum).
    flat = []
    n_layers = len(params)
    for li, (w, b) in enumerate(params):
        w = jnp.asarray(w, jnp.float32)
        b = jnp.asarray(b, jnp.float32)
        if li == 0 and w.shape[0] < d_in_pad:
            w = jnp.pad(w, ((0, d_in_pad - w.shape[0]), (0, 0)))
        if li == 4:  # conv5: +8 output rows, first extra row is the constant 1
            w = jnp.pad(w, ((0, 0), (0, 8)))
            b_extra = jnp.zeros((1, 8), jnp.float32).at[0, 0].set(1.0)
            b = jnp.concatenate([b, b_extra], axis=1)
        if li == n_layers - 1 and w.shape[1] < d_out_pad:
            w = jnp.pad(w, ((0, 0), (0, d_out_pad - w.shape[1])))
            b = jnp.pad(b, ((0, 0), (0, d_out_pad - b.shape[1])))
        flat.append(jnp.transpose(w).astype(jnp.bfloat16))   # (D_out, D_in)
        flat.append(jnp.transpose(b).astype(jnp.float32))    # (D_out, 1)
    return flat


def run_apen_mlp(x_gfm, wm_g, msk_g, params, *, lane_target=2048,
                 vmem_budget_bytes=24 << 20):
    # x_gfm : (n_groups_total, D_IN, n_pts) f32, group/feature-major; groups
    #         ordered (batch, group, frame-op); one group = one pooling group.
    # wm_g / msk_g : (n_groups_total, n_pts) f32.
    g_total, d_in, n_pts = x_gfm.shape
    d_out = params[-1][0].shape[1]
    d5 = params[4][0].shape[1]
    d_cat = params[5][0].shape[0]
    d_in_p = _round_up(d_in, 8)
    d_out_p = _round_up(d_out, 8)

    gps = _pick_groups_per_step(g_total, n_pts, d_cat, lane_target,
                                vmem_budget_bytes)
    steps = g_total // gps
    r_real = gps * n_pts
    r_lane = _round_up(r_real, 128)        # lane-dense stores on every tile

    # feature-major step tiles (steps, D_IN_P, r_lane); the small re-layout is
    # done on bf16 data (half the HBM bytes of an f32 transpose).
    x = x_gfm.astype(jnp.bfloat16).reshape(steps, gps, d_in, n_pts)
    x = jnp.transpose(x, (0, 2, 1, 3)).reshape(steps, d_in, r_real)
    x = jnp.pad(x, ((0, 0), (0, d_in_p - d_in), (0, r_lane - r_real)))

    aux = jnp.stack([wm_g.reshape(steps, r_real),
                     msk_g.reshape(steps, r_real)], axis=1).astype(jnp.float32)
    aux = jnp.pad(aux, ((0, 0), (0, 0), (0, r_lane - r_real)))

    # Hoisted one-hot pooling / broadcast matrices (static -> built once,
    # exact in bf16, DMA'd once thanks to constant-index BlockSpecs).  Padded
    # lanes fall into phantom trailing groups with wm = msk = 0.
    n_grp_cols = -(-r_lane // n_pts)
    g_pad = _round_up(n_grp_cols, 8)
    lane_grp = jnp.arange(r_lane, dtype=jnp.int32) // n_pts
    grp_ids = jnp.arange(g_pad, dtype=jnp.int32)
    pool_mat = (lane_grp[:, None] == grp_ids[None, :]).astype(jnp.bfloat16)
    bcast_mat = (grp_ids[:, None] == lane_grp[None, :]).astype(jnp.bfloat16)

    flat = _prep_params(params, d_in_p, d_out_p)
    kernel = functools.partial(apen_mlp_kernel, d5=d5)

    tile_spec = lambda d: pl.BlockSpec((1, d, r_lane), lambda i: (i, 0, 0))
    # TODO(synk): on v7x, pipeline_mode=pl.Buffered(1) on the constant-index
    # weight specs would free ~0.5 MiB of VMEM; skipped to keep compile safe.
    full_spec = lambda a: pl.BlockSpec(a.shape, lambda i, nd=a.ndim: (0,) * nd)

    vmem_limit = int(min(max(_vmem_step_bytes(r_lane, d_cat)
                             + 2 * _params_bytes(flat) + (8 << 20),
                             32 << 20), 56 << 20))

    out = pl.pallas_call(
        kernel,
        out_shape=jax.ShapeDtypeStruct((steps, d_out_p, r_lane), jnp.float32),
        grid_spec=pltpu.PrefetchScalarGridSpec(
            num_scalar_prefetch=0,
            grid=(steps,),
            in_specs=[tile_spec(d_in_p), tile_spec(2),
                      full_spec(pool_mat), full_spec(bcast_mat)]
                     + [full_spec(p) for p in flat],
            out_specs=tile_spec(d_out_p),
            scratch_shapes=[pltpu.VMEM((d_cat, r_lane), jnp.bfloat16)]),
        compiler_params=pltpu.CompilerParams(
            dimension_semantics=("parallel",),
            vmem_limit_bytes=vmem_limit),
    )(x, aux, pool_mat, bcast_mat, *flat)

    out = out[:, :d_out, :r_real]                                 # drop padding
    out = jnp.transpose(out, (0, 2, 1)).reshape(g_total, n_pts, d_out)
    return out


# --------------------------------------------------------------------------
# Plain-JAX glue (frame estimation, neighbor selection, output assembly)
# --------------------------------------------------------------------------
def get_frame(pnts, weights, noise_key):
    """Weighted-frame branch of Frames_Base.get_frame (is_2d_frame=False, eval)."""
    wn = weights / (weights.sum(1, keepdims=True) + 1e-6)           # (B,N,G)
    center = jnp.einsum('bng,bnd->bgd', wn, pnts)[:, :, None, :]    # (B,G,1,3)
    pc = pnts[:, None, :, :] - center                               # (B,G,N,3)
    wT = jnp.transpose(weights, (0, 2, 1))                          # (B,G,N)
    R = jnp.einsum('bgnj,bgn,bgnl->bgjl', pc, wT, pc)               # (B,G,3,3)
    cond = (weights.sum(1) > 1).astype(jnp.float32)[:, :, None, None]
    noise = jax.random.normal(noise_key, R.shape, jnp.float32)
    # TODO(synk): torch.linalg.eigh has no Pallas equivalent; done in plain JAX.
    lambdas, v = jnp.linalg.eigh(cond * R + (1.0 - cond) * noise)
    return lax.stop_gradient(v), lax.stop_gradient(center), lambdas


def init_linear(key, d_in, d_out):
    kw, kb = jax.random.split(key)
    lim = 1.0 / (d_in ** 0.5)
    w = jax.random.uniform(kw, (d_in, d_out), jnp.float32, -lim, lim)
    b = jax.random.uniform(kb, (1, d_out), jnp.float32, -lim, lim)
    return w, b


def init_params(key, *, local_n_size, a_out, b_out):
    a_in = b_in = 4                      # in_features_size == 0 branch in __init__
    d_in = local_n_size * 3 + 3
    dims1 = [d_in] + [_fs(a_in * i, b_in * i) for i in range(2, 7)]
    d_cat = sum(dims1[1:]) + _fs(a_in * 6, b_in * 6)                # 416
    d_out = _fs(a_out, b_out) + 3
    dims2 = [d_cat, 256, 256, 128, d_out]
    keys = jax.random.split(key, 9)
    params = []
    for i in range(5):
        params.append(init_linear(keys[i], dims1[i], dims1[i + 1]))
    for i in range(4):
        params.append(init_linear(keys[5 + i], dims2[i], dims2[i + 1]))
    return params


def apen_block_forward(point_cloud, normals, dr_w, params, *,
                       weight_threshold, local_n_size, a_out, b_out,
                       noise_key, it=0):
    B, N, _ = point_cloud.shape
    G = dr_w.shape[-1]
    L = local_n_size
    weights = dr_w                         # forward() overrides weights with dr_w
    output = {}

    frames, centers, lambdas = get_frame(point_cloud, weights, noise_key)
    output[f'debug_{it}_lambdas'] = lambdas
    output[f'debug_{it}_frames'] = frames

    F_ops = OPS[None, :, None, None, :] * frames[:, None]          # (B,8,G,3,3)

    # soft-weighted kNN neighbor selection
    ww = jnp.einsum('bng,bmg->bnm', weights, weights)
    dist2 = ((point_cloud[:, :, None, :] - point_cloud[:, None, :, :]) ** 2).sum(-1)
    d = ww * dist2 + (1.0 - ww) * 1000.0
    # TODO(synk): topk/gather has no clean Pallas equivalent; plain JAX lax.top_k.
    _, idx = lax.top_k(-d, L)
    pnts_n = jax.vmap(lambda p, i: p[i])(point_cloud, idx)          # (B,N,L,3)

    wT = jnp.transpose(weights, (0, 2, 1))                          # (B,G,N)
    wT5 = wT[:, :, :, None, None]
    c5 = centers[:, :, :, None, :]                                  # (B,G,1,1,3)
    v1 = (1.0 - wT5) * c5 + wT5 * pnts_n[:, None] - c5              # (B,G,N,L,3)
    output[f'debug_{it}_input_before'] = v1
    framed1 = jnp.einsum('bogij,bgnli->bognlj', F_ops, v1)          # (B,8,G,N,L,3)
    output[f'debug_{it}_input_aftrer'] = framed1

    nrm = normals[:, None, :, None, :]
    term1 = nrm * wT5                                               # (B,G,N,1,3)
    tsum = term1.sum(2, keepdims=True)
    wsum = jnp.transpose(weights.sum(1, keepdims=True), (0, 2, 1))[:, :, :, None, None]
    v2 = term1 + (1.0 - wT5) * (tsum / (wsum + 1e-6))               # (B,G,N,1,3)
    output[f'debug_{it}_v2_before'] = v2
    framed2 = jnp.einsum('bogij,bgnli->bognlj', F_ops, v2)          # (B,8,G,N,1,3)
    output[f'debug_{it}_v2_after'] = framed2

    # Kernel input produced directly group/feature-major (groups ordered
    # (b, g, op), features ordered (l, j) like framed_input.flatten(-2)):
    # no separate full-tensor transpose pass before the kernel.
    x1 = jnp.einsum('bogij,bgnli->bgoljn', F_ops, v1).reshape(B * G * N_OPS, L * 3, N)
    x2 = jnp.einsum('bogij,bgnli->bgoljn', F_ops, v2).reshape(B * G * N_OPS, 3, N)
    x_gfm = jnp.concatenate([x1, x2], axis=1)                       # (BG8, 3L+3, N)

    w_g = jnp.broadcast_to(wT[:, :, None, :], (B, G, N_OPS, N)).reshape(
        B * G * N_OPS, N)
    msk_g = (w_g >= weight_threshold).astype(jnp.float32)
    wm_g = w_g * msk_g

    ff_g = run_apen_mlp(x_gfm, wm_g, msk_g, params)                 # (BG8, N, d_out)
    ff = ff_g.reshape(B, G, N_OPS, N, -1)                           # dense outs4

    mask_bgn = (wT >= weight_threshold).astype(jnp.float32)         # (B,G,N)
    wd = (wT * mask_bgn)[..., None]                                 # dense weights

    # frames per sparse point, densified + masked (the "gg" tensor)
    gg = mask_bgn[:, :, None, :, None, None] * jnp.broadcast_to(
        jnp.transpose(F_ops, (0, 2, 1, 3, 4))[:, :, :, None],
        (B, G, N_OPS, N, 3, 3))                                     # (B,G,8,N,3,3)

    ff_inv = ff[..., :a_out].mean(2)                                # (B,G,N,a_out)
    ff_eq = ff[..., a_out:].reshape(B, G, N_OPS, N, b_out + 1, 3)
    sd = jnp.einsum('bgonij,bgonkj->bgnik', gg, ff_eq) / N_OPS      # (B,G,N,3,K)
    sd = jnp.swapaxes(sd, -1, -2)                                   # (B,G,N,K,3)
    output[f'debug_{it}_equiv_output'] = sd

    output[f'{it}_seeds_features_inv'] = (wd * ff_inv).sum(1)       # (B,N,a_out)
    cur_eq = wd[..., None] * sd[:, :, :, 1:]                        # (B,G,N,b_out,3)
    output[f'{it}_seeds_features_equiv'] = cur_eq.sum(1)            # (B,N,b_out,3)

    disp = sd[:, :, :, 0]                                           # (B,G,N,3)
    pc_dense = mask_bgn[..., None] * point_cloud[:, None, :, :]
    output[f'{it}_predicted_seeds'] = wd * (pc_dense + disp)        # (B,G,N,3)
    return output


# --------------------------------------------------------------------------
if __name__ == "__main__":
    B, N, G, L = 2, 16, 2, 4
    A_OUT, B_OUT = 4, 2
    # threshold 0.0 keeps every point -> dense layout matches ME dense shapes
    WEIGHT_THRESHOLD = 0.0

    key = jax.random.PRNGKey(0)
    k_pc, k_nrm, k_w, k_noise, k_par = jax.random.split(key, 5)
    point_cloud = jax.random.normal(k_pc, (B, N, 3), jnp.float32)
    normals = jax.random.normal(k_nrm, (B, N, 3), jnp.float32)
    normals = normals / (jnp.linalg.norm(normals, axis=-1, keepdims=True) + 1e-8)
    dr_w = jax.random.uniform(k_w, (B, N, G), jnp.float32, minval=0.05, maxval=1.0)

    params = init_params(k_par, local_n_size=L, a_out=A_OUT, b_out=B_OUT)

    out = apen_block_forward(point_cloud, normals, dr_w, params,
                             weight_threshold=WEIGHT_THRESHOLD,
                             local_n_size=L, a_out=A_OUT, b_out=B_OUT,
                             noise_key=k_noise, it=0)
    out = jax.block_until_ready(out)
    for name, val in out.items():
        assert bool(jnp.all(jnp.isfinite(val))), name
    print("KERNEL_OK")
</pallas_src>

<mosaic_0001>
module attributes {stable_mosaic.version = 11 : i64} {
  func.func @apen_mlp_kernel(%arg0: i32, %arg1: memref<1x16x256xbf16, #tpu.memory_space<vmem>>, %arg2: memref<1x2x256xf32, #tpu.memory_space<vmem>>, %arg3: memref<256x16xbf16, #tpu.memory_space<vmem>>, %arg4: memref<16x256xbf16, #tpu.memory_space<vmem>>, %arg5: memref<32x16xbf16, #tpu.memory_space<vmem>>, %arg6: memref<32x1xf32, #tpu.memory_space<vmem>>, %arg7: memref<48x32xbf16, #tpu.memory_space<vmem>>, %arg8: memref<48x1xf32, #tpu.memory_space<vmem>>, %arg9: memref<64x48xbf16, #tpu.memory_space<vmem>>, %arg10: memref<64x1xf32, #tpu.memory_space<vmem>>, %arg11: memref<80x64xbf16, #tpu.memory_space<vmem>>, %arg12: memref<80x1xf32, #tpu.memory_space<vmem>>, %arg13: memref<104x80xbf16, #tpu.memory_space<vmem>>, %arg14: memref<104x1xf32, #tpu.memory_space<vmem>>, %arg15: memref<256x416xbf16, #tpu.memory_space<vmem>>, %arg16: memref<256x1xf32, #tpu.memory_space<vmem>>, %arg17: memref<256x256xbf16, #tpu.memory_space<vmem>>, %arg18: memref<256x1xf32, #tpu.memory_space<vmem>>, %arg19: memref<128x256xbf16, #tpu.memory_space<vmem>>, %arg20: memref<128x1xf32, #tpu.memory_space<vmem>>, %arg21: memref<16x128xbf16, #tpu.memory_space<vmem>>, %arg22: memref<16x1xf32, #tpu.memory_space<vmem>>, %arg23: memref<1x16x256xf32, #tpu.memory_space<vmem>>, %arg24: memref<416x256xbf16, #tpu.memory_space<vmem>>) attributes {dimension_semantics = [#tpu.dimension_semantics<parallel>], iteration_bounds = array<i64: 2>, scalar_prefetch = 0 : i64, scratch_operands = 1 : i64, tpu.core_type = #tpu.core_type<tc>, window_params = [{transform_indices = @transform_0, window_bounds = array<i64: 1, 16, 256>}, {transform_indices = @transform_1, window_bounds = array<i64: 1, 2, 256>}, {pipeline_mode = #tpu.pipeline_mode<synchronous>, transform_indices = @transform_2, window_bounds = array<i64: 256, 16>}, {pipeline_mode = #tpu.pipeline_mode<synchronous>, transform_indices = @transform_3, window_bounds = array<i64: 16, 256>}, {pipeline_mode = #tpu.pipeline_mode<synchronous>, transform_indices = @transform_4, window_bounds = array<i64: 32, 16>}, {pipeline_mode = #tpu.pipeline_mode<synchronous>, transform_indices = @transform_5, window_bounds = array<i64: 32, 1>}, {pipeline_mode = #tpu.pipeline_mode<synchronous>, transform_indices = @transform_6, window_bounds = array<i64: 48, 32>}, {pipeline_mode = #tpu.pipeline_mode<synchronous>, transform_indices = @transform_7, window_bounds = array<i64: 48, 1>}, {pipeline_mode = #tpu.pipeline_mode<synchronous>, transform_indices = @transform_8, window_bounds = array<i64: 64, 48>}, {pipeline_mode = #tpu.pipeline_mode<synchronous>, transform_indices = @transform_9, window_bounds = array<i64: 64, 1>}, {pipeline_mode = #tpu.pipeline_mode<synchronous>, transform_indices = @transform_10, window_bounds = array<i64: 80, 64>}, {pipeline_mode = #tpu.pipeline_mode<synchronous>, transform_indices = @transform_11, window_bounds = array<i64: 80, 1>}, {pipeline_mode = #tpu.pipeline_mode<synchronous>, transform_indices = @transform_12, window_bounds = array<i64: 104, 80>}, {pipeline_mode = #tpu.pipeline_mode<synchronous>, transform_indices = @transform_13, window_bounds = array<i64: 104, 1>}, {pipeline_mode = #tpu.pipeline_mode<synchronous>, transform_indices = @transform_14, window_bounds = array<i64: 256, 416>}, {pipeline_mode = #tpu.pipeline_mode<synchronous>, transform_indices = @transform_15, window_bounds = array<i64: 256, 1>}, {pipeline_mode = #tpu.pipeline_mode<synchronous>, transform_indices = @transform_16, window_bounds = array<i64: 256, 256>}, {pipeline_mode = #tpu.pipeline_mode<synchronous>, transform_indices = @transform_17, window_bounds = array<i64: 256, 1>}, {pipeline_mode = #tpu.pipeline_mode<synchronous>, transform_indices = @transform_18, window_bounds = array<i64: 128, 256>}, {pipeline_mode = #tpu.pipeline_mode<synchronous>, transform_indices = @transform_19, window_bounds = array<i64: 128, 1>}, {pipeline_mode = #tpu.pipeline_mode<synchronous>, transform_indices = @transform_20, window_bounds = array<i64: 16, 128>}, {pipeline_mode = #tpu.pipeline_mode<synchronous>, transform_indices = @transform_21, window_bounds = array<i64: 16, 1>}, {transform_indices = @transform_22, window_bounds = array<i64: 1, 16, 256>}]} {
    %c0 = arith.constant 0 : index
    %c0_0 = arith.constant 0 : index
    %c0_1 = arith.constant 0 : index
    %0 = vector.load %arg1[%c0, %c0_0, %c0_1] : memref<1x16x256xbf16, #tpu.memory_space<vmem>>, vector<1x16x256xbf16>
    %1 = vector.shape_cast %0 : vector<1x16x256xbf16> to vector<16x256xbf16>
    %c0_2 = arith.constant 0 : index
    %c0_3 = arith.constant 0 : index
    %c0_4 = arith.constant 0 : index
    %2 = vector.load %arg2[%c0_2, %c0_3, %c0_4] : memref<1x2x256xf32, #tpu.memory_space<vmem>>, vector<1x2x256xf32>
    %3 = vector.shape_cast %2 : vector<1x2x256xf32> to vector<2x256xf32>
    %4 = vector.extract_strided_slice %3 {offsets = [0, 0], sizes = [1, 256], strides = [1, 1]} : vector<2x256xf32> to vector<1x256xf32>
    %5 = vector.extract_strided_slice %3 {offsets = [1, 0], sizes = [1, 256], strides = [1, 1]} : vector<2x256xf32> to vector<1x256xf32>
    %c0_5 = arith.constant 0 : index
    %c0_6 = arith.constant 0 : index
    %6 = vector.load %arg5[%c0_5, %c0_6] : memref<32x16xbf16, #tpu.memory_space<vmem>>, vector<32x16xbf16>
    %cst = arith.constant dense<0.000000e+00> : vector<32x256xf32>
    %7 = tpu.matmul %6, %1, %cst {dimension_numbers = #tpu.dot_dimension_numbers<[1], [0], [0], [1], [0, 0, 1, 1], [], []>} : vector<32x16xbf16>, vector<16x256xbf16>, vector<32x256xf32> -> vector<32x256xf32>
    %c0_7 = arith.constant 0 : index
    %c0_8 = arith.constant 0 : index
    %8 = vector.load %arg6[%c0_7, %c0_8] : memref<32x1xf32, #tpu.memory_space<vmem>>, vector<32x1xf32>
    %9 = vector.broadcast %8 : vector<32x1xf32> to vector<32x256xf32>
    %10 = arith.addf %7, %9 : vector<32x256xf32>
    %cst_9 = arith.constant 0.000000e+00 : f32
    %11 = vector.broadcast %cst_9 : f32 to vector<32x256xf32>
    %12 = arith.maximumf %10, %11 : vector<32x256xf32>
    %13 = arith.truncf %12 : vector<32x256xf32> to vector<32x256xbf16>
    %c0_10 = arith.constant 0 : index
    %c0_11 = arith.constant 0 : index
    %14 = vector.load %arg7[%c0_10, %c0_11] : memref<48x32xbf16, #tpu.memory_space<vmem>>, vector<48x32xbf16>
    %cst_12 = arith.constant dense<0.000000e+00> : vector<48x256xf32>
    %15 = tpu.matmul %14, %13, %cst_12 {dimension_numbers = #tpu.dot_dimension_numbers<[1], [0], [0], [1], [0, 0, 1, 1], [], []>} : vector<48x32xbf16>, vector<32x256xbf16>, vector<48x256xf32> -> vector<48x256xf32>
    %c0_13 = arith.constant 0 : index
    %c0_14 = arith.constant 0 : index
    %16 = vector.load %arg8[%c0_13, %c0_14] : memref<48x1xf32, #tpu.memory_space<vmem>>, vector<48x1xf32>
    %17 = vector.broadcast %16 : vector<48x1xf32> to vector<48x256xf32>
    %18 = arith.addf %15, %17 : vector<48x256xf32>
    %cst_15 = arith.constant 0.000000e+00 : f32
    %19 = vector.broadcast %cst_15 : f32 to vector<48x256xf32>
    %20 = arith.maximumf %18, %19 : vector<48x256xf32>
    %21 = arith.truncf %20 : vector<48x256xf32> to vector<48x256xbf16>
    %c0_16 = arith.constant 0 : index
    %c0_17 = arith.constant 0 : index
    %22 = vector.load %arg9[%c0_16, %c0_17] : memref<64x48xbf16, #tpu.memory_space<vmem>>, vector<64x48xbf16>
    %cst_18 = arith.constant dense<0.000000e+00> : vector<64x256xf32>
    %23 = tpu.matmul %22, %21, %cst_18 {dimension_numbers = #tpu.dot_dimension_numbers<[1], [0], [0], [1], [0, 0, 1, 1], [], []>} : vector<64x48xbf16>, vector<48x256xbf16>, vector<64x256xf32> -> vector<64x256xf32>
    %c0_19 = arith.constant 0 : index
    %c0_20 = arith.constant 0 : index
    %24 = vector.load %arg10[%c0_19, %c0_20] : memref<64x1xf32, #tpu.memory_space<vmem>>, vector<64x1xf32>
    %25 = vector.broadcast %24 : vector<64x1xf32> to vector<64x256xf32>
    %26 = arith.addf %23, %25 : vector<64x256xf32>
    %cst_21 = arith.constant 0.000000e+00 : f32
    %27 = vector.broadcast %cst_21 : f32 to vector<64x256xf32>
    %28 = arith.maximumf %26, %27 : vector<64x256xf32>
    %29 = arith.truncf %28 : vector<64x256xf32> to vector<64x256xbf16>
    %c0_22 = arith.constant 0 : index
    %c0_23 = arith.constant 0 : index
    %30 = vector.load %arg11[%c0_22, %c0_23] : memref<80x64xbf16, #tpu.memory_space<vmem>>, vector<80x64xbf16>
    %cst_24 = arith.constant dense<0.000000e+00> : vector<80x256xf32>
    %31 = tpu.matmul %30, %29, %cst_24 {dimension_numbers = #tpu.dot_dimension_numbers<[1], [0], [0], [1], [0, 0, 1, 1], [], []>} : vector<80x64xbf16>, vector<64x256xbf16>, vector<80x256xf32> -> vector<80x256xf32>
    %c0_25 = arith.constant 0 : index
    %c0_26 = arith.constant 0 : index
    %32 = vector.load %arg12[%c0_25, %c0_26] : memref<80x1xf32, #tpu.memory_space<vmem>>, vector<80x1xf32>
    %33 = vector.broadcast %32 : vector<80x1xf32> to vector<80x256xf32>
    %34 = arith.addf %31, %33 : vector<80x256xf32>
    %cst_27 = arith.constant 0.000000e+00 : f32
    %35 = vector.broadcast %cst_27 : f32 to vector<80x256xf32>
    %36 = arith.maximumf %34, %35 : vector<80x256xf32>
    %37 = arith.truncf %36 : vector<80x256xf32> to vector<80x256xbf16>
    %c0_28 = arith.constant 0 : index
    %c0_29 = arith.constant 0 : index
    %38 = vector.load %arg13[%c0_28, %c0_29] : memref<104x80xbf16, #tpu.memory_space<vmem>>, vector<104x80xbf16>
    %cst_30 = arith.constant dense<0.000000e+00> : vector<104x256xf32>
    %39 = tpu.matmul %38, %37, %cst_30 {dimension_numbers = #tpu.dot_dimension_numbers<[1], [0], [0], [1], [0, 0, 1, 1], [], []>} : vector<104x80xbf16>, vector<80x256xbf16>, vector<104x256xf32> -> vector<104x256xf32>
    %c0_31 = arith.constant 0 : index
    %c0_32 = arith.constant 0 : index
    %40 = vector.load %arg14[%c0_31, %c0_32] : memref<104x1xf32, #tpu.memory_space<vmem>>, vector<104x1xf32>
    %41 = vector.broadcast %40 : vector<104x1xf32> to vector<104x256xf32>
    %42 = arith.addf %39, %41 : vector<104x256xf32>
    %c0_33 = arith.constant 0 : index
    %c0_34 = arith.constant 0 : index
    %43 = vector.load %arg24[%c0_33, %c0_34] : memref<416x256xbf16, #tpu.memory_space<vmem>>, vector<32x256xbf16>
    tpu.vector_store %arg24[%c0_33, %c0_34], %13 {strides = array<i32>} : memref<416x256xbf16, #tpu.memory_space<vmem>>, vector<32x256xbf16>,
    %c32 = arith.constant 32 : index
    %c0_35 = arith.constant 0 : index
    %44 = vector.load %arg24[%c32, %c0_35] : memref<416x256xbf16, #tpu.memory_space<vmem>>, vector<48x256xbf16>
    tpu.vector_store %arg24[%c32, %c0_35], %21 {strides = array<i32>} : memref<416x256xbf16, #tpu.memory_space<vmem>>, vector<48x256xbf16>,
    %c80 = arith.constant 80 : index
    %c0_36 = arith.constant 0 : index
    %45 = vector.load %arg24[%c80, %c0_36] : memref<416x256xbf16, #tpu.memory_space<vmem>>, vector<64x256xbf16>
    tpu.vector_store %arg24[%c80, %c0_36], %29 {strides = array<i32>} : memref<416x256xbf16, #tpu.memory_space<vmem>>, vector<64x256xbf16>,
    %c144 = arith.constant 144 : index
    %c0_37 = arith.constant 0 : index
    %46 = vector.load %arg24[%c144, %c0_37] : memref<416x256xbf16, #tpu.memory_space<vmem>>, vector<80x256xbf16>
    tpu.vector_store %arg24[%c144, %c0_37], %37 {strides = array<i32>} : memref<416x256xbf16, #tpu.memory_space<vmem>>, vector<80x256xbf16>,
    %47 = vector.extract_strided_slice %42 {offsets = [0, 0], sizes = [96, 256], strides = [1, 1]} : vector<104x256xf32> to vector<96x256xf32>
    %48 = arith.truncf %47 : vector<96x256xf32> to vector<96x256xbf16>
    %c224 = arith.constant 224 : index
    %c0_38 = arith.constant 0 : index
    %49 = vector.load %arg24[%c224, %c0_38] : memref<416x256xbf16, #tpu.memory_space<vmem>>, vector<96x256xbf16>
    tpu.vector_store %arg24[%c224, %c0_38], %48 {strides = array<i32>} : memref<416x256xbf16, #tpu.memory_space<vmem>>, vector<96x256xbf16>,
    %50 = vector.broadcast %4 : vector<1x256xf32> to vector<104x256xf32>
    %51 = arith.mulf %50, %42 : vector<104x256xf32>
    %52 = arith.truncf %51 : vector<104x256xf32> to vector<104x256xbf16>
    %c0_39 = arith.constant 0 : index
    %c0_40 = arith.constant 0 : index
    %53 = vector.load %arg3[%c0_39, %c0_40] : memref<256x16xbf16, #tpu.memory_space<vmem>>, vector<256x16xbf16>
    %cst_41 = arith.constant dense<0.000000e+00> : vector<104x16xf32>
    %54 = tpu.matmul %52, %53, %cst_41 {dimension_numbers = #tpu.dot_dimension_numbers<[1], [0], [0], [1], [0, 0, 1, 1], [], []>} : vector<104x256xbf16>, vector<256x16xbf16>, vector<104x16xf32> -> vector<104x16xf32>
    %55 = vector.extract_strided_slice %54 {offsets = [0, 0], sizes = [96, 16], strides = [1, 1]} : vector<104x16xf32> to vector<96x16xf32>
    %56 = vector.extract_strided_slice %54 {offsets = [96, 0], sizes = [1, 16], strides = [1, 1]} : vector<104x16xf32> to vector<1x16xf32>
    %cst_42 = arith.constant 9.99999974E-6 : f32
    %57 = vector.broadcast %cst_42 : f32 to vector<1x16xf32>
    %58 = arith.addf %56, %57 : vector<1x16xf32>
    %59 = tpu.reciprocal %58 {approx = true} : vector<1x16xf32> -> vector<1x16xf32>
    %60 = vector.broadcast %59 : vector<1x16xf32> to vector<96x16xf32>
    %61 = arith.mulf %55, %60 : vector<96x16xf32>
    %62 = arith.truncf %61 : vector<96x16xf32> to vector<96x16xbf16>
    %c0_43 = arith.constant 0 : index
    %c0_44 = arith.constant 0 : index
    %63 = vector.load %arg4[%c0_43, %c0_44] : memref<16x256xbf16, #tpu.memory_space<vmem>>, vector<16x256xbf16>
    %cst_45 = arith.constant dense<0.000000e+00> : vector<96x256xf32>
    %64 = tpu.matmul %62, %63, %cst_45 {dimension_numbers = #tpu.dot_dimension_numbers<[1], [0], [0], [1], [0, 0, 1, 1], [], []>} : vector<96x16xbf16>, vector<16x256xbf16>, vector<96x256xf32> -> vector<96x256xf32>
    %65 = arith.truncf %64 : vector<96x256xf32> to vector<96x256xbf16>
    %c320 = arith.constant 320 : index
    %c0_46 = arith.constant 0 : index
    %66 = vector.load %arg24[%c320, %c0_46] : memref<416x256xbf16, #tpu.memory_space<vmem>>, vector<96x256xbf16>
    tpu.vector_store %arg24[%c320, %c0_46], %65 {strides = array<i32>} : memref<416x256xbf16, #tpu.memory_space<vmem>>, vector<96x256xbf16>,
    %c0_47 = arith.constant 0 : index
    %c0_48 = arith.constant 0 : index
    %67 = vector.load %arg24[%c0_47, %c0_48] : memref<416x256xbf16, #tpu.memory_space<vmem>>, vector<416x256xbf16>
    %c0_49 = arith.constant 0 : index
    %c0_50 = arith.constant 0 : index
    %68 = vector.load %arg15[%c0_49, %c0_50] : memref<256x416xbf16, #tpu.memory_space<vmem>>, vector<256x416xbf16>
    %cst_51 = arith.constant dense<0.000000e+00> : vector<256x256xf32>
    %69 = tpu.matmul %68, %67, %cst_51 {dimension_numbers = #tpu.dot_dimension_numbers<[1], [0], [0], [1], [0, 0, 1, 1], [], []>} : vector<256x416xbf16>, vector<416x256xbf16>, vector<256x256xf32> -> vector<256x256xf32>
    %c0_52 = arith.constant 0 : index
    %c0_53 = arith.constant 0 : index
    %70 = vector.load %arg16[%c0_52, %c0_53] : memref<256x1xf32, #tpu.memory_space<vmem>>, vector<256x1xf32>
    %71 = vector.broadcast %70 : vector<256x1xf32> to vector<256x256xf32>
    %72 = arith.addf %69, %71 : vector<256x256xf32>
    %cst_54 = arith.constant 0.000000e+00 : f32
    %73 = vector.broadcast %cst_54 : f32 to vector<256x256xf32>
    %74 = arith.maximumf %72, %73 : vector<256x256xf32>
    %75 = arith.truncf %74 : vector<256x256xf32> to vector<256x256xbf16>
    %c0_55 = arith.constant 0 : index
    %c0_56 = arith.constant 0 : index
    %76 = vector.load %arg17[%c0_55, %c0_56] : memref<256x256xbf16, #tpu.memory_space<vmem>>, vector<256x256xbf16>
    %cst_57 = arith.constant dense<0.000000e+00> : vector<256x256xf32>
    %77 = tpu.matmul %76, %75, %cst_57 {dimension_numbers = #tpu.dot_dimension_numbers<[1], [0], [0], [1], [0, 0, 1, 1], [], []>} : vector<256x256xbf16>, vector<256x256xbf16>, vector<256x256xf32> -> vector<256x256xf32>
    %c0_58 = arith.constant 0 : index
    %c0_59 = arith.constant 0 : index
    %78 = vector.load %arg18[%c0_58, %c0_59] : memref<256x1xf32, #tpu.memory_space<vmem>>, vector<256x1xf32>
    %79 = vector.broadcast %78 : vector<256x1xf32> to vector<256x256xf32>
    %80 = arith.addf %77, %79 : vector<256x256xf32>
    %cst_60 = arith.constant 0.000000e+00 : f32
    %81 = vector.broadcast %cst_60 : f32 to vector<256x256xf32>
    %82 = arith.maximumf %80, %81 : vector<256x256xf32>
    %83 = arith.truncf %82 : vector<256x256xf32> to vector<256x256xbf16>
    %c0_61 = arith.constant 0 : index
    %c0_62 = arith.constant 0 : index
    %84 = vector.load %arg19[%c0_61, %c0_62] : memref<128x256xbf16, #tpu.memory_space<vmem>>, vector<128x256xbf16>
    %cst_63 = arith.constant dense<0.000000e+00> : vector<128x256xf32>
    %85 = tpu.matmul %84, %83, %cst_63 {dimension_numbers = #tpu.dot_dimension_numbers<[1], [0], [0], [1], [0, 0, 1, 1], [], []>} : vector<128x256xbf16>, vector<256x256xbf16>, vector<128x256xf32> -> vector<128x256xf32>
    %c0_64 = arith.constant 0 : index
    %c0_65 = arith.constant 0 : index
    %86 = vector.load %arg20[%c0_64, %c0_65] : memref<128x1xf32, #tpu.memory_space<vmem>>, vector<128x1xf32>
    %87 = vector.broadcast %86 : vector<128x1xf32> to vector<128x256xf32>
    %88 = arith.addf %85, %87 : vector<128x256xf32>
    %cst_66 = arith.constant 0.000000e+00 : f32
    %89 = vector.broadcast %cst_66 : f32 to vector<128x256xf32>
    %90 = arith.maximumf %88, %89 : vector<128x256xf32>
    %91 = arith.truncf %90 : vector<128x256xf32> to vector<128x256xbf16>
    %c0_67 = arith.constant 0 : index
    %c0_68 = arith.constant 0 : index
    %92 = vector.load %arg21[%c0_67, %c0_68] : memref<16x128xbf16, #tpu.memory_space<vmem>>, vector<16x128xbf16>
    %cst_69 = arith.constant dense<0.000000e+00> : vector<16x256xf32>
    %93 = tpu.matmul %92, %91, %cst_69 {dimension_numbers = #tpu.dot_dimension_numbers<[1], [0], [0], [1], [0, 0, 1, 1], [], []>} : vector<16x128xbf16>, vector<128x256xbf16>, vector<16x256xf32> -> vector<16x256xf32>
    %c0_70 = arith.constant 0 : index
    %c0_71 = arith.constant 0 : index
    %94 = vector.load %arg22[%c0_70, %c0_71] : memref<16x1xf32, #tpu.memory_space<vmem>>, vector<16x1xf32>
    %95 = vector.broadcast %94 : vector<16x1xf32> to vector<16x256xf32>
    %96 = arith.addf %93, %95 : vector<16x256xf32>
    %97 = vector.broadcast %5 : vector<1x256xf32> to vector<16x256xf32>
    %98 = arith.mulf %96, %97 : vector<16x256xf32>
    %c0_72 = arith.constant 0 : index
    %c0_73 = arith.constant 0 : index
    %c0_74 = arith.constant 0 : index
    %99 = vector.load %arg23[%c0_72, %c0_73, %c0_74] : memref<1x16x256xf32, #tpu.memory_space<vmem>>, vector<1x16x256xf32>
    %100 = vector.shape_cast %99 : vector<1x16x256xf32> to vector<16x256xf32>
    %101 = vector.shape_cast %98 : vector<16x256xf32> to vector<1x16x256xf32>
    tpu.vector_store %arg23[%c0_72, %c0_73, %c0_74], %101 {strides = array<i32>} : memref<1x16x256xf32, #tpu.memory_space<vmem>>, vector<1x16x256xf32>,
    return
  }
  func.func @transform_0(%arg0: i32) -> (i32, i32, i32) {
    %c0_i32 = arith.constant 0 : i32
    %c0_i32_0 = arith.constant 0 : i32
    %c0_i32_1 = arith.constant 0 : i32
    return %arg0, %c0_i32, %c0_i32_0 : i32, i32, i32
  }
  func.func @transform_1(%arg0: i32) -> (i32, i32, i32) {
    %c0_i32 = arith.constant 0 : i32
    %c0_i32_0 = arith.constant 0 : i32
    %c0_i32_1 = arith.constant 0 : i32
    return %arg0, %c0_i32, %c0_i32_0 : i32, i32, i32
  }
  func.func @transform_2(%arg0: i32) -> (i32, i32) {
    %c0_i32 = arith.constant 0 : i32
    %c0_i32_0 = arith.constant 0 : i32
    %c0_i32_1 = arith.constant 0 : i32
    return %c0_i32, %c0_i32_0 : i32, i32
  }
  func.func @transform_3(%arg0: i32) -> (i32, i32) {
    %c0_i32 = arith.constant 0 : i32
    %c0_i32_0 = arith.constant 0 : i32
    %c0_i32_1 = arith.constant 0 : i32
    return %c0_i32, %c0_i32_0 : i32, i32
  }
  func.func @transform_4(%arg0: i32) -> (i32, i32) {
    %c0_i32 = arith.constant 0 : i32
    %c0_i32_0 = arith.constant 0 : i32
    %c0_i32_1 = arith.constant 0 : i32
    return %c0_i32, %c0_i32_0 : i32, i32
  }
  func.func @transform_5(%arg0: i32) -> (i32, i32) {
    %c0_i32 = arith.constant 0 : i32
    %c0_i32_0 = arith.constant 0 : i32
    %c0_i32_1 = arith.constant 0 : i32
    return %c0_i32, %c0_i32_0 : i32, i32
  }
  func.func @transform_6(%arg0: i32) -> (i32, i32) {
    %c0_i32 = arith.constant 0 : i32
    %c0_i32_0 = arith.constant 0 : i32
    %c0_i32_1 = arith.constant 0 : i32
    return %c0_i32, %c0_i32_0 : i32, i32
  }
  func.func @transform_7(%arg0: i32) -> (i32, i32) {
    %c0_i32 = arith.constant 0 : i32
    %c0_i32_0 = arith.constant 0 : i32
    %c0_i32_1 = arith.constant 0 : i32
    return %c0_i32, %c0_i32_0 : i32, i32
  }
  func.func @transform_8(%arg0: i32) -> (i32, i32) {
    %c0_i32 = arith.constant 0 : i32
    %c0_i32_0 = arith.constant 0 : i32
    %c0_i32_1 = arith.constant 0 : i32
    return %c0_i32, %c0_i32_0 : i32, i32
  }
  func.func @transform_9(%arg0: i32) -> (i32, i32) {
    %c0_i32 = arith.constant 0 : i32
    %c0_i32_0 = arith.constant 0 : i32
    %c0_i32_1 = arith.constant 0 : i32
    return %c0_i32, %c0_i32_0 : i32, i32
  }
  func.func @transform_10(%arg0: i32) -> (i32, i32) {
    %c0_i32 = arith.constant 0 : i32
    %c0_i32_0 = arith.constant 0 : i32
    %c0_i32_1 = arith.constant 0 : i32
    return %c0_i32, %c0_i32_0 : i32, i32
  }
  func.func @transform_11(%arg0: i32) -> (i32, i32) {
    %c0_i32 = arith.constant 0 : i32
    %c0_i32_0 = arith.constant 0 : i32
    %c0_i32_1 = arith.constant 0 : i32
    return %c0_i32, %c0_i32_0 : i32, i32
  }
  func.func @transform_12(%arg0: i32) -> (i32, i32) {
    %c0_i32 = arith.constant 0 : i32
    %c0_i32_0 = arith.constant 0 : i32
    %c0_i32_1 = arith.constant 0 : i32
    return %c0_i32, %c0_i32_0 : i32, i32
  }
  func.func @transform_13(%arg0: i32) -> (i32, i32) {
    %c0_i32 = arith.constant 0 : i32
    %c0_i32_0 = arith.constant 0 : i32
    %c0_i32_1 = arith.constant 0 : i32
    return %c0_i32, %c0_i32_0 : i32, i32
  }
  func.func @transform_14(%arg0: i32) -> (i32, i32) {
    %c0_i32 = arith.constant 0 : i32
    %c0_i32_0 = arith.constant 0 : i32
    %c0_i32_1 = arith.constant 0 : i32
    return %c0_i32, %c0_i32_0 : i32, i32
  }
  func.func @transform_15(%arg0: i32) -> (i32, i32) {
    %c0_i32 = arith.constant 0 : i32
    %c0_i32_0 = arith.constant 0 : i32
    %c0_i32_1 = arith.constant 0 : i32
    return %c0_i32, %c0_i32_0 : i32, i32
  }
  func.func @transform_16(%arg0: i32) -> (i32, i32) {
    %c0_i32 = arith.constant 0 : i32
    %c0_i32_0 = arith.constant 0 : i32
    %c0_i32_1 = arith.constant 0 : i32
    return %c0_i32, %c0_i32_0 : i32, i32
  }
  func.func @transform_17(%arg0: i32) -> (i32, i32) {
    %c0_i32 = arith.constant 0 : i32
    %c0_i32_0 = arith.constant 0 : i32
    %c0_i32_1 = arith.constant 0 : i32
    return %c0_i32, %c0_i32_0 : i32, i32
  }
  func.func @transform_18(%arg0: i32) -> (i32, i32) {
    %c0_i32 = arith.constant 0 : i32
    %c0_i32_0 = arith.constant 0 : i32
    %c0_i32_1 = arith.constant 0 : i32
    return %c0_i32, %c0_i32_0 : i32, i32
  }
  func.func @transform_19(%arg0: i32) -> (i32, i32) {
    %c0_i32 = arith.constant 0 : i32
    %c0_i32_0 = arith.constant 0 : i32
    %c0_i32_1 = arith.constant 0 : i32
    return %c0_i32, %c0_i32_0 : i32, i32
  }
  func.func @transform_20(%arg0: i32) -> (i32, i32) {
    %c0_i32 = arith.constant 0 : i32
    %c0_i32_0 = arith.constant 0 : i32
    %c0_i32_1 = arith.constant 0 : i32
    return %c0_i32, %c0_i32_0 : i32, i32
  }
  func.func @transform_21(%arg0: i32) -> (i32, i32) {
    %c0_i32 = arith.constant 0 : i32
    %c0_i32_0 = arith.constant 0 : i32
    %c0_i32_1 = arith.constant 0 : i32
    return %c0_i32, %c0_i32_0 : i32, i32
  }
  func.func @transform_22(%arg0: i32) -> (i32, i32, i32) {
    %c0_i32 = arith.constant 0 : i32
    %c0_i32_0 = arith.constant 0 : i32
    %c0_i32_1 = arith.constant 0 : i32
    return %arg0, %c0_i32, %c0_i32_0 : i32, i32, i32
  }
}

</mosaic_0001>

<bundles_post_ra>
// kernel: tpu_custom_call.1
= control target key start
LH: loop header
LB: loop body
LE: loop exit
PB: predicated region body
PF: predicated region fallthrough
CT: control target
= control target key end

     0   :  { %s9527_s0 = inlined_call_operand.vmem [shape: bf16[2,16,256], index: 0, kind: input, shape index: {}]   ;;  %s9528_s1 = inlined_call_operand.vmem [shape: f32[2,2,256], index: 1, kind: input, shape index: {}]   ;;  %s9529_s2 = inlined_call_operand.vmem [shape: bf16[256,16], index: 2, kind: input, shape index: {}]   ;;  %s9530_s3 = inlined_call_operand.vmem [shape: bf16[16,256], index: 3, kind: input, shape index: {}]   ;;  %s9531_s4 = inlined_call_operand.vmem [shape: bf16[32,16], index: 4, kind: input, shape index: {}]   ;;  %s9532_s5 = inlined_call_operand.vmem [shape: f32[32,1], index: 5, kind: input, shape index: {}]   ;;  %s9533_s6 = inlined_call_operand.vmem [shape: bf16[48,32], index: 6, kind: input, shape index: {}]   ;;  %s9534_s7 = inlined_call_operand.vmem [shape: f32[48,1], index: 7, kind: input, shape index: {}]   ;;  %s9535_s8 = inlined_call_operand.vmem [shape: bf16[64,48], index: 8, kind: input, shape index: {}]   ;;  %s9536_s9 = inlined_call_operand.vmem [shape: f32[64,1], index: 9, kind: input, shape index: {}]   ;;  %s9537_s10 = inlined_call_operand.vmem [shape: bf16[80,64], index: 10, kind: input, shape index: {}]   ;;  %s9538_s11 = inlined_call_operand.vmem [shape: f32[80,1], index: 11, kind: input, shape index: {}]   ;;  %s9539_s12 = inlined_call_operand.vmem [shape: bf16[104,80], index: 12, kind: input, shape index: {}]   ;;  %s9540_s13 = inlined_call_operand.vmem [shape: f32[104,1], index: 13, kind: input, shape index: {}]   ;;  %s9541_s14 = inlined_call_operand.vmem [shape: bf16[256,416], index: 14, kind: input, shape index: {}]   ;;  %s9542_s15 = inlined_call_operand.vmem [shape: f32[256,1], index: 15, kind: input, shape index: {}]   ;;  %s9543_s16 = inlined_call_operand.vmem [shape: bf16[256,256], index: 16, kind: input, shape index: {}]   ;;  %s9544_s17 = inlined_call_operand.vmem [shape: f32[256,1], index: 17, kind: input, shape index: {}]   ;;  %s9545_s18 = inlined_call_operand.vmem [shape: bf16[128,256], index: 18, kind: input, shape index: {}]   ;;  %s9546_s19 = inlined_call_operand.vmem [shape: f32[128,1], index: 19, kind: input, shape index: {}]   ;;  %s9547_s20 = inlined_call_operand.vmem [shape: bf16[16,128], index: 20, kind: input, shape index: {}]   ;;  %s9548_s21 = inlined_call_operand.vmem [shape: f32[16,1], index: 21, kind: input, shape index: {}]   ;;  %s9549_s22 = inlined_call_operand.hbm [shape: f32[2,16,256], index: 22, kind: output, shape index: {}]  }
   0x1   :  { %9667 = sst [smem:[#allocation84_spill]] %s9527_s0 }
   0x2   :  { %9668 = sst [smem:[#allocation85_spill]] %s9528_s1 }
   0x3   :  { %9669 = sst [smem:[#allocation86_spill]] %s9529_s2 }
   0x4   :  { %9670 = sst [smem:[#allocation87_spill]] %s9530_s3 }
   0x5   :  { %9671 = sst [smem:[#allocation88_spill]] %s9531_s4 }
   0x6   :  { %9672 = sst [smem:[#allocation89_spill]] %s9532_s5 }
   0x7   :  { %9673 = sst [smem:[#allocation90_spill]] %s9533_s6 }
   0x8   :  { %9674 = sst [smem:[#allocation91_spill]] %s9534_s7 }
   0x9   :  { %9675 = sst [smem:[#allocation92_spill]] %s9535_s8 }
   0xa   :  { %9676 = sst [smem:[#allocation93_spill]] %s9536_s9 }
   0xb   :  { %9677 = sst [smem:[#allocation94_spill]] %s9537_s10 }
   0xc   :  { %9678 = sst [smem:[#allocation95_spill]] %s9549_s22 }
   0xd   :  { %27 = vsyncpa [#allocation4], 0 }
   0xe   :  { %29 = vsyncpa [#allocation4 + $0x1], 0  ;;  %s6672_s3 = smov 0   ;;  %s6674_s28 = smov 0  }
   0xf   :  { %s6676_s29 = smov 0   ;;  %s6678_s30 = smov 0  }
  0x10 LB: > { %9679 = sst [smem:[#allocation6_spill]] %s6540_s3  ;;  %s6693_s4 = sadd.s32 4294967295, %s6552_s30   ;;  %s6552_s30 = sphi %s6678_s30, %s10045_s30   ;;  %s6548_s29 = sphi %s6676_s29, %s10047_s29   ;;  %s6544_s28 = sphi %s6674_s28, %s10049_s28   ;;  %s6540_s3 = sphi %s6672_s3, %s10048_s3  }
  0x11   : > { %9680 = sst [smem:[#allocation7_spill]] %s6548_s29  ;;  %s5314_s0 = sadd.s32 4294967294, %s6552_s30  }
  0x12   : > { %9681 = sst [smem:[#allocation8_spill]] %s6552_s30  ;;  %s6697_s23 = sadd.s32 1, %s6552_s30  }
  0x13   : > { %9682 = sst [smem:[#allocation9_spill]] %s6697_s23  ;;  %s514_s1 = sadd.s32 1, %s6548_s29 }
  0x14   : > { %s511_s5 = ssub.s32 %s6552_s30, %s6697_s23  ;;  %p524_p0 = scmp.ne.s32.totalorder %s6548_s29, %s6544_s28 }
  0x15   : > { %p512_p1 = scmp.eq.s32.totalorder %s511_s5, 0  ;;  %p525_p2 = scmp.eq.s32.totalorder %s6693_s4, 1 }
  0x16   : > { %p530_p3 = scmp.ne.s32.totalorder %s6544_s28, %s6540_s3  ;;  %p531_p4 = scmp.eq.s32.totalorder %s5314_s0, 1 }
  0x17   : > { %s6708_s24 = scalar_select %p512_p1, %s6548_s29, %s514_s1  }
  0x18   : > { %p6710_p5 = por %p525_p2, %p524_p0  ;;  %p6714_p6 = por %p531_p4, %p530_p3 }
  0x19   : > { %9683 = sst [smem:[#allocation10_spill]] %s6708_s24  ;;  %p5317_p7 = scmp.ge.s32.totalorder %s6552_s30, 1 }
  0x1a   : > { %s9685_s25 = scalar_select %p6714_p6, 1, 0 }
  0x1b   : > { %p625_p8 = scmp.lt.s32.totalorder %s6552_s30, 3 }
  0x1c   : > { %9686 = sst [smem:[#allocation11_spill]] %s9685_s25 }
  0x1d   : > { %p626_p9 = pnand %p5317_p7, %p625_p8 }
  0x1f   : > { %629 = sbr.rel (%p626_p9) target bundleno = 2988 (0xbac), region = 108 }
  0x24   : > { %s9687_s7 = sld [smem:[#allocation91_spill]]  ;;  %p692_p10 = scmp.lt.s32.totalorder %s6693_s4, 1  ;;  %v6554_v3 = vmov 0   ;;  %vm754_vm0 = vcmask 130048   ;;  %v1181_v27 = vld [vmem:[%s9538_s11 + $0x30] sm:$0xff]  ;;  %v1183_v28 = vld [vmem:[%s9538_s11 + $0x40] sm:$0xff] }
  0x25   : > { %s9688_s1 = sld [smem:[#allocation89_spill]]  ;;  %6486 = vset.pattern.permute.xlu2 %v6554_v3  ;;  %6485 = vset.pattern.permute.xlu1 %v6554_v3  ;;  %v1184_v29 = vld [vmem:[%s9538_s11 + $0x48] sm:$0xff]  ;;  %v1182_v31 = vld [vmem:[%s9538_s11 + $0x38] sm:$0xff]  ;;  %v1179_v32 = vld [vmem:[%s9538_s11 + $0x20] sm:$0xff]  ;;  %vm888_vm1 = vcmask 261120   ;;  %vm1070_vm2 = vcmask 392192  }
  0x26   : > { %6484 = vset.pattern.permute.xlu0 %v6554_v3  ;;  %s6731_s29 = scalar_select %p692_p10, %s6693_s4, 1  ;;  %v1180_v30 = vld [vmem:[%s9538_s11 + $0x28] sm:$0xff]  ;;  %v1175_v33 = vld [vmem:[%s9538_s11] sm:$0xff]  ;;  %v1177_v34 = vld [vmem:[%s9538_s11 + $0x10] sm:$0xff]  ;;  %vm1300_vm3 = vcmask 523264   ;;  %vm1588_vm4 = vcmask 654336  }
  0x27   : > { %s9689_s27 = sld [smem:[#allocation84_spill]]  ;;  %v1178_v35 = vld [vmem:[%s9538_s11 + $0x18] sm:$0xff]  ;;  %v1428_v36 = vld [vmem:[%s9540_s13 + $0x8] sm:$0xff]  ;;  %v1427_v38 = vld [vmem:[%s9540_s13] sm:$0xff]  ;;  %s689_s24 = sand.u32 1, %s6544_s28  }
  0x28   : > { %s6234_s26 = sshll.u32 %s6731_s29, 4  ;;  %s9690_s2 = sld [smem:[#allocation88_spill]]  ;;  %v1176_v37 = vld [vmem:[%s9538_s11 + $0x8] sm:$0xff]  ;;  %v1431_v39 = vld [vmem:[%s9540_s13 + $0x20] sm:$0xff]  ;;  %v1429_v40 = vld [vmem:[%s9540_s13 + $0x10] sm:$0xff] }
  0x29   : > { %s9691_s9 = sld [smem:[#allocation93_spill]]  ;;  %v1430_v41 = vld [vmem:[%s9540_s13 + $0x18] sm:$0xff]  ;;  %v1432_v43 = vld [vmem:[%s9540_s13 + $0x28] sm:$0xff]  ;;  %v1433_v44 = vld [vmem:[%s9540_s13 + $0x30] sm:$0xff]  ;;  %s5318_s5 = sshll.u32 %s689_s24, 5 }
  0x2a   : > { %v821_v0 = vld [vmem:[%s9687_s7 + $0x20] sm:$0xff]  ;;  %v822_v9 = vld [vmem:[%s9687_s7 + $0x28] sm:$0xff]  ;;  %v819_v15 = vld [vmem:[%s9687_s7 + $0x10] sm:$0xff]  ;;  %s9692_s3 = sld [smem:[#allocation90_spill]]  ;;  %s6441_s23 = sshll.u32 %s6693_s4, 5 }
  0x2b   : > { %v712_v1 = vld [vmem:[%s9688_s1 + $0x10] sm:$0xff]  ;;  %v710_v2 = vld [vmem:[%s9688_s1] sm:$0xff]  ;;  %845 = vperm.xlu2 %6486, %v821_v0   ;;  %v713_v11 = vld [vmem:[%s9688_s1 + $0x18] sm:$0xff]  ;;  %s9694_s8 = sld [smem:[#allocation92_spill]] }
  0x2c   : > { %726 = vperm.xlu0 %6484, %v712_v1   ;;  %716 = vperm.xlu1 %6485, %v710_v2   ;;  %v711_v12 = vld [vmem:[%s9688_s1 + $0x8] sm:$0xff]  ;;  %v817_v14 = vld [vmem:[%s9687_s7] sm:$0xff]  ;;  %v820_v16 = vld [vmem:[%s9687_s7 + $0x18] sm:$0xff]  ;;  %s9695_s1 = sld [smem:[#allocation86_spill]] }
  0x2d   : > { %s696_s0 = scalar_lea.vmem %s9689_s27, %s6234_s26  ;;  %v818_v18 = vld [vmem:[%s9687_s7 + $0x8] sm:$0xff]  ;;  %v1434_v42 = vld [vmem:[%s9540_s13 + $0x38] sm:$0xff]  ;;  %v1437_v45 = vld [vmem:[%s9540_s13 + $0x50] sm:$0xff]  ;;  %s9696_s10 = sld [smem:[#allocation94_spill]] }
  0x2e   : > { %v5333_v4 = vld [vmem:[%s696_s0] sm:$0xf]  ;;  %v6237_v5 = vld [vmem:[%s696_s0 + $0x4] sm:$0xf0]  ;;  %v6236_v7 = vld [vmem:[%s696_s0 + $0x4] sm:$0xf] }
  0x2f   : > { %v5334_v6 = vor.u32 %v6237_v5, %v5333_v4  ;;  %v5335_v8 = vld [vmem:[%s696_s0 + $0x8] sm:$0xf0]  ;;  %v6238_v13 = vld [vmem:[%s9690_s2] sm:$0xff]  ;;  %v979_v17 = vld [vmem:[%s9691_s9 + $0x38] sm:$0xff]  ;;  %s6235_s26 = sshll.u32 %s6731_s29, 2  ;;  %s9697_s30 = sld [smem:[#allocation85_spill]] }
  0x30   : > { %v5338_v10 = vor.u32 %v6236_v7, %v5335_v8  ;;  %v978_v19 = vld [vmem:[%s9691_s9 + $0x30] sm:$0xff]  ;;  %v6239_v20 = vld [vmem:[%s9690_s2 + $0x8] sm:$0xff]  ;;  %v976_v22 = vld [vmem:[%s9691_s9 + $0x20] sm:$0xff]  ;;  %s9693_s25 = smov %s9692_s3  ;;  %s9707_s22 = sld [smem:[#allocation87_spill]] }
  0x31   : > { %768 = vmatpush.bf16.msra.mxu2 %v5334_v6  ;;  %v974_v21 = vld [vmem:[%s9691_s9 + $0x10] sm:$0xff]  ;;  %v977_v23 = vld [vmem:[%s9691_s9 + $0x28] sm:$0xff]  ;;  %v975_v25 = vld [vmem:[%s9691_s9 + $0x18] sm:$0xff] }
  0x32   : > { %787 = vmatpush.bf16.msra.mxu3 %v5338_v10  ;;  %v973_v24 = vld [vmem:[%s9691_s9 + $0x8] sm:$0xff]  ;;  %v972_v26 = vld [vmem:[%s9691_s9] sm:$0xff]  ;;  %v2292_v48 = vld [vmem:[%s9542_s15 + $0x70] sm:$0xff] }
  0x33   : > { %850 = vperm.xlu2 %6486, %v822_v9   ;;  %v1435_v46 = vld [vmem:[%s9540_s13 + $0x40] sm:$0xff]  ;;  %v1436_v47 = vld [vmem:[%s9540_s13 + $0x48] sm:$0xff]  ;;  %v1438_v49 = vld [vmem:[%s9540_s13 + $0x58] sm:$0xff] }
  0x34   : > { %731 = vperm.xlu0 %6484, %v713_v11   ;;  %721 = vperm.xlu1 %6485, %v711_v12   ;;  %v1439_v50 = vld [vmem:[%s9540_s13 + $0x60] sm:$0xff]  ;;  %v2309_v51 = vld [vmem:[%s9542_s15 + $0xf8] sm:$0xff]  ;;  %v2308_v53 = vld [vmem:[%s9542_s15 + $0xf0] sm:$0xff] }
  0x35   : > { %5339 = vmatmul.msk.bf16.vlgmr.msra.gmra.mxu2 %vm754_vm0, %v6238_v13  ;;  %5341 = vmatmul.msk.bf16.vlgmr.msra.gmra.mxu3 %vm754_vm0, %v6238_v13  ;;  %v2293_v52 = vld [vmem:[%s9542_s15 + $0x78] sm:$0xff]  ;;  %v2306_v54 = vld [vmem:[%s9542_s15 + $0xe0] sm:$0xff]  ;;  %v2291_v56 = vld [vmem:[%s9542_s15 + $0x68] sm:$0xff]  ;;  %s7312_s2 = scalar_lea.vmem %s9697_s30, %s6235_s26  ;;  %s10040_s30 = sld [smem:[#allocation95_spill]] }
  0x36   : > { %v2290_v55 = vld [vmem:[%s9542_s15 + $0x60] sm:$0xff]  ;;  %v2289_v57 = vld [vmem:[%s9542_s15 + $0x58] sm:$0xff]  ;;  %v2307_v58 = vld [vmem:[%s9542_s15 + $0xe8] sm:$0xff] }
  0x37   : > { %v2288_v59 = vld [vmem:[%s9542_s15 + $0x50] sm:$0xff]  ;;  %v2286_v60 = vld [vmem:[%s9542_s15 + $0x40] sm:$0xff]  ;;  %v2305_v62 = vld [vmem:[%s9542_s15 + $0xd8] sm:$0xff] }
  0x38   : > { %v2304_v61 = vld [vmem:[%s9542_s15 + $0xd0] sm:$0xff]  ;;  %v2303_v1 = vld [vmem:[%s9542_s15 + $0xc8] sm:$0xff]  ;;  %v2302_v5 = vld [vmem:[%s9542_s15 + $0xc0] sm:$0xff] }
  0x39   : > { %v2287_v4 = vld [vmem:[%s9542_s15 + $0x48] sm:$0xff]  ;;  %v2300_v12 = vld [vmem:[%s9542_s15 + $0xb0] sm:$0xff] }
  0x3b   : > { %825 = vperm.xlu2 %6486, %v817_v14   ;;  %s10041_s27 = smov %s10040_s30  ;;  %s5236_s29 = scalar_lea.hbm %s10040_s30, %s6441_s23 }
  0x3c   : > { %835 = vperm.xlu0 %6484, %v819_v15   ;;  %840 = vperm.xlu1 %6485, %v820_v16   ;;  %v2284_v15 = vld [vmem:[%s9542_s15 + $0x30] sm:$0xff]  ;;  %v2285_v16 = vld [vmem:[%s9542_s15 + $0x38] sm:$0xff] }
  0x43   : > { %1017 = vperm.xlu2 %6486, %v979_v17  }
  0x44   : > { %830 = vperm.xlu0 %6484, %v818_v18   ;;  %1012 = vperm.xlu1 %6485, %v978_v19  }
  0x45   : > { %5340 = vmatmul.msk.bf16.gmra.mxu2 %vm754_vm0, %v6239_v20  ;;  %5342 = vmatmul.msk.bf16.gmra.mxu3 %vm754_vm0, %v6239_v20 }
  0x4b   : > { %992 = vperm.xlu2 %6486, %v974_v21  }
  0x4c   : > { %1002 = vperm.xlu0 %6484, %v976_v22   ;;  %1007 = vperm.xlu1 %6485, %v977_v23   ;;  %v2283_v23 = vld [vmem:[%s9542_s15 + $0x28] sm:$0xff] }
  0x53   : > { %987 = vperm.xlu2 %6486, %v973_v24  }
  0x54   : > { %997 = vperm.xlu0 %6484, %v975_v25   ;;  %982 = vperm.xlu1 %6485, %v972_v26   ;;  %v2301_v26 = vld [vmem:[%s9542_s15 + $0xb8] sm:$0xff] }
  0x5b   : > { %1217 = vperm.xlu2 %6486, %v1181_v27   ;;  %v2282_v27 = vld [vmem:[%s9542_s15 + $0x20] sm:$0xff] }
  0x5c   : > { %1227 = vperm.xlu0 %6484, %v1183_v28   ;;  %1232 = vperm.xlu1 %6485, %v1184_v29  }
  0x63   : > { %1212 = vperm.xlu2 %6486, %v1180_v30  }
  0x64   : > { %1222 = vperm.xlu0 %6484, %v1182_v31   ;;  %1207 = vperm.xlu1 %6485, %v1179_v32  }
  0x6b   : > { %1187 = vperm.xlu2 %6486, %v1175_v33  }
  0x6c   : > { %1197 = vperm.xlu0 %6484, %v1177_v34   ;;  %1202 = vperm.xlu1 %6485, %v1178_v35   ;;  %v2280_v34 = vld [vmem:[%s9542_s15 + $0x10] sm:$0xff] }
  0x73   : > { %1447 = vperm.xlu2 %6486, %v1428_v36  }
  0x74   : > { %1192 = vperm.xlu0 %6484, %v1176_v37   ;;  %1442 = vperm.xlu1 %6485, %v1427_v38   ;;  %v2298_v37 = vld [vmem:[%s9542_s15 + $0xa0] sm:$0xff]  ;;  %v2299_v38 = vld [vmem:[%s9542_s15 + $0xa8] sm:$0xff] }
  0x7b   : > { %1462 = vperm.xlu2 %6486, %v1431_v39  }
  0x7c   : > { %1452 = vperm.xlu0 %6484, %v1429_v40   ;;  %1457 = vperm.xlu1 %6485, %v1430_v41  }
  0x83   : > { %1477 = vperm.xlu2 %6486, %v1434_v42  }
  0x84   : > { %1467 = vperm.xlu0 %6484, %v1432_v43   ;;  %1472 = vperm.xlu1 %6485, %v1433_v44   ;;  %v2297_v43 = vld [vmem:[%s9542_s15 + $0x98] sm:$0xff] }
  0x8b   : > { %1492 = vperm.xlu2 %6486, %v1437_v45  }
  0x8c   : > { %1482 = vperm.xlu0 %6484, %v1435_v46   ;;  %1487 = vperm.xlu1 %6485, %v1436_v47  }
  0x93   : > { %2382 = vperm.xlu2 %6486, %v2292_v48   ;;  %v2281_v48 = vld [vmem:[%s9542_s15 + $0x18] sm:$0xff] }
  0x94   : > { %1497 = vperm.xlu0 %6484, %v1438_v49   ;;  %1502 = vperm.xlu1 %6485, %v1439_v50   ;;  %v2296_v49 = vld [vmem:[%s9542_s15 + $0x90] sm:$0xff] }
  0x9b   : > { %2467 = vperm.xlu2 %6486, %v2309_v51  }
  0x9c   : > { %2387 = vperm.xlu0 %6484, %v2293_v52   ;;  %2462 = vperm.xlu1 %6485, %v2308_v53  }
  0x9e   : > { %v717_v63 = vpop.permute.xlu1 %716  ;;  %v727_v20 = vpop.permute.xlu0 %726 }
  0xa3   : > { %2452 = vperm.xlu2 %6486, %v2306_v54  }
  0xa4   : > { %2372 = vperm.xlu0 %6484, %v2290_v55   ;;  %2377 = vperm.xlu1 %6485, %v2291_v56  }
  0xa6   : > { %v722_v10 = vpop.permute.xlu1 %721  ;;  %v732_v32 = vpop.permute.xlu0 %731 }
  0xab   : > { %2367 = vperm.xlu2 %6486, %v2289_v57  }
  0xac   : > { %2457 = vperm.xlu0 %6484, %v2307_v58   ;;  %2362 = vperm.xlu1 %6485, %v2288_v59   ;;  %v6240_v58 = vld [vmem:[%s9692_s3] sm:$0xff]  ;;  %s6510_s3 = scalar_lea.hbm %s10041_s27, 64 }
  0xad   : > { %v2294_v59 = vld [vmem:[%s9542_s15 + $0x80] sm:$0xff] }
  0xb3   : > { %2352 = vperm.xlu2 %6486, %v2286_v60   ;;  %v2278_v60 = vld [vmem:[%s9542_s15] sm:$0xff] }
  0xb4   : > { %2442 = vperm.xlu0 %6484, %v2304_v61   ;;  %2447 = vperm.xlu1 %6485, %v2305_v62   ;;  %v2279_v61 = vld [vmem:[%s9542_s15 + $0x8] sm:$0xff]  ;;  %v3937_v62 = vld [vmem:[%s9544_s17 + $0x78] sm:$0xff] }
  0xb8   : > { %v770_v0 = vpop.f32.mrf.mxu2  ;;  %v789_v3 = vpop.f32.mrf.mxu3 }
  0xb9   : > { %v771_v2 = vadd.f32 %v770_v0, %v717_v63  ;;  %v790_v6 = vadd.f32 %v789_v3, %v717_v63  ;;  %v2295_v63 = vld [vmem:[%s9542_s15 + $0x88] sm:$0xff]  ;;  %v3936_v0 = vld [vmem:[%s9544_s17 + $0x70] sm:$0xff] }
  0xba   : > { %v3952_v3 = vld [vmem:[%s9544_s17 + $0xf0] sm:$0xff] }
  0xbb   : > { %v799_v7 = vmax.f32 %v771_v2, 0.0  ;;  %2437 = vperm.xlu2 %6486, %v2303_v1   ;;  %v800_v8 = vmax.f32 %v790_v6, 0.0  ;;  %v6241_v1 = vld [vmem:[%s9693_s25 + $0x8] sm:$0xff]  ;;  %v3934_v2 = vld [vmem:[%s9544_s17 + $0x60] sm:$0xff] }
  0xbc   : > { %2357 = vperm.xlu0 %6484, %v2287_v4   ;;  %2432 = vperm.xlu1 %6485, %v2302_v5   ;;  %v3953_v4 = vld [vmem:[%s9544_s17 + $0xf8] sm:$0xff]  ;;  %v3951_v5 = vld [vmem:[%s9544_s17 + $0xe8] sm:$0xff] }
  0xbd   : > { %v6909_v9 = vpack.c.bf16 %v800_v8, %v799_v7  ;;  %v3935_v6 = vld [vmem:[%s9544_s17 + $0x68] sm:$0xff]  ;;  %v3950_v7 = vld [vmem:[%s9544_s17 + $0xe0] sm:$0xff]  ;;  %v6242_v8 = vld [vmem:[%s9693_s25 + $0x10] sm:$0xff] }
  0xbf   : > { %1696 = vst [vmem:[#allocation2] sm:$0xff] %v6909_v9  ;;  %v872_v54 = vunpack.c.l.b16 %v6909_v9  ;;  %v873_v55 = vunpack.c.h.b16 %v6909_v9  ;;  %v3948_v9 = vld [vmem:[%s9544_s17 + $0xd0] sm:$0xff] }
  0xc0   : > { %v772_v11 = vpop.f32.mrf.mxu2  ;;  %v791_v14 = vpop.f32.mrf.mxu3 }
  0xc1   : > { %v773_v13 = vadd.f32 %v772_v11, %v722_v10  ;;  %v792_v17 = vadd.f32 %v791_v14, %v722_v10  ;;  %v3932_v10 = vld [vmem:[%s9544_s17 + $0x50] sm:$0xff]  ;;  %v3933_v11 = vld [vmem:[%s9544_s17 + $0x58] sm:$0xff]  ;;  %v3930_v14 = vld [vmem:[%s9544_s17 + $0x40] sm:$0xff] }
  0xc3   : > { %v801_v18 = vmax.f32 %v773_v13, 0.0  ;;  %2422 = vperm.xlu2 %6486, %v2300_v12   ;;  %v802_v19 = vmax.f32 %v792_v17, 0.0  ;;  %v3931_v12 = vld [vmem:[%s9544_s17 + $0x48] sm:$0xff]  ;;  %v3949_v13 = vld [vmem:[%s9544_s17 + $0xd8] sm:$0xff] }
  0xc4   : > { %2342 = vperm.xlu0 %6484, %v2284_v15   ;;  %2347 = vperm.xlu1 %6485, %v2285_v16   ;;  %v3928_v15 = vld [vmem:[%s9544_s17 + $0x30] sm:$0xff]  ;;  %v3946_v16 = vld [vmem:[%s9544_s17 + $0xc0] sm:$0xff]  ;;  %v3947_v17 = vld [vmem:[%s9544_s17 + $0xc8] sm:$0xff] }
  0xc5   : > { %v808_v21 = vpack.c.bf16 %v802_v19, %v801_v18  ;;  %v3945_v18 = vld [vmem:[%s9544_s17 + $0xb8] sm:$0xff] }
  0xc6   : > { %v3929_v19 = vld [vmem:[%s9544_s17 + $0x38] sm:$0xff] }
  0xc7   : > { %1697 = vst [vmem:[#allocation2 + $0x8] sm:$0xff] %v808_v21  ;;  %v874_v52 = vunpack.c.l.b16 %v808_v21  ;;  %v875_v53 = vunpack.c.h.b16 %v808_v21  ;;  %v3942_v21 = vld [vmem:[%s9544_s17 + $0xa0] sm:$0xff] }
  0xc8   : > { %v775_v22 = vpop.f32.mrf.mxu2  ;;  %v794_v25 = vpop.f32.mrf.mxu3 }
  0xc9   : > { %v776_v24 = vadd.f32 %v775_v22, %v727_v20  ;;  %v795_v28 = vadd.f32 %v794_v25, %v727_v20  ;;  %v880_v56 = vpack.c.b16 %v874_v52, %v872_v54  ;;  %v881_v57 = vpack.c.b16 %v875_v53, %v873_v55  ;;  %v3944_v20 = vld [vmem:[%s9544_s17 + $0xb0] sm:$0xff]  ;;  %v3926_v22 = vld [vmem:[%s9544_s17 + $0x20] sm:$0xff]  ;;  %v3943_v25 = vld [vmem:[%s9544_s17 + $0xa8] sm:$0xff] }
  0xca   : > { %v5165_v54 = vld [vmem:[%s9548_s21 + $0x8] sm:$0xff] }
  0xcb   : > { %v803_v29 = vmax.f32 %v776_v24, 0.0  ;;  %2337 = vperm.xlu2 %6486, %v2283_v23   ;;  %v804_v30 = vmax.f32 %v795_v28, 0.0  ;;  %v3927_v23 = vld [vmem:[%s9544_s17 + $0x28] sm:$0xff]  ;;  %v3925_v24 = vld [vmem:[%s9544_s17 + $0x18] sm:$0xff]  ;;  %v3940_v28 = vld [vmem:[%s9544_s17 + $0x90] sm:$0xff] }
  0xcc   : > { %2427 = vperm.xlu0 %6484, %v2301_v26   ;;  %2332 = vperm.xlu1 %6485, %v2282_v27   ;;  %v3924_v26 = vld [vmem:[%s9544_s17 + $0x10] sm:$0xff]  ;;  %v3922_v27 = vld [vmem:[%s9544_s17] sm:$0xff] }
  0xcd   : > { %v809_v31 = vpack.c.bf16 %v804_v30, %v803_v29  ;;  %v3941_v29 = vld [vmem:[%s9544_s17 + $0x98] sm:$0xff]  ;;  %v3939_v30 = vld [vmem:[%s9544_s17 + $0x88] sm:$0xff] }
  0xcf   : > { %1698 = vst [vmem:[#allocation2 + $0x10] sm:$0xff] %v809_v31  ;;  %v876_v44 = vunpack.c.l.b16 %v809_v31  ;;  %v877_v46 = vunpack.c.h.b16 %v809_v31  ;;  %v3923_v31 = vld [vmem:[%s9544_s17 + $0x8] sm:$0xff] }
  0xd0   : > { %v777_v33 = vpop.f32.mrf.mxu2  ;;  %v796_v36 = vpop.f32.mrf.mxu3 }
  0xd1   : > { %v778_v35 = vadd.f32 %v777_v33, %v732_v32  ;;  %v797_v39 = vadd.f32 %v796_v36, %v732_v32  ;;  %v3938_v32 = vld [vmem:[%s9544_s17 + $0x80] sm:$0xff]  ;;  %v4753_v36 = vld [vmem:[%s9546_s19 + $0x58] sm:$0xff] }
  0xd2   : > { %v4754_v33 = vld [vmem:[%s9546_s19 + $0x60] sm:$0xff] }
  0xd3   : > { %v805_v40 = vmax.f32 %v778_v35, 0.0  ;;  %2322 = vperm.xlu2 %6486, %v2280_v34   ;;  %v806_v41 = vmax.f32 %v797_v39, 0.0  ;;  %v4756_v34 = vld [vmem:[%s9546_s19 + $0x70] sm:$0xff]  ;;  %v4757_v35 = vld [vmem:[%s9546_s19 + $0x78] sm:$0xff] }
  0xd4   : > { %2412 = vperm.xlu0 %6484, %v2298_v37   ;;  %2417 = vperm.xlu1 %6485, %v2299_v38   ;;  %v4755_v37 = vld [vmem:[%s9546_s19 + $0x68] sm:$0xff]  ;;  %v4752_v38 = vld [vmem:[%s9546_s19 + $0x50] sm:$0xff] }
  0xd5   : > { %v810_v42 = vpack.c.bf16 %v806_v41, %v805_v40  ;;  %v4748_v39 = vld [vmem:[%s9546_s19 + $0x30] sm:$0xff]  ;;  %v4750_v40 = vld [vmem:[%s9546_s19 + $0x40] sm:$0xff]  ;;  %v4751_v41 = vld [vmem:[%s9546_s19 + $0x48] sm:$0xff] }
  0xd7   : > { %1699 = vst [vmem:[#allocation2 + $0x18] sm:$0xff] %v810_v42  ;;  %v878_v45 = vunpack.c.l.b16 %v810_v42  ;;  %v879_v47 = vunpack.c.h.b16 %v810_v42  ;;  %v846_v42 = vpop.permute.xlu2 %845 }
  0xd9   : > { %v882_v50 = vpack.c.b16 %v878_v45, %v876_v44  ;;  %v883_v51 = vpack.c.b16 %v879_v47, %v877_v46  ;;  %v4749_v44 = vld [vmem:[%s9546_s19 + $0x38] sm:$0xff]  ;;  %v4746_v45 = vld [vmem:[%s9546_s19 + $0x20] sm:$0xff] }
  0xda   : > { %v4742_v47 = vld [vmem:[%s9546_s19] sm:$0xff] }
  0xdb   : > { %2407 = vperm.xlu2 %6486, %v2297_v43   ;;  %904 = vmatpush.bf16.msrb.mxu2 %v882_v50  ;;  %v4747_v43 = vld [vmem:[%s9546_s19 + $0x28] sm:$0xff]  ;;  %v836_v50 = vpop.permute.xlu0 %835 }
  0xdc   : > { %2327 = vperm.xlu0 %6484, %v2281_v48   ;;  %2402 = vperm.xlu1 %6485, %v2296_v49   ;;  %v4744_v48 = vld [vmem:[%s9546_s19 + $0x10] sm:$0xff]  ;;  %v4745_v49 = vld [vmem:[%s9546_s19 + $0x18] sm:$0xff] }
  0xdd   : > { %928 = vmatpush.bf16.msrb.mxu3 %v883_v51 }
  0xdf   : > { %905 = vmatpush.bf16.msrb.mxu2 %v880_v56  ;;  %v851_v46 = vpop.permute.xlu2 %850 }
  0xe1   : > { %929 = vmatpush.bf16.msrb.mxu3 %v881_v57  ;;  %v4743_v57 = vld [vmem:[%s9546_s19 + $0x8] sm:$0xff] }
  0xe2   : > { %5355 = vmatmul.msk.bf16.vlgmr.msrb.gmra.mxu2 %vm888_vm1, %v6240_v58 }
  0xe3   : > { %2392 = vperm.xlu2 %6486, %v2294_v59  }
  0xe4   : > { %5358 = vmatmul.msk.bf16.vlgmr.msrb.gmra.mxu3 %vm888_vm1, %v6240_v58  ;;  %2312 = vperm.xlu0 %6484, %v2278_v60   ;;  %v5164_v58 = vld [vmem:[%s9548_s21] sm:$0xff] }
  0xe5   : > { %2317 = vperm.xlu1 %6485, %v2279_v61  }
  0xe7   : > { %v826_v51 = vpop.permute.xlu2 %825 }
  0xeb   : > { %4031 = vperm.xlu2 %6486, %v3937_v62   ;;  %v831_v62 = vpop.permute.xlu0 %830 }
  0xec   : > { %2397 = vperm.xlu0 %6484, %v2295_v63  }
  0xed   : > { %4026 = vperm.xlu1 %6485, %v3936_v0  }
  0xf2   : > { %5356 = vmatmul.msk.bf16.gmra.mxu2 %vm888_vm1, %v6241_v1 }
  0xf3   : > { %4016 = vperm.xlu2 %6486, %v3934_v2  }
  0xf4   : > { %5359 = vmatmul.msk.bf16.gmra.mxu3 %vm888_vm1, %v6241_v1  ;;  %4106 = vperm.xlu0 %6484, %v3952_v3  }
  0xf5   : > { %4111 = vperm.xlu1 %6485, %v3953_v4  }
  0xfb   : > { %4101 = vperm.xlu2 %6486, %v3951_v5  }
  0xfc   : > { %4021 = vperm.xlu0 %6484, %v3935_v6  }
  0xfd   : > { %4096 = vperm.xlu1 %6485, %v3950_v7  }
 0x102   : > { %5357 = vmatmul.msk.bf16.gmra.mxu2 %vm888_vm1, %v6242_v8 }
 0x103   : > { %4086 = vperm.xlu2 %6486, %v3948_v9  }
 0x104   : > { %5360 = vmatmul.msk.bf16.gmra.mxu3 %vm888_vm1, %v6242_v8  ;;  %4006 = vperm.xlu0 %6484, %v3932_v10  }
 0x105   : > { %4011 = vperm.xlu1 %6485, %v3933_v11  }
 0x10b   : > { %4001 = vperm.xlu2 %6486, %v3931_v12  }
 0x10c   : > { %4091 = vperm.xlu0 %6484, %v3949_v13   ;;  %v841_v13 = vpop.permute.xlu1 %840 }
 0x10d   : > { %3996 = vperm.xlu1 %6485, %v3930_v14  }
 0x113   : > { %3986 = vperm.xlu2 %6486, %v3928_v15  }
 0x114   : > { %4076 = vperm.xlu0 %6484, %v3946_v16  }
 0x115   : > { %4081 = vperm.xlu1 %6485, %v3947_v17  }
 0x11b   : > { %4071 = vperm.xlu2 %6486, %v3945_v18  }
 0x11c   : > { %3991 = vperm.xlu0 %6484, %v3929_v19  }
 0x11d   : > { %4066 = vperm.xlu1 %6485, %v3944_v20  }
 0x123   : > { %4056 = vperm.xlu2 %6486, %v3942_v21  }
 0x124   : > { %3976 = vperm.xlu0 %6484, %v3926_v22  }
 0x125   : > { %3981 = vperm.xlu1 %6485, %v3927_v23  }
 0x12b   : > { %3971 = vperm.xlu2 %6486, %v3925_v24  }
 0x12c   : > { %4061 = vperm.xlu0 %6484, %v3943_v25  }
 0x12d   : > { %3966 = vperm.xlu1 %6485, %v3924_v26  }
 0x133   : > { %3956 = vperm.xlu2 %6486, %v3922_v27  }
 0x134   : > { %4046 = vperm.xlu0 %6484, %v3940_v28  }
 0x135   : > { %4051 = vperm.xlu1 %6485, %v3941_v29  }
 0x13b   : > { %4041 = vperm.xlu2 %6486, %v3939_v30  }
 0x13c   : > { %3961 = vperm.xlu0 %6484, %v3923_v31  }
 0x13d   : > { %4036 = vperm.xlu1 %6485, %v3938_v32  }
 0x143   : > { %4820 = vperm.xlu2 %6486, %v4754_v33  }
 0x144   : > { %4830 = vperm.xlu0 %6484, %v4756_v34  }
 0x145   : > { %4835 = vperm.xlu1 %6485, %v4757_v35  }
 0x14b   : > { %4815 = vperm.xlu2 %6486, %v4753_v36  }
 0x14c   : > { %4825 = vperm.xlu0 %6484, %v4755_v37  }
 0x14d   : > { %4810 = vperm.xlu1 %6485, %v4752_v38  }
 0x153   : > { %4790 = vperm.xlu2 %6486, %v4748_v39  }
 0x154   : > { %4800 = vperm.xlu0 %6484, %v4750_v40  }
 0x155   : > { %4805 = vperm.xlu1 %6485, %v4751_v41  }
 0x15b   : > { %4785 = vperm.xlu2 %6486, %v4747_v43  }
 0x15c   : > { %4795 = vperm.xlu0 %6484, %v4749_v44  }
 0x15d   : > { %4780 = vperm.xlu1 %6485, %v4746_v45  }
 0x163   : > { %4760 = vperm.xlu2 %6486, %v4742_v47  }
 0x164   : > { %4770 = vperm.xlu0 %6484, %v4744_v48  }
 0x165   : > { %4775 = vperm.xlu1 %6485, %v4745_v49   ;;  %v907_v52 = vpop.f32.mrf.mxu2 }
 0x166   : > { %v908_v55 = vadd.f32 %v907_v52, %v826_v51 }
 0x167   : > { %v931_v53 = vpop.f32.mrf.mxu3 }
 0x168   : > { %v932_v56 = vadd.f32 %v931_v53, %v826_v51  ;;  %v946_v59 = vmax.f32 %v908_v55, 0.0  ;;  %v6243_v53 = vld [vmem:[%s9694_s8] sm:$0xff]  ;;  %v6245_v55 = vld [vmem:[%s9694_s8 + $0x10] sm:$0xff] }
 0x16a   : > { %v947_v60 = vmax.f32 %v932_v56, 0.0  ;;  %v6246_v56 = vld [vmem:[%s9694_s8 + $0x18] sm:$0xff] }
 0x16b   : > { %5173 = vperm.xlu2 %6486, %v5165_v54   ;;  %v6244_v54 = vld [vmem:[%s9694_s8 + $0x8] sm:$0xff] }
 0x16c   : > { %v7127_v61 = vpack.c.bf16 %v947_v60, %v946_v59  ;;  %4765 = vperm.xlu0 %6484, %v4743_v57   ;;  %v1013_v57 = vpop.permute.xlu1 %1012 }
 0x16d   : > { %5168 = vperm.xlu1 %6485, %v5164_v58   ;;  %v909_v63 = vpop.f32.mrf.mxu2  ;;  %v7144_v58 = vpop.permute.xlu2 %1017 }
 0x16e   : > { %1700 = vst [vmem:[#allocation2 + $0x20] sm:$0xff] %v7127_v61  ;;  %v910_v1 = vadd.f32 %v909_v63, %v831_v62  ;;  %v1046_v49 = vunpack.c.l.b16 %v7127_v61 }
 0x16f   : > { %v933_v0 = vpop.f32.mrf.mxu3 }
 0x170   : > { %v934_v2 = vadd.f32 %v933_v0, %v831_v62  ;;  %v948_v3 = vmax.f32 %v910_v1, 0.0 }
 0x172   : > { %v949_v4 = vmax.f32 %v934_v2, 0.0 }
 0x174   : > { %v959_v5 = vpack.c.bf16 %v949_v4, %v948_v3  ;;  %v1008_v59 = vpop.permute.xlu1 %1007 }
 0x175   : > { %v912_v6 = vpop.f32.mrf.mxu2  ;;  %v993_v60 = vpop.permute.xlu2 %992 }
 0x176   : > { %1701 = vst [vmem:[#allocation2 + $0x28] sm:$0xff] %v959_v5  ;;  %v913_v8 = vadd.f32 %v912_v6, %v836_v50  ;;  %v1048_v48 = vunpack.c.l.b16 %v959_v5 }
 0x177   : > { %v936_v7 = vpop.f32.mrf.mxu3 }
 0x178   : > { %v937_v9 = vadd.f32 %v936_v7, %v836_v50  ;;  %v950_v10 = vmax.f32 %v913_v8, 0.0  ;;  %v1047_v50 = vunpack.c.h.b16 %v7127_v61  ;;  %v1058_v51 = vpack.c.b16 %v1048_v48, %v1046_v49 }
 0x17a   : > { %v951_v11 = vmax.f32 %v937_v9, 0.0 }
 0x17c   : > { %v960_v12 = vpack.c.bf16 %v951_v11, %v950_v10  ;;  %v983_v61 = vpop.permute.xlu1 %982 }
 0x17d   : > { %v914_v14 = vpop.f32.mrf.mxu2 }
 0x17e   : > { %1702 = vst [vmem:[#allocation2 + $0x30] sm:$0xff] %v960_v12  ;;  %v915_v16 = vadd.f32 %v914_v14, %v841_v13  ;;  %v1050_v43 = vunpack.c.l.b16 %v960_v12  ;;  %v1051_v44 = vunpack.c.h.b16 %v960_v12  ;;  %v1003_v12 = vpop.permute.xlu0 %1002 }
 0x17f   : > { %v938_v15 = vpop.f32.mrf.mxu3 }
 0x180   : > { %v939_v17 = vadd.f32 %v938_v15, %v841_v13  ;;  %v952_v18 = vmax.f32 %v915_v16, 0.0 }
 0x182   : > { %v953_v19 = vmax.f32 %v939_v17, 0.0 }
 0x184   : > { %v961_v20 = vpack.c.bf16 %v953_v19, %v952_v18 }
 0x185   : > { %v917_v21 = vpop.f32.mrf.mxu2 }
 0x186   : > { %1703 = vst [vmem:[#allocation2 + $0x38] sm:$0xff] %v961_v20  ;;  %v918_v23 = vadd.f32 %v917_v21, %v846_v42  ;;  %v1052_v41 = vunpack.c.l.b16 %v961_v20  ;;  %v998_v21 = vpop.permute.xlu0 %997 }
 0x187   : > { %v941_v22 = vpop.f32.mrf.mxu3 }
 0x188   : > { %v942_v24 = vadd.f32 %v941_v22, %v846_v42  ;;  %v954_v25 = vmax.f32 %v918_v23, 0.0  ;;  %v1053_v42 = vunpack.c.h.b16 %v961_v20  ;;  %v1060_v45 = vpack.c.b16 %v1052_v41, %v1050_v43 }
 0x18a   : > { %v955_v26 = vmax.f32 %v942_v24, 0.0  ;;  %v1061_v47 = vpack.c.b16 %v1053_v42, %v1051_v44 }
 0x18c   : > { %v962_v27 = vpack.c.bf16 %v955_v26, %v954_v25 }
 0x18d   : > { %v919_v28 = vpop.f32.mrf.mxu2 }
 0x18e   : > { %1704 = vst [vmem:[#allocation2 + $0x40] sm:$0xff] %v962_v27  ;;  %v920_v30 = vadd.f32 %v919_v28, %v851_v46  ;;  %v1054_v35 = vunpack.c.l.b16 %v962_v27  ;;  %v1055_v37 = vunpack.c.h.b16 %v962_v27 }
 0x18f   : > { %v943_v29 = vpop.f32.mrf.mxu3 }
 0x190   : > { %v944_v31 = vadd.f32 %v943_v29, %v851_v46  ;;  %v956_v32 = vmax.f32 %v920_v30, 0.0  ;;  %v1049_v46 = vunpack.c.h.b16 %v959_v5  ;;  %v988_v5 = vpop.permute.xlu2 %987 }
 0x192   : > { %v957_v33 = vmax.f32 %v944_v31, 0.0  ;;  %v1059_v52 = vpack.c.b16 %v1049_v46, %v1047_v50 }
 0x194   : > { %v963_v34 = vpack.c.bf16 %v957_v33, %v956_v32 }
 0x196   : > { %1705 = vst [vmem:[#allocation2 + $0x48] sm:$0xff] %v963_v34  ;;  %v1056_v36 = vunpack.c.l.b16 %v963_v34  ;;  %v1057_v38 = vunpack.c.h.b16 %v963_v34 }
 0x198   : > { %v1062_v39 = vpack.c.b16 %v1056_v36, %v1054_v35  ;;  %v1063_v40 = vpack.c.b16 %v1057_v38, %v1055_v37 }
 0x19a   : > { %1088 = vmatpush.bf16.msra.mxu0 %v1062_v39  ;;  %1117 = vmatpush.bf16.msra.mxu1 %v1063_v40 }
 0x19e   : > { %1089 = vmatpush.bf16.msra.mxu0 %v1060_v45  ;;  %1118 = vmatpush.bf16.msra.mxu1 %v1061_v47 }
 0x1a2   : > { %1090 = vmatpush.bf16.msra.mxu0 %v1058_v51  ;;  %1119 = vmatpush.bf16.msra.mxu1 %v1059_v52 }
 0x1a5   : > { %5377 = vmatmul.msk.bf16.vlgmr.msra.gmra.mxu0 %vm1070_vm2, %v6243_v53  ;;  %5381 = vmatmul.msk.bf16.vlgmr.msra.gmra.mxu1 %vm1070_vm2, %v6243_v53 }
 0x1b5   : > { %5378 = vmatmul.msk.bf16.gmra.mxu0 %vm1070_vm2, %v6244_v54  ;;  %5382 = vmatmul.msk.bf16.gmra.mxu1 %vm1070_vm2, %v6244_v54 }
 0x1c5   : > { %5379 = vmatmul.msk.bf16.gmra.mxu0 %vm1070_vm2, %v6245_v55  ;;  %5383 = vmatmul.msk.bf16.gmra.mxu1 %vm1070_vm2, %v6245_v55 }
 0x1d5   : > { %5380 = vmatmul.msk.bf16.gmra.mxu0 %vm1070_vm2, %v6246_v56  ;;  %5384 = vmatmul.msk.bf16.gmra.mxu1 %vm1070_vm2, %v6246_v56 }
 0x222   : > { %v1092_v62 = vpop.f32.mrf.mxu0  ;;  %v1121_v63 = vpop.f32.mrf.mxu1 }
 0x223   : > { %v1093_v0 = vadd.f32 %v1092_v62, %v983_v61  ;;  %v1122_v1 = vadd.f32 %v1121_v63, %v983_v61 }
 0x225   : > { %v1141_v2 = vmax.f32 %v1093_v0, 0.0  ;;  %v1142_v3 = vmax.f32 %v1122_v1, 0.0 }
 0x227   : > { %v7146_v4 = vpack.c.bf16 %v1142_v3, %v1141_v2 }
 0x229   : > { %1706 = vst [vmem:[#allocation2 + $0x50] sm:$0xff] %v7146_v4 }
 0x22a   : > { %v1094_v6 = vpop.f32.mrf.mxu0  ;;  %v1123_v7 = vpop.f32.mrf.mxu1 }
 0x22b   : > { %v1095_v8 = vadd.f32 %v1094_v6, %v988_v5  ;;  %v1124_v9 = vadd.f32 %v1123_v7, %v988_v5 }
 0x22d   : > { %v1143_v10 = vmax.f32 %v1095_v8, 0.0  ;;  %v1144_v11 = vmax.f32 %v1124_v9, 0.0 }
 0x22f   : > { %v7149_v13 = vpack.c.bf16 %v1144_v11, %v1143_v10 }
 0x231   : > { %1707 = vst [vmem:[#allocation2 + $0x58] sm:$0xff] %v7149_v13 }
 0x232   : > { %v1097_v14 = vpop.f32.mrf.mxu0  ;;  %v1126_v15 = vpop.f32.mrf.mxu1 }
 0x233   : > { %v1098_v16 = vadd.f32 %v1097_v14, %v993_v60  ;;  %v1127_v17 = vadd.f32 %v1126_v15, %v993_v60  ;;  %v1271_v14 = vunpack.c.h.b16 %v7149_v13  ;;  %v1268_v15 = vunpack.c.l.b16 %v7146_v4 }
 0x235   : > { %v1145_v18 = vmax.f32 %v1098_v16, 0.0  ;;  %v1146_v19 = vmax.f32 %v1127_v17, 0.0  ;;  %v1269_v16 = vunpack.c.h.b16 %v7146_v4  ;;  %v6265_v17 = vld [vmem:[%s9695_s1 + $0x38] sm:$0xff]  ;;  %v6263_v4 = vld [vmem:[%s9695_s1 + $0x28] sm:$0xff] }
 0x237   : > { %v7152_v20 = vpack.c.bf16 %v1146_v19, %v1145_v18  ;;  %v1285_v19 = vpack.c.b16 %v1271_v14, %v1269_v16 }
 0x239   : > { %1708 = vst [vmem:[#allocation2 + $0x60] sm:$0xff] %v7152_v20  ;;  %v1272_v8 = vunpack.c.l.b16 %v7152_v20  ;;  %v1273_v9 = vunpack.c.h.b16 %v7152_v20  ;;  %v6247_v20 = vld [vmem:[%s9696_s10] sm:$0xff] }
 0x23a   : > { %v1099_v22 = vpop.f32.mrf.mxu0  ;;  %v1128_v23 = vpop.f32.mrf.mxu1 }
 0x23b   : > { %v1100_v24 = vadd.f32 %v1099_v22, %v998_v21  ;;  %v1129_v25 = vadd.f32 %v1128_v23, %v998_v21  ;;  %v6262_v21 = vld [vmem:[%s9695_s1 + $0x20] sm:$0xff]  ;;  %v6261_v22 = vld [vmem:[%s9695_s1 + $0x18] sm:$0xff]  ;;  %v6248_v23 = vld [vmem:[%s9696_s10 + $0x8] sm:$0xff] }
 0x23d   : > { %v1147_v26 = vmax.f32 %v1100_v24, 0.0  ;;  %v1148_v27 = vmax.f32 %v1129_v25, 0.0  ;;  %v6260_v24 = vld [vmem:[%s9695_s1 + $0x10] sm:$0xff]  ;;  %v6259_v25 = vld [vmem:[%s9695_s1 + $0x8] sm:$0xff] }
 0x23f   : > { %v1160_v28 = vpack.c.bf16 %v1148_v27, %v1147_v26  ;;  %v6258_v26 = vld [vmem:[%s9695_s1] sm:$0xff] }
 0x241   : > { %1709 = vst [vmem:[#allocation2 + $0x68] sm:$0xff] %v1160_v28  ;;  %v1274_v7 = vunpack.c.l.b16 %v1160_v28 }
 0x242   : > { %v1102_v29 = vpop.f32.mrf.mxu0  ;;  %v1131_v30 = vpop.f32.mrf.mxu1 }
 0x243   : > { %v1103_v31 = vadd.f32 %v1102_v29, %v1003_v12  ;;  %v1132_v32 = vadd.f32 %v1131_v30, %v1003_v12  ;;  %v1286_v10 = vpack.c.b16 %v1274_v7, %v1272_v8  ;;  %v1270_v12 = vunpack.c.l.b16 %v7149_v13  ;;  %v6264_v13 = vld [vmem:[%s9695_s1 + $0x30] sm:$0xff] }
 0x245   : > { %v1149_v33 = vmax.f32 %v1103_v31, 0.0  ;;  %v1150_v34 = vmax.f32 %v1132_v32, 0.0  ;;  %v1284_v18 = vpack.c.b16 %v1270_v12, %v1268_v15  ;;  %v5843_v31 = vld [vmem:[#allocation2 + $0x60] sm:$0xf]  ;;  %v6249_v32 = vld [vmem:[%s9696_s10 + $0x10] sm:$0xff] }
 0x247   : > { %v1161_v35 = vpack.c.bf16 %v1150_v34, %v1149_v33  ;;  %v6287_v34 = vld [vmem:[#allocation2 + $0x54] sm:$0xf0] }
 0x248   : > { %v6289_v30 = vld [vmem:[#allocation2 + $0x64] sm:$0xf0] }
 0x249   : > { %1710 = vst [vmem:[#allocation2 + $0x70] sm:$0xff] %v1161_v35  ;;  %v1276_v2 = vunpack.c.l.b16 %v1161_v35  ;;  %v1277_v3 = vunpack.c.h.b16 %v1161_v35  ;;  %v5844_v33 = vor.u32 %v6289_v30, %v5843_v31  ;;  %v5835_v35 = vld [vmem:[#allocation2 + $0x50] sm:$0xf] }
 0x24a   : > { %v1104_v36 = vpop.f32.mrf.mxu0  ;;  %v1133_v37 = vpop.f32.mrf.mxu1 }
 0x24b   : > { %v1105_v38 = vadd.f32 %v1104_v36, %v1008_v59  ;;  %v1134_v39 = vadd.f32 %v1133_v37, %v1008_v59  ;;  %v5836_v36 = vor.u32 %v6287_v34, %v5835_v35  ;;  %v6285_v37 = vld [vmem:[#allocation2 + $0x44] sm:$0xf0] }
 0x24d   : > { %v1151_v40 = vmax.f32 %v1105_v38, 0.0  ;;  %v1152_v41 = vmax.f32 %v1134_v39, 0.0  ;;  %v5827_v38 = vld [vmem:[#allocation2 + $0x40] sm:$0xf] }
 0x24e   : > { %v5828_v39 = vor.u32 %v6285_v37, %v5827_v38 }
 0x24f   : > { %v1162_v42 = vpack.c.bf16 %v1152_v41, %v1151_v40  ;;  %v6283_v40 = vld [vmem:[#allocation2 + $0x34] sm:$0xf0]  ;;  %v5819_v41 = vld [vmem:[#allocation2 + $0x30] sm:$0xf] }
 0x251   : > { %1711 = vst [vmem:[#allocation2 + $0x78] sm:$0xff] %v1162_v42  ;;  %v1278_v0 = vunpack.c.l.b16 %v1162_v42  ;;  %v1279_v1 = vunpack.c.h.b16 %v1162_v42  ;;  %v5820_v42 = vor.u32 %v6283_v40, %v5819_v41 }
 0x252   : > { %v1107_v43 = vpop.f32.mrf.mxu0  ;;  %v1136_v44 = vpop.f32.mrf.mxu1 }
 0x253   : > { %v1108_v45 = vadd.f32 %v1107_v43, %v1013_v57  ;;  %v1137_v47 = vadd.f32 %v1136_v44, %v1013_v57  ;;  %v1288_v5 = vpack.c.b16 %v1278_v0, %v1276_v2  ;;  %v1289_v6 = vpack.c.b16 %v1279_v1, %v1277_v3  ;;  %v6281_v43 = vld [vmem:[#allocation2 + $0x24] sm:$0xf0]  ;;  %v5811_v44 = vld [vmem:[#allocation2 + $0x20] sm:$0xf]  ;;  %v7218_v1 = vpop.permute.xlu1 %1232 }
 0x255   : > { %v1153_v48 = vmax.f32 %v1108_v45, 0.0  ;;  %v1154_v46 = vmax.f32 %v1137_v47, 0.0  ;;  %v6250_v45 = vld [vmem:[%s9696_s10 + $0x18] sm:$0xff]  ;;  %v5812_v47 = vor.u32 %v6281_v43, %v5811_v44 }
 0x257   : > { %v1163_v49 = vpack.c.bf16 %v1154_v46, %v1153_v48  ;;  %v6279_v48 = vld [vmem:[#allocation2 + $0x14] sm:$0xf0]  ;;  %v5803_v46 = vld [vmem:[#allocation2 + $0x10] sm:$0xf] }
 0x258   : > { %v6291_v27 = vld [vmem:[#allocation2 + $0x74] sm:$0xf0] }
 0x259   : > { %1712 = vst [vmem:[#allocation2 + $0x80] sm:$0xff] %v1163_v49  ;;  %v1280_v59 = vunpack.c.l.b16 %v1163_v49  ;;  %v1281_v60 = vunpack.c.h.b16 %v1163_v49  ;;  %v5804_v49 = vor.u32 %v6279_v48, %v5803_v46 }
 0x25a   : > { %v1109_v50 = vpop.f32.mrf.mxu0  ;;  %v1138_v51 = vpop.f32.mrf.mxu1 }
 0x25b   : > { %v1110_v52 = vadd.f32 %v1109_v50, %v7144_v58  ;;  %v1139_v53 = vadd.f32 %v1138_v51, %v7144_v58  ;;  %v1275_v58 = vunpack.c.h.b16 %v1160_v28  ;;  %v5851_v28 = vld [vmem:[#allocation2 + $0x70] sm:$0xf]  ;;  %v6277_v50 = vld [vmem:[#allocation2 + $0x4] sm:$0xf0]  ;;  %v5795_v51 = vld [vmem:[#allocation2] sm:$0xf]  ;;  %v1208_v12 = vpop.permute.xlu1 %1207 }
 0x25c   : > { %v5852_v29 = vor.u32 %v6291_v27, %v5851_v28 }
 0x25d   : > { %v1155_v54 = vmax.f32 %v1110_v52, 0.0  ;;  %v1156_v55 = vmax.f32 %v1139_v53, 0.0  ;;  %v1287_v11 = vpack.c.b16 %v1275_v58, %v1273_v9  ;;  %v5796_v52 = vor.u32 %v6277_v50, %v5795_v51  ;;  %v6251_v53 = vld [vmem:[%s9696_s10 + $0x20] sm:$0xff] }
 0x25f   : > { %v1164_v56 = vpack.c.bf16 %v1156_v55, %v1155_v54  ;;  %v7212_v54 = vpop.permute.xlu0 %1227  ;;  %v7214_v55 = vpop.permute.xlu2 %1217 }
 0x261   : > { %v1282_v61 = vunpack.c.l.b16 %v1164_v56  ;;  %v1283_v62 = vunpack.c.h.b16 %v1164_v56  ;;  %1713 = vst [vmem:[#allocation2 + $0x88] sm:$0xff] %v1164_v56 }
 0x263   : > { %v1290_v63 = vpack.c.b16 %v1282_v61, %v1280_v59  ;;  %v1291_v57 = vpack.c.b16 %v1283_v62, %v1281_v60 }
 0x265   : > { %1320 = vmatpush.bf16.msra.mxu2 %v1290_v63  ;;  %1354 = vmatpush.bf16.msra.mxu3 %v1291_v57 }
 0x267   : > { %v7216_v56 = vpop.permute.xlu0 %1222  ;;  %v1213_v59 = vpop.permute.xlu2 %1212 }
 0x269   : > { %1321 = vmatpush.bf16.msra.mxu2 %v1288_v5  ;;  %1355 = vmatpush.bf16.msra.mxu3 %v1289_v6 }
 0x26d   : > { %1322 = vmatpush.bf16.msra.mxu2 %v1286_v10  ;;  %1356 = vmatpush.bf16.msra.mxu3 %v1287_v11 }
 0x26f   : > { %v1198_v60 = vpop.permute.xlu0 %1197  ;;  %v1188_v61 = vpop.permute.xlu2 %1187 }
 0x271   : > { %1323 = vmatpush.bf16.msra.mxu2 %v1284_v18  ;;  %1357 = vmatpush.bf16.msra.mxu3 %v1285_v19 }
 0x274   : > { %5405 = vmatmul.msk.bf16.vlgmr.msra.gmra.mxu2 %vm1300_vm3, %v6247_v20  ;;  %5410 = vmatmul.msk.bf16.vlgmr.msra.gmra.mxu3 %vm1300_vm3, %v6247_v20 }
 0x275   : > { %1923 = vmatpush.bf16.msrb.mxu2 %v6265_v17 }
 0x277   : > { %v1193_v6 = vpop.permute.xlu0 %1192 }
 0x279   : > { %1924 = vmatpush.bf16.msrb.mxu2 %v6264_v13 }
 0x27d   : > { %1925 = vmatpush.bf16.msrb.mxu2 %v6263_v4 }
 0x281   : > { %1926 = vmatpush.bf16.msrb.mxu2 %v6262_v21 }
 0x284   : > { %5406 = vmatmul.msk.bf16.gmra.mxu2 %vm1300_vm3, %v6248_v23  ;;  %5411 = vmatmul.msk.bf16.gmra.mxu3 %vm1300_vm3, %v6248_v23 }
 0x285   : > { %1927 = vmatpush.bf16.msrb.mxu2 %v6261_v22 }
 0x289   : > { %1928 = vmatpush.bf16.msrb.mxu2 %v6260_v24 }
 0x28d   : > { %1929 = vmatpush.bf16.msrb.mxu2 %v6259_v25 }
 0x291   : > { %1930 = vmatpush.bf16.msrb.mxu2 %v6258_v26  ;;  %v1203_v26 = vpop.permute.xlu1 %1202 }
 0x294   : > { %5407 = vmatmul.msk.bf16.gmra.mxu2 %vm1300_vm3, %v6249_v32  ;;  %5412 = vmatmul.msk.bf16.gmra.mxu3 %vm1300_vm3, %v6249_v32 }
 0x295   : > { %3082 = vmatpush.bf16.msra.mxu2 %v5852_v29 }
 0x299   : > { %3083 = vmatpush.bf16.msra.mxu2 %v5844_v33 }
 0x29d   : > { %3084 = vmatpush.bf16.msra.mxu2 %v5836_v36 }
 0x2a1   : > { %3085 = vmatpush.bf16.msra.mxu2 %v5828_v39 }
 0x2a4   : > { %5408 = vmatmul.msk.bf16.gmra.mxu2 %vm1300_vm3, %v6250_v45  ;;  %5413 = vmatmul.msk.bf16.gmra.mxu3 %vm1300_vm3, %v6250_v45 }
 0x2a5   : > { %3086 = vmatpush.bf16.msra.mxu2 %v5820_v42 }
 0x2a9   : > { %3087 = vmatpush.bf16.msra.mxu2 %v5812_v47 }
 0x2ad   : > { %3088 = vmatpush.bf16.msra.mxu2 %v5804_v49 }
 0x2b1   : > { %3089 = vmatpush.bf16.msra.mxu2 %v5796_v52 }
 0x2b4   : > { %5409 = vmatmul.msk.bf16.gmra.mxu2 %vm1300_vm3, %v6251_v53  ;;  %5414 = vmatmul.msk.bf16.gmra.mxu3 %vm1300_vm3, %v6251_v53 }
 0x2f7   : > { %v1325_v62 = vpop.f32.mrf.mxu2  ;;  %v1359_v63 = vpop.f32.mrf.mxu3 }
 0x2f8   : > { %v1326_v57 = vadd.f32 %v1325_v62, %v1188_v61  ;;  %v1360_v0 = vadd.f32 %v1359_v63, %v1188_v61 }
 0x2fa   : > { %v1384_v2 = vmax.f32 %v1326_v57, 0.0  ;;  %v1385_v3 = vmax.f32 %v1360_v0, 0.0 }
 0x2fc   : > { %v1404_v5 = vpack.c.bf16 %v1385_v3, %v1384_v2 }
 0x2fe   : > { %1714 = vst [vmem:[#allocation2 + $0x90] sm:$0xff] %v1404_v5  ;;  %v1548_v15 = vunpack.c.l.b16 %v1404_v5  ;;  %v1549_v17 = vunpack.c.h.b16 %v1404_v5 }
 0x2ff   : > { %v1327_v7 = vpop.f32.mrf.mxu2  ;;  %v1361_v58 = vpop.f32.mrf.mxu3 }
 0x300   : > { %v1328_v8 = vadd.f32 %v1327_v7, %v1193_v6  ;;  %v1362_v9 = vadd.f32 %v1361_v58, %v1193_v6 }
 0x302   : > { %v1386_v10 = vmax.f32 %v1328_v8, 0.0  ;;  %v1387_v11 = vmax.f32 %v1362_v9, 0.0 }
 0x304   : > { %v1405_v14 = vpack.c.bf16 %v1387_v11, %v1386_v10 }
 0x306   : > { %1715 = vst [vmem:[#allocation2 + $0x98] sm:$0xff] %v1405_v14  ;;  %v1550_v16 = vunpack.c.l.b16 %v1405_v14  ;;  %v1551_v18 = vunpack.c.h.b16 %v1405_v14 }
 0x307   : > { %v1330_v19 = vpop.f32.mrf.mxu2  ;;  %v1364_v20 = vpop.f32.mrf.mxu3 }
 0x308   : > { %v1331_v13 = vadd.f32 %v1330_v19, %v1198_v60  ;;  %v1365_v4 = vadd.f32 %v1364_v20, %v1198_v60  ;;  %v7220_v21 = vpack.c.b16 %v1550_v16, %v1548_v15  ;;  %v7222_v22 = vpack.c.b16 %v1551_v18, %v1549_v17 }
 0x30a   : > { %v1388_v23 = vmax.f32 %v1331_v13, 0.0  ;;  %v1389_v24 = vmax.f32 %v1365_v4, 0.0 }
 0x30c   : > { %v7224_v25 = vpack.c.bf16 %v1389_v24, %v1388_v23 }
 0x30e   : > { %1716 = vst [vmem:[#allocation2 + $0xa0] sm:$0xff] %v7224_v25 }
 0x30f   : > { %v1332_v27 = vpop.f32.mrf.mxu2  ;;  %v1366_v28 = vpop.f32.mrf.mxu3 }
 0x310   : > { %v1333_v29 = vadd.f32 %v1332_v27, %v1203_v26  ;;  %v1367_v30 = vadd.f32 %v1366_v28, %v1203_v26 }
 0x312   : > { %v1390_v31 = vmax.f32 %v1333_v29, 0.0  ;;  %v1391_v32 = vmax.f32 %v1367_v30, 0.0 }
 0x314   : > { %v7227_v33 = vpack.c.bf16 %v1391_v32, %v1390_v31 }
 0x316   : > { %1717 = vst [vmem:[#allocation2 + $0xa8] sm:$0xff] %v7227_v33 }
 0x317   : > { %v1335_v34 = vpop.f32.mrf.mxu2  ;;  %v1369_v35 = vpop.f32.mrf.mxu3 }
 0x318   : > { %v1336_v36 = vadd.f32 %v1335_v34, %v1208_v12  ;;  %v1370_v37 = vadd.f32 %v1369_v35, %v1208_v12  ;;  %v1554_v34 = vunpack.c.l.b16 %v7227_v33  ;;  %v1555_v35 = vunpack.c.h.b16 %v7227_v33  ;;  %v6254_v33 = vld [vmem:[%s9539_s12 + $0x10] sm:$0xff] }
 0x31a   : > { %v1392_v38 = vmax.f32 %v1336_v36, 0.0  ;;  %v1393_v39 = vmax.f32 %v1370_v37, 0.0  ;;  %v1552_v36 = vunpack.c.l.b16 %v7224_v25  ;;  %v1553_v37 = vunpack.c.h.b16 %v7224_v25  ;;  %v6253_v25 = vld [vmem:[%s9539_s12 + $0x8] sm:$0xff] }
 0x31c   : > { %v7230_v40 = vpack.c.bf16 %v1393_v39, %v1392_v38  ;;  %v1570_v38 = vpack.c.b16 %v1554_v34, %v1552_v36  ;;  %v1571_v39 = vpack.c.b16 %v1555_v35, %v1553_v37  ;;  %v6284_v37 = vld [vmem:[#allocation2 + $0x44] sm:$0xf] }
 0x31e   : > { %1718 = vst [vmem:[#allocation2 + $0xb0] sm:$0xff] %v7230_v40  ;;  %v1556_v30 = vunpack.c.l.b16 %v7230_v40 }
 0x31f   : > { %v1337_v41 = vpop.f32.mrf.mxu2  ;;  %v1371_v42 = vpop.f32.mrf.mxu3 }
 0x320   : > { %v1338_v43 = vadd.f32 %v1337_v41, %v1213_v59  ;;  %v1372_v44 = vadd.f32 %v1371_v42, %v1213_v59  ;;  %v6273_v41 = vld [vmem:[%s9695_s1 + $0x78] sm:$0xff]  ;;  %v6272_v42 = vld [vmem:[%s9695_s1 + $0x70] sm:$0xff] }
 0x321   : > { %1966 = vmatpush.bf16.msrb.mxu3 %v6273_v41 }
 0x322   : > { %v1394_v45 = vmax.f32 %v1338_v43, 0.0  ;;  %v1395_v47 = vmax.f32 %v1372_v44, 0.0  ;;  %v6271_v43 = vld [vmem:[%s9695_s1 + $0x68] sm:$0xff]  ;;  %v6270_v44 = vld [vmem:[%s9695_s1 + $0x60] sm:$0xff] }
 0x324   : > { %v1409_v48 = vpack.c.bf16 %v1395_v47, %v1394_v45  ;;  %v6257_v45 = vld [vmem:[%s9539_s12 + $0x28] sm:$0xff]  ;;  %v1426_v47 = vld [vmem:[%s9539_s12 + $0x30] sm:$0xf] }
 0x325   : > { %1967 = vmatpush.bf16.msrb.mxu3 %v6272_v42 }
 0x326   : > { %1719 = vst [vmem:[#allocation2 + $0xb8] sm:$0xff] %v1409_v48  ;;  %v1558_v28 = vunpack.c.l.b16 %v1409_v48  ;;  %v1559_v29 = vunpack.c.h.b16 %v1409_v48  ;;  %v1530_v48 = vunpack.c.l.b16 %v1426_v47  ;;  %v5813_v47 = vld [vmem:[#allocation2 + $0x28] sm:$0xf0] }
 0x327   : > { %v1340_v46 = vpop.f32.mrf.mxu2  ;;  %v1374_v49 = vpop.f32.mrf.mxu3 }
 0x328   : > { %v1341_v50 = vadd.f32 %v1340_v46, %v7214_v55  ;;  %v1375_v51 = vadd.f32 %v1374_v49, %v7214_v55  ;;  %v1572_v31 = vpack.c.b16 %v1558_v28, %v1556_v30  ;;  %v6269_v46 = vld [vmem:[%s9695_s1 + $0x58] sm:$0xff]  ;;  %v1537_v49 = vpack.c.b16 %v1530_v48, %v1530_v48 }
 0x329   : > { %1968 = vmatpush.bf16.msrb.mxu3 %v6271_v43  ;;  %v5837_v28 = vld [vmem:[#allocation2 + $0x58] sm:$0xf0]  ;;  %v6282_v43 = vld [vmem:[#allocation2 + $0x34] sm:$0xf] }
 0x32a   : > { %v1396_v52 = vmax.f32 %v1341_v50, 0.0  ;;  %v1397_v53 = vmax.f32 %v1375_v51, 0.0  ;;  %v6268_v50 = vld [vmem:[%s9695_s1 + $0x50] sm:$0xff]  ;;  %v6267_v51 = vld [vmem:[%s9695_s1 + $0x48] sm:$0xff] }
 0x32c   : > { %v1410_v60 = vpack.c.bf16 %v1397_v53, %v1396_v52  ;;  %v6266_v52 = vld [vmem:[%s9695_s1 + $0x40] sm:$0xff]  ;;  %s5225_s1 = scalar_lea.sflag [#allocation4], %s689_s24 }
 0x32d   : > { %1969 = vmatpush.bf16.msrb.mxu3 %v6270_v44  ;;  %v705_v53 = vld [vmem:[%s7312_s2] sm:$0xf] }
 0x32e   : > { %1720 = vst [vmem:[#allocation2 + $0xc0] sm:$0xff] %v1410_v60  ;;  %v1560_v3 = vunpack.c.l.b16 %v1410_v60  ;;  %v1561_v6 = vunpack.c.h.b16 %v1410_v60  ;;  %v1443_v60 = vpop.permute.xlu1 %1442 }
 0x32f   : > { %v1342_v61 = vpop.f32.mrf.mxu2  ;;  %v1376_v62 = vpop.f32.mrf.mxu3 }
 0x330   : > { %v1343_v63 = vadd.f32 %v1342_v61, %v7216_v56  ;;  %v1377_v59 = vadd.f32 %v1376_v62, %v7216_v56 }
 0x331   : > { %1970 = vmatpush.bf16.msrb.mxu3 %v6269_v46 }
 0x332   : > { %v1398_v57 = vmax.f32 %v1343_v63, 0.0  ;;  %v1399_v0 = vmax.f32 %v1377_v59, 0.0 }
 0x334   : > { %v1411_v2 = vpack.c.bf16 %v1399_v0, %v1398_v57  ;;  %v1749_v57 = vperm.slane %v705_v53, 0  ;;  %v1750_v0 = vperm.slane %v705_v53, 2 }
 0x335   : > { %1971 = vmatpush.bf16.msrb.mxu3 %v6268_v50 }
 0x336   : > { %1721 = vst [vmem:[#allocation2 + $0xc8] sm:$0xff] %v1411_v2  ;;  %v1562_v5 = vunpack.c.l.b16 %v1411_v2  ;;  %v1563_v7 = vunpack.c.h.b16 %v1411_v2 }
 0x337   : > { %v1345_v58 = vpop.f32.mrf.mxu2  ;;  %v1379_v55 = vpop.f32.mrf.mxu3 }
 0x338   : > { %v1346_v8 = vadd.f32 %v1345_v58, %v7212_v54  ;;  %v1380_v9 = vadd.f32 %v1379_v55, %v7212_v54  ;;  %v1574_v10 = vpack.c.b16 %v1562_v5, %v1560_v3  ;;  %v1575_v11 = vpack.c.b16 %v1563_v7, %v1561_v6  ;;  %v1448_v6 = vpop.permute.xlu2 %1447 }
 0x339   : > { %1972 = vmatpush.bf16.msrb.mxu3 %v6267_v51  ;;  %v7315_v3 = vperm.slane %v1749_v57, 0  ;;  %v7317_v5 = vperm.slane %v1750_v0, 0  ;;  %v6280_v51 = vld [vmem:[#allocation2 + $0x24] sm:$0xf] }
 0x33a   : > { %v1400_v12 = vmax.f32 %v1346_v8, 0.0  ;;  %v1401_v14 = vmax.f32 %v1380_v9, 0.0 }
 0x33c   : > { %v1412_v15 = vpack.c.bf16 %v1401_v14, %v1400_v12 }
 0x33d   : > { %1973 = vmatpush.bf16.msrb.mxu3 %v6266_v52  ;;  %v5816_v52 = vor.u32 %v6280_v51, %v5813_v47 }
 0x33e   : > { %1722 = vst [vmem:[#allocation2 + $0xd0] sm:$0xff] %v1412_v15  ;;  %v1564_v4 = vunpack.c.l.b16 %v1412_v15  ;;  %v1565_v24 = vunpack.c.h.b16 %v1412_v15  ;;  %v5853_v15 = vld [vmem:[#allocation2 + $0x78] sm:$0xf0] }
 0x33f   : > { %v1347_v56 = vpop.f32.mrf.mxu2  ;;  %v1381_v16 = vpop.f32.mrf.mxu3 }
 0x340   : > { %v1348_v17 = vadd.f32 %v1347_v56, %v7218_v1  ;;  %v1382_v18 = vadd.f32 %v1381_v16, %v7218_v1  ;;  %v1557_v1 = vunpack.c.h.b16 %v7230_v40  ;;  %v6252_v40 = vld [vmem:[%s9539_s12] sm:$0xff] }
 0x342   : > { %v1402_v19 = vmax.f32 %v1348_v17, 0.0  ;;  %v1403_v20 = vmax.f32 %v1382_v18, 0.0  ;;  %v1573_v32 = vpack.c.b16 %v1559_v29, %v1557_v1  ;;  %v6290_v17 = vld [vmem:[#allocation2 + $0x74] sm:$0xf]  ;;  %v1458_v1 = vpop.permute.xlu1 %1457 }
 0x343   : > { %v5856_v18 = vor.u32 %v6290_v17, %v5853_v15  ;;  %v6286_v29 = vld [vmem:[#allocation2 + $0x54] sm:$0xf] }
 0x344   : > { %v1413_v13 = vpack.c.bf16 %v1403_v20, %v1402_v19  ;;  %v1453_v19 = vpop.permute.xlu0 %1452  ;;  %v5845_v20 = vld [vmem:[#allocation2 + $0x68] sm:$0xf0]  ;;  %v5840_v30 = vor.u32 %v6286_v29, %v5837_v28  ;;  %v5891_v29 = vld [vmem:[#allocation2 + $0xc0] sm:$0xf] }
 0x346   : > { %1723 = vst [vmem:[#allocation2 + $0xd8] sm:$0xff] %v1413_v13  ;;  %v1566_v23 = vunpack.c.l.b16 %v1413_v13  ;;  %v1567_v54 = vunpack.c.h.b16 %v1413_v13 }
 0x348   : > { %v1576_v26 = vpack.c.b16 %v1566_v23, %v1564_v4  ;;  %v1577_v27 = vpack.c.b16 %v1567_v54, %v1565_v24  ;;  %v6288_v54 = vld [vmem:[#allocation2 + $0x64] sm:$0xf] }
 0x34a   : > { %1613 = vmatpush.bf16.msrb.mxu0 %v1576_v26  ;;  %1656 = vmatpush.bf16.msrb.mxu1 %v1577_v27  ;;  %v5848_v26 = vor.u32 %v6288_v54, %v5845_v20 }
 0x34e   : > { %1614 = vmatpush.bf16.msrb.mxu0 %v1574_v10  ;;  %1657 = vmatpush.bf16.msrb.mxu1 %v1575_v11 }
 0x352   : > { %1615 = vmatpush.bf16.msrb.mxu0 %v1572_v31  ;;  %1658 = vmatpush.bf16.msrb.mxu1 %v1573_v32  ;;  %v5829_v31 = vld [vmem:[#allocation2 + $0x48] sm:$0xf0] }
 0x356   : > { %1616 = vmatpush.bf16.msrb.mxu0 %v1570_v38  ;;  %1659 = vmatpush.bf16.msrb.mxu1 %v1571_v39  ;;  %v5832_v39 = vor.u32 %v6284_v37, %v5829_v31  ;;  %v6299_v31 = vld [vmem:[#allocation2 + $0xb4] sm:$0xf0] }
 0x35a   : > { %1617 = vmatpush.bf16.msrb.mxu0 %v7220_v21  ;;  %1660 = vmatpush.bf16.msrb.mxu1 %v7222_v22  ;;  %v6255_v21 = vld [vmem:[%s9539_s12 + $0x18] sm:$0xff]  ;;  %v6256_v22 = vld [vmem:[%s9539_s12 + $0x20] sm:$0xff] }
 0x35d   : > { %5439 = vmatmul.msk.bf16.vlgmr.msrb.gmra.mxu0 %vm1588_vm4, %v6252_v40  ;;  %5446 = vmatmul.msk.bf16.vlgmr.msrb.gmra.mxu1 %vm1588_vm4, %v6252_v40 }
 0x36d   : > { %5440 = vmatmul.msk.bf16.gmra.mxu0 %vm1588_vm4, %v6253_v25  ;;  %5447 = vmatmul.msk.bf16.gmra.mxu1 %vm1588_vm4, %v6253_v25 }
 0x37d   : > { %5441 = vmatmul.msk.bf16.gmra.mxu0 %vm1588_vm4, %v6254_v33  ;;  %5448 = vmatmul.msk.bf16.gmra.mxu1 %vm1588_vm4, %v6254_v33 }
 0x38d   : > { %5442 = vmatmul.msk.bf16.gmra.mxu0 %vm1588_vm4, %v6255_v21  ;;  %5449 = vmatmul.msk.bf16.gmra.mxu1 %vm1588_vm4, %v6255_v21 }
 0x39d   : > { %5443 = vmatmul.msk.bf16.gmra.mxu0 %vm1588_vm4, %v6256_v22  ;;  %5450 = vmatmul.msk.bf16.gmra.mxu1 %vm1588_vm4, %v6256_v22  ;;  %v5821_v22 = vld [vmem:[#allocation2 + $0x38] sm:$0xf0] }
 0x39e   : > { %v5824_v44 = vor.u32 %v6282_v43, %v5821_v22 }
 0x3ad   : > { %5444 = vmatmul.msk.bf16.gmra.mxu0 %vm1588_vm4, %v6257_v45  ;;  %5451 = vmatmul.msk.bf16.gmra.mxu1 %vm1588_vm4, %v6257_v45  ;;  %v1463_v45 = vpop.permute.xlu2 %1462 }
 0x3bd   : > { %5445 = vmatmul.msk.bf16.gmra.mxu0 %vm1588_vm4, %v1537_v49  ;;  %5452 = vmatmul.msk.bf16.gmra.mxu1 %vm1588_vm4, %v1537_v49 }
 0x3da   : > { %v1619_v61 = vpop.f32.mrf.mxu0  ;;  %v1662_v62 = vpop.f32.mrf.mxu1 }
 0x3db   : > { %v1620_v63 = vadd.f32 %v1619_v61, %v1443_v60  ;;  %v1663_v59 = vadd.f32 %v1662_v62, %v1443_v60  ;;  %v5805_v60 = vld [vmem:[#allocation2 + $0x18] sm:$0xf0] }
 0x3dd   : > { %v1724_v2 = vpack.c.bf16 %v1663_v59, %v1620_v63  ;;  %v1755_v9 = vmul.f32 %v7315_v3, %v1620_v63  ;;  %v1756_v10 = vmul.f32 %v7317_v5, %v1663_v59  ;;  %v6278_v59 = vld [vmem:[#allocation2 + $0x14] sm:$0xf] }
 0x3de   : > { %v5808_v57 = vor.u32 %v6278_v59, %v5805_v60 }
 0x3df   : > { %1736 = vst [vmem:[#allocation2 + $0xe0] sm:$0xff] %v1724_v2  ;;  %v1468_v2 = vpop.permute.xlu0 %1467 }
 0x3e2   : > { %v1621_v7 = vpop.f32.mrf.mxu0  ;;  %v1664_v58 = vpop.f32.mrf.mxu1 }
 0x3e3   : > { %v1622_v55 = vadd.f32 %v1621_v7, %v1448_v6  ;;  %v1665_v8 = vadd.f32 %v1664_v58, %v1448_v6  ;;  %v5797_v6 = vld [vmem:[#allocation2 + $0x8] sm:$0xf0] }
 0x3e5   : > { %v1757_v11 = vmul.f32 %v7315_v3, %v1622_v55  ;;  %v1725_v12 = vpack.c.bf16 %v1665_v8, %v1622_v55  ;;  %v1758_v14 = vmul.f32 %v7317_v5, %v1665_v8 }
 0x3e6   : > { %v5907_v55 = vld [vmem:[#allocation2 + $0xe0] sm:$0xf] }
 0x3e7   : > { %v1781_v56 = vpack.c.bf16 %v1757_v11, %v1755_v9  ;;  %1737 = vst [vmem:[#allocation2 + $0xe8] sm:$0xff] %v1725_v12  ;;  %v1782_v16 = vpack.c.bf16 %v1758_v14, %v1756_v10  ;;  %v6276_v11 = vld [vmem:[#allocation2 + $0x4] sm:$0xf] }
 0x3e8   : > { %v5800_v14 = vor.u32 %v6276_v11, %v5797_v6  ;;  %v6304_v6 = vld [vmem:[#allocation2 + $0xe4] sm:$0xf] }
 0x3e9   : > { %1931 = vmatmul.bf16.vlgmr.msrb.gmra.mxu2 %v1781_v56  ;;  %1974 = vmatmul.bf16.vlgmr.msrb.gmra.mxu3 %v1782_v16 }
 0x3ea   : > { %3438 = vmatpush.bf16.msrb.mxu2 %v5856_v18  ;;  %v1624_v13 = vpop.f32.mrf.mxu0  ;;  %v1667_v4 = vpop.f32.mrf.mxu1  ;;  %v6303_v18 = vld [vmem:[#allocation2 + $0xd4] sm:$0xf0] }
 0x3eb   : > { %v1625_v23 = vadd.f32 %v1624_v13, %v1453_v19  ;;  %v1668_v24 = vadd.f32 %v1667_v4, %v1453_v19  ;;  %v5899_v13 = vld [vmem:[#allocation2 + $0xd0] sm:$0xf] }
 0x3ec   : > { %v5900_v4 = vor.u32 %v6303_v18, %v5899_v13 }
 0x3ed   : > { %v1726_v27 = vpack.c.bf16 %v1668_v24, %v1625_v23  ;;  %v1759_v38 = vmul.f32 %v7315_v3, %v1625_v23  ;;  %v1760_v40 = vmul.f32 %v7317_v5, %v1668_v24  ;;  %v1473_v23 = vpop.permute.xlu1 %1472  ;;  %v6301_v24 = vld [vmem:[#allocation2 + $0xc4] sm:$0xf0] }
 0x3ee   : > { %3439 = vmatpush.bf16.msrb.mxu2 %v5848_v26  ;;  %v6305_v0 = vld [vmem:[#allocation2 + $0xe4] sm:$0xf0] }
 0x3ef   : > { %1738 = vst [vmem:[#allocation2 + $0xf0] sm:$0xff] %v1726_v27  ;;  %v5908_v10 = vor.u32 %v6305_v0, %v5907_v55  ;;  %v5901_v55 = vld [vmem:[#allocation2 + $0xd8] sm:$0xf0] }
 0x3f2   : > { %3440 = vmatpush.bf16.msrb.mxu2 %v5840_v30  ;;  %v1626_v32 = vpop.f32.mrf.mxu0  ;;  %v1669_v34 = vpop.f32.mrf.mxu1  ;;  %v5892_v30 = vor.u32 %v6301_v24, %v5891_v29 }
 0x3f3   : > { %v1627_v35 = vadd.f32 %v1626_v32, %v1458_v1  ;;  %v1670_v36 = vadd.f32 %v1669_v34, %v1458_v1  ;;  %v5883_v32 = vld [vmem:[#allocation2 + $0xb0] sm:$0xf] }
 0x3f4   : > { %v5884_v34 = vor.u32 %v6299_v31, %v5883_v32  ;;  %v5877_v32 = vld [vmem:[#allocation2 + $0xa8] sm:$0xf0] }
 0x3f5   : > { %v1727_v25 = vpack.c.bf16 %v1670_v36, %v1627_v35  ;;  %v1761_v33 = vmul.f32 %v7315_v3, %v1627_v35  ;;  %v1762_v21 = vmul.f32 %v7317_v5, %v1670_v36  ;;  %v1478_v35 = vpop.permute.xlu2 %1477  ;;  %v6297_v36 = vld [vmem:[#allocation2 + $0xa4] sm:$0xf0] }
 0x3f6   : > { %3441 = vmatpush.bf16.msrb.mxu2 %v5832_v39  ;;  %v5915_v61 = vld [vmem:[#allocation2 + $0xf0] sm:$0xf]  ;;  %v6306_v59 = vld [vmem:[#allocation2 + $0xf4] sm:$0xf] }
 0x3f7   : > { %1739 = vst [vmem:[#allocation2 + $0xf8] sm:$0xff] %v1727_v25  ;;  %v1783_v41 = vpack.c.bf16 %v1761_v33, %v1759_v38  ;;  %v1784_v42 = vpack.c.bf16 %v1762_v21, %v1760_v40  ;;  %v5875_v25 = vld [vmem:[#allocation2 + $0xa0] sm:$0xf] }
 0x3f8   : > { %v5876_v21 = vor.u32 %v6297_v36, %v5875_v25 }
 0x3f9   : > { %1936 = vmatmul.bf16.gmra.mxu2 %v1783_v41  ;;  %1979 = vmatmul.bf16.gmra.mxu3 %v1784_v42 }
 0x3fa   : > { %3442 = vmatpush.bf16.msrb.mxu2 %v5824_v44  ;;  %v1629_v48 = vpop.f32.mrf.mxu0  ;;  %v1672_v46 = vpop.f32.mrf.mxu1  ;;  %v6295_v44 = vld [vmem:[#allocation2 + $0x94] sm:$0xf0] }
 0x3fb   : > { %v1630_v49 = vadd.f32 %v1629_v48, %v1463_v45  ;;  %v1673_v50 = vadd.f32 %v1672_v46, %v1463_v45  ;;  %v5867_v48 = vld [vmem:[#allocation2 + $0x90] sm:$0xf] }
 0x3fc   : > { %v5868_v46 = vor.u32 %v6295_v44, %v5867_v48 }
 0x3fd   : > { %v1728_v53 = vpack.c.bf16 %v1673_v50, %v1630_v49  ;;  %v1763_v12 = vmul.f32 %v7315_v3, %v1630_v49  ;;  %v1764_v15 = vmul.f32 %v7317_v5, %v1673_v50  ;;  %v1483_v49 = vpop.permute.xlu0 %1482  ;;  %v6293_v50 = vld [vmem:[#allocation2 + $0x84] sm:$0xf0] }
 0x3fe   : > { %3443 = vmatpush.bf16.msrb.mxu2 %v5816_v52  ;;  %v6307_v62 = vld [vmem:[#allocation2 + $0xf4] sm:$0xf0] }
 0x3ff   : > { %1740 = vst [vmem:[#allocation2 + $0x100] sm:$0xff] %v1728_v53  ;;  %v5916_v63 = vor.u32 %v6307_v62, %v5915_v61  ;;  %v5917_v53 = vld [vmem:[#allocation2 + $0xf8] sm:$0xf0]  ;;  %v5859_v62 = vld [vmem:[#allocation2 + $0x80] sm:$0xf] }
 0x400   : > { %v5920_v0 = vor.u32 %v6306_v59, %v5917_v53 }
 0x401   : > { %3171 = vmatpush.bf16.msra.mxu3 %v5916_v63  ;;  %v5860_v63 = vor.u32 %v6293_v50, %v5859_v62 }
 0x402   : > { %3444 = vmatpush.bf16.msrb.mxu2 %v5808_v57  ;;  %v1631_v7 = vpop.f32.mrf.mxu0  ;;  %v1674_v58 = vpop.f32.mrf.mxu1 }
 0x403   : > { %v1632_v8 = vadd.f32 %v1631_v7, %v1468_v2  ;;  %v1675_v9 = vadd.f32 %v1674_v58, %v1468_v2  ;;  %v5909_v2 = vld [vmem:[#allocation2 + $0xe8] sm:$0xf0]  ;;  %v1488_v7 = vpop.permute.xlu1 %1487 }
 0x404   : > { %v5912_v58 = vor.u32 %v6304_v6, %v5909_v2  ;;  %v5539_v2 = vld [vmem:[%s9541_s14] sm:$0xf]  ;;  %v6330_v6 = vld [vmem:[%s9541_s14 + $0xc] sm:$0xf0] }
 0x405   : > { %v1765_v56 = vmul.f32 %v7315_v3, %v1632_v8  ;;  %v1729_v16 = vpack.c.bf16 %v1675_v9, %v1632_v8  ;;  %v1766_v17 = vmul.f32 %v7317_v5, %v1675_v9  ;;  %3172 = vmatpush.bf16.msra.mxu3 %v5908_v10 }
 0x406   : > { %3445 = vmatpush.bf16.msrb.mxu2 %v5800_v14 }
 0x407   : > { %1741 = vst [vmem:[#allocation2 + $0x108] sm:$0xff] %v1729_v16  ;;  %v1785_v19 = vpack.c.bf16 %v1765_v56, %v1763_v12  ;;  %v1786_v20 = vpack.c.bf16 %v1766_v17, %v1764_v15  ;;  %v6302_v12 = vld [vmem:[#allocation2 + $0xd4] sm:$0xf] }
 0x408   : > { %v5904_v15 = vor.u32 %v6302_v12, %v5901_v55  ;;  %v5555_v55 = vld [vmem:[%s9541_s14 + $0x20] sm:$0xf] }
 0x409   : > { %1941 = vmatmul.bf16.gmra.mxu2 %v1785_v19  ;;  %1984 = vmatmul.bf16.gmra.mxu3 %v1786_v20  ;;  %v5893_v19 = vld [vmem:[#allocation2 + $0xc8] sm:$0xf0] }
 0x40a   : > { %3173 = vmatpush.bf16.msra.mxu3 %v5900_v4  ;;  %v1634_v54 = vpop.f32.mrf.mxu0  ;;  %v1677_v26 = vpop.f32.mrf.mxu1  ;;  %v6300_v4 = vld [vmem:[#allocation2 + $0xc4] sm:$0xf] }
 0x40b   : > { %v1635_v27 = vadd.f32 %v1634_v54, %v1473_v23  ;;  %v1678_v28 = vadd.f32 %v1677_v26, %v1473_v23  ;;  %v1493_v23 = vpop.permute.xlu2 %1492  ;;  %v5896_v24 = vor.u32 %v6300_v4, %v5893_v19  ;;  %v5573_v19 = vld [vmem:[%s9541_s14 + $0x50] sm:$0xf0] }
 0x40d   : > { %v1730_v1 = vpack.c.bf16 %v1678_v28, %v1635_v27  ;;  %v1767_v33 = vmul.f32 %v7315_v3, %v1635_v27  ;;  %v1768_v22 = vmul.f32 %v7317_v5, %v1678_v28  ;;  %v5885_v27 = vld [vmem:[#allocation2 + $0xb8] sm:$0xf0] }
 0x40e   : > { %3174 = vmatpush.bf16.msra.mxu3 %v5892_v30  ;;  %v6298_v30 = vld [vmem:[#allocation2 + $0xb4] sm:$0xf] }
 0x40f   : > { %1742 = vst [vmem:[#allocation2 + $0x110] sm:$0xff] %v1730_v1  ;;  %v5888_v31 = vor.u32 %v6298_v30, %v5885_v27  ;;  %v6342_v30 = vld [vmem:[%s9541_s14 + $0x6c] sm:$0xf0] }
 0x412   : > { %3175 = vmatpush.bf16.msra.mxu3 %v5884_v34  ;;  %v1636_v37 = vpop.f32.mrf.mxu0  ;;  %v1679_v38 = vpop.f32.mrf.mxu1  ;;  %v6296_v34 = vld [vmem:[#allocation2 + $0xa4] sm:$0xf] }
 0x413   : > { %v1637_v39 = vadd.f32 %v1636_v37, %v1478_v35  ;;  %v1680_v40 = vadd.f32 %v1679_v38, %v1478_v35  ;;  %v1498_v35 = vpop.permute.xlu0 %1497  ;;  %v5880_v36 = vor.u32 %v6296_v34, %v5877_v32  ;;  %v5869_v37 = vld [vmem:[#allocation2 + $0x98] sm:$0xf0] }
 0x415   : > { %v1769_v41 = vmul.f32 %v7315_v3, %v1637_v39  ;;  %v1731_v42 = vpack.c.bf16 %v1680_v40, %v1637_v39  ;;  %v1770_v43 = vmul.f32 %v7317_v5, %v1680_v40 }
 0x416   : > { %3176 = vmatpush.bf16.msra.mxu3 %v5876_v21 }
 0x417   : > { %1743 = vst [vmem:[#allocation2 + $0x118] sm:$0xff] %v1731_v42  ;;  %v1787_v45 = vpack.c.bf16 %v1769_v41, %v1767_v33  ;;  %v1788_v47 = vpack.c.bf16 %v1770_v43, %v1768_v22  ;;  %v6294_v33 = vld [vmem:[#allocation2 + $0x94] sm:$0xf] }
 0x418   : > { %v5872_v22 = vor.u32 %v6294_v33, %v5869_v37 }
 0x419   : > { %1946 = vmatmul.bf16.gmra.mxu2 %v1787_v45  ;;  %1989 = vmatmul.bf16.gmra.mxu3 %v1788_v47  ;;  %v5861_v45 = vld [vmem:[#allocation2 + $0x88] sm:$0xf0] }
 0x41a   : > { %3177 = vmatpush.bf16.msra.mxu3 %v5868_v46  ;;  %v1639_v51 = vpop.f32.mrf.mxu0  ;;  %v1682_v52 = vpop.f32.mrf.mxu1  ;;  %v6292_v46 = vld [vmem:[#allocation2 + $0x84] sm:$0xf] }
 0x41b   : > { %v1640_v60 = vadd.f32 %v1639_v51, %v1483_v49  ;;  %v1683_v61 = vadd.f32 %v1682_v52, %v1483_v49  ;;  %v5864_v49 = vor.u32 %v6292_v46, %v5861_v45  ;;  %v1503_v52 = vpop.permute.xlu1 %1502 }
 0x41d   : > { %v1732_v57 = vpack.c.bf16 %v1683_v61, %v1640_v60  ;;  %v1771_v14 = vmul.f32 %v7315_v3, %v1640_v60  ;;  %v1772_v56 = vmul.f32 %v7317_v5, %v1683_v61 }
 0x41e   : > { %3178 = vmatpush.bf16.msra.mxu3 %v5860_v63 }
 0x41f   : > { %1744 = vst [vmem:[#allocation2 + $0x120] sm:$0xff] %v1732_v57 }
 0x422   : > { %3527 = vmatpush.bf16.msrb.mxu3 %v5920_v0  ;;  %v1641_v8 = vpop.f32.mrf.mxu0  ;;  %v1684_v9 = vpop.f32.mrf.mxu1 }
 0x423   : > { %v1642_v10 = vadd.f32 %v1641_v8, %v1488_v7  ;;  %v1685_v11 = vadd.f32 %v1684_v9, %v1488_v7  ;;  %v6328_v7 = vld [vmem:[%s9541_s14 + $0x4] sm:$0xf]  ;;  %v6334_v8 = vld [vmem:[%s9541_s14 + $0x2c] sm:$0xf0] }
 0x424   : > { %v6332_v9 = vld [vmem:[%s9541_s14 + $0x24] sm:$0xf] }
 0x425   : > { %v1773_v16 = vmul.f32 %v7315_v3, %v1642_v10  ;;  %v1733_v17 = vpack.c.bf16 %v1685_v11, %v1642_v10  ;;  %v1774_v18 = vmul.f32 %v7317_v5, %v1685_v11  ;;  %v5557_v10 = vld [vmem:[%s9541_s14 + $0x30] sm:$0xf0]  ;;  %v7375_v11 = vor.u32 %v6334_v8, %v5555_v55 }
 0x426   : > { %3528 = vmatpush.bf16.msrb.mxu3 %v5912_v58  ;;  %v7377_v12 = vor.u32 %v6332_v9, %v5557_v10 }
 0x427   : > { %1745 = vst [vmem:[#allocation2 + $0x128] sm:$0xff] %v1733_v17  ;;  %v1789_v20 = vpack.c.bf16 %v1773_v16, %v1771_v14  ;;  %v1790_v13 = vpack.c.bf16 %v1774_v18, %v1772_v56  ;;  %v5571_v16 = vld [vmem:[%s9541_s14 + $0x40] sm:$0xf]  ;;  %v6338_v17 = vld [vmem:[%s9541_s14 + $0x4c] sm:$0xf0] }
 0x428   : > { %v6336_v18 = vld [vmem:[%s9541_s14 + $0x44] sm:$0xf] }
 0x429   : > { %1951 = vmatmul.bf16.gmra.mxu2 %v1789_v20  ;;  %1994 = vmatmul.bf16.gmra.mxu3 %v1790_v13 }
 0x42a   : > { %3529 = vmatpush.bf16.msrb.mxu3 %v5904_v15  ;;  %v1644_v54 = vpop.f32.mrf.mxu0  ;;  %v1687_v26 = vpop.f32.mrf.mxu1 }
 0x42b   : > { %v1645_v28 = vadd.f32 %v1644_v54, %v1493_v23  ;;  %v1688_v29 = vadd.f32 %v1687_v26, %v1493_v23  ;;  %v7397_v23 = vor.u32 %v6338_v17, %v5571_v16 }
 0x42d   : > { %v1734_v1 = vpack.c.bf16 %v1688_v29, %v1645_v28  ;;  %v1775_v21 = vmul.f32 %v7315_v3, %v1645_v28  ;;  %v1776_v41 = vmul.f32 %v7317_v5, %v1688_v29  ;;  %v7405_v28 = vpop.permute.xlu0 %2387  ;;  %v5587_v29 = vld [vmem:[%s9541_s14 + $0x60] sm:$0xf] }
 0x42e   : > { %3530 = vmatpush.bf16.msrb.mxu3 %v5896_v24  ;;  %v7399_v24 = vor.u32 %v6336_v18, %v5573_v19  ;;  %9698 = vst [vmem:[#allocation12_spill] sm:$0xff] %v7405_v28  ;;  %v5635_v18 = vld [vmem:[%s9541_s14 + $0xc0] sm:$0xf]  ;;  %v6354_v19 = vld [vmem:[%s9541_s14 + $0xcc] sm:$0xf0] }
 0x42f   : > { %1746 = vst [vmem:[#allocation2 + $0x130] sm:$0xff] %v1734_v1  ;;  %v6340_v1 = vld [vmem:[%s9541_s14 + $0x64] sm:$0xf] }
 0x432   : > { %3531 = vmatpush.bf16.msrb.mxu3 %v5888_v31  ;;  %v1646_v38 = vpop.f32.mrf.mxu0  ;;  %v1689_v39 = vpop.f32.mrf.mxu1  ;;  %v5589_v31 = vld [vmem:[%s9541_s14 + $0x70] sm:$0xf0] }
 0x433   : > { %v1647_v40 = vadd.f32 %v1646_v38, %v1498_v35  ;;  %v1690_v25 = vadd.f32 %v1689_v39, %v1498_v35  ;;  %v7423_v37 = vor.u32 %v6340_v1, %v5589_v31  ;;  %v7425_v38 = vpop.permute.xlu1 %2462  ;;  %v7513_v1 = vor.u32 %v6354_v19, %v5635_v18 }
 0x434   : > { %9699 = vst [vmem:[#allocation13_spill] sm:$0xff] %v7425_v38 }
 0x435   : > { %v1777_v42 = vmul.f32 %v7315_v3, %v1647_v40  ;;  %v1735_v43 = vpack.c.bf16 %v1690_v25, %v1647_v40  ;;  %v1778_v44 = vmul.f32 %v7317_v5, %v1690_v25  ;;  %v7429_v39 = vpop.permute.xlu0 %2372 }
 0x436   : > { %3532 = vmatpush.bf16.msrb.mxu3 %v5880_v36  ;;  %v7421_v36 = vor.u32 %v6342_v30, %v5587_v29  ;;  %9700 = vst [vmem:[#allocation14_spill] sm:$0xff] %v7429_v39 }
 0x437   : > { %1747 = vst [vmem:[#allocation2 + $0x138] sm:$0xff] %v1735_v43  ;;  %v1791_v47 = vpack.c.bf16 %v1777_v42, %v1775_v21  ;;  %v1792_v48 = vpack.c.bf16 %v1778_v44, %v1776_v41  ;;  %v5603_v21 = vld [vmem:[%s9541_s14 + $0x80] sm:$0xf]  ;;  %v6344_v41 = vld [vmem:[%s9541_s14 + $0x84] sm:$0xf] }
 0x438   : > { %v5605_v42 = vld [vmem:[%s9541_s14 + $0x90] sm:$0xf0] }
 0x439   : > { %1956 = vmatmul.bf16.gmra.mxu2 %v1791_v47  ;;  %1999 = vmatmul.bf16.gmra.mxu3 %v1792_v48 }
 0x43a   : > { %3533 = vmatpush.bf16.msrb.mxu3 %v5872_v22  ;;  %v1649_v50 = vpop.f32.mrf.mxu0  ;;  %v1692_v51 = vpop.f32.mrf.mxu1  ;;  %v6346_v22 = vld [vmem:[%s9541_s14 + $0x8c] sm:$0xf0] }
 0x43b   : > { %v1650_v53 = vadd.f32 %v1649_v50, %v1503_v52  ;;  %v1693_v60 = vadd.f32 %v1692_v51, %v1503_v52  ;;  %v7445_v43 = vpop.permute.xlu1 %2377  ;;  %v7451_v46 = vor.u32 %v6346_v22, %v5603_v21  ;;  %v7457_v50 = vpop.permute.xlu2 %2382  ;;  %v5521_v22 = vld [vmem:[%s9707_s22 + $0x8] sm:$0xf0] }
 0x43c   : > { %9701 = vst [vmem:[#allocation15_spill] sm:$0xff] %v7445_v43 }
 0x43d   : > { %v1779_v63 = vmul.f32 %v7315_v3, %v1650_v53  ;;  %v1780_v59 = vmul.f32 %v7317_v5, %v1693_v60  ;;  %v5541_v3 = vld [vmem:[%s9541_s14 + $0x10] sm:$0xf0]  ;;  %v7357_v5 = vor.u32 %v6330_v6, %v5539_v2  ;;  %v7447_v47 = vpop.permute.xlu0 %2457 }
 0x43e   : > { %3534 = vmatpush.bf16.msrb.mxu3 %v5864_v49  ;;  %v7359_v58 = vor.u32 %v6328_v7, %v5541_v3  ;;  %9702 = vst [vmem:[#allocation16_spill] sm:$0xff] %v7447_v47  ;;  %v7453_v49 = vor.u32 %v6344_v41, %v5605_v42 }
 0x43f   : > { %v1793_v57 = vpack.c.bf16 %v1779_v63, %v1779_v63  ;;  %v1794_v0 = vpack.c.bf16 %v1780_v59, %v1780_v59  ;;  %v6350_v63 = vld [vmem:[%s9541_s14 + $0xac] sm:$0xf0]  ;;  %v6348_v59 = vld [vmem:[%s9541_s14 + $0xa4] sm:$0xf] }
 0x442   : > { %v1651_v61 = vpop.f32.mrf.mxu0  ;;  %v1694_v62 = vpop.f32.mrf.mxu1 }
 0x443   : > { %v7459_v53 = vpop.permute.xlu1 %2362  ;;  %v5619_v62 = vld [vmem:[%s9541_s14 + $0xa0] sm:$0xf]  ;;  %v7477_v6 = vpop.permute.xlu2 %2467 }
 0x444   : > { %9703 = vst [vmem:[#allocation17_spill] sm:$0xff] %v7477_v6  ;;  %v7481_v3 = vor.u32 %v6350_v63, %v5619_v62  ;;  %v5651_v62 = vld [vmem:[%s9541_s14 + $0xe0] sm:$0xf]  ;;  %v6358_v63 = vld [vmem:[%s9541_s14 + $0xec] sm:$0xf0] }
 0x445   : > { %v7463_v61 = vpop.permute.xlu0 %2442  ;;  %v7553_v19 = vor.u32 %v6358_v63, %v5651_v62  ;;  %v5669_v62 = vld [vmem:[%s9541_s14 + $0x110] sm:$0xf0] }
 0x447   : > { %9709 = vst [vmem:[#allocation22_spill] sm:$0xff] %v7553_v19 }
 0x449   : > { %1961 = vmatmul.bf16.gmra.mxu2 %v1793_v57  ;;  %2004 = vmatmul.bf16.gmra.mxu3 %v1794_v0  ;;  %v5621_v57 = vld [vmem:[%s9541_s14 + $0xb0] sm:$0xf0] }
 0x44a   : > { %v7483_v55 = vor.u32 %v6348_v59, %v5621_v57  ;;  %v6356_v59 = vld [vmem:[%s9541_s14 + $0xe4] sm:$0xf]  ;;  %v5653_v57 = vld [vmem:[%s9541_s14 + $0xf0] sm:$0xf0] }
 0x44b   : > { %v7485_v8 = vpop.permute.xlu1 %2447  ;;  %v7493_v16 = vpop.permute.xlu2 %2452 }
 0x44c   : > { %9704 = vst [vmem:[#allocation18_spill] sm:$0xff] %v7485_v8 }
 0x44d   : > { %v7487_v9 = vpop.permute.xlu0 %2357 }
 0x44e   : > { %9705 = vst [vmem:[#allocation19_spill] sm:$0xff] %v7487_v9 }
 0x453   : > { %v7495_v17 = vpop.permute.xlu1 %2432 }
 0x459   : > { %3090 = vmatmul.bf16.vlgmr.msra.gmra.mxu2 %v7357_v5  ;;  %3179 = vmatmul.bf16.vlgmr.msra.gmra.mxu3 %v7359_v58 }
 0x45b   : > { %v7533_v41 = vpop.permute.xlu1 %2347 }
 0x469   : > { %3095 = vmatmul.bf16.gmra.mxu2 %v7375_v11  ;;  %3184 = vmatmul.bf16.gmra.mxu3 %v7377_v12 }
 0x46c   : > { %v1932_v14 = vpop.f32.mrf.mxu2  ;;  %v1975_v15 = vpop.f32.mrf.mxu3 }
 0x46d   : > { %v7381_v56 = vadd.f32 %v1975_v15, %v1932_v14 }
 0x474   : > { %v1934_v20 = vpop.f32.mrf.mxu2  ;;  %v1977_v13 = vpop.f32.mrf.mxu3 }
 0x475   : > { %v7395_v4 = vadd.f32 %v1977_v13, %v1934_v20  ;;  %v6352_v20 = vld [vmem:[%s9541_s14 + $0xc4] sm:$0xf]  ;;  %v5637_v13 = vld [vmem:[%s9541_s14 + $0xd0] sm:$0xf0] }
 0x476   : > { %v7515_v31 = vor.u32 %v6352_v20, %v5637_v13  ;;  %v7555_v20 = vor.u32 %v6356_v59, %v5653_v57 }
 0x478   : > { %9710 = vst [vmem:[#allocation23_spill] sm:$0xff] %v7555_v20 }
 0x479   : > { %3100 = vmatmul.bf16.gmra.mxu2 %v7397_v23  ;;  %3189 = vmatmul.bf16.gmra.mxu3 %v7399_v24 }
 0x47c   : > { %v1937_v54 = vpop.f32.mrf.mxu2  ;;  %v1980_v26 = vpop.f32.mrf.mxu3 }
 0x47d   : > { %v7403_v27 = vadd.f32 %v1980_v26, %v1937_v54  ;;  %v7509_v54 = vpop.permute.xlu0 %2342 }
 0x484   : > { %v1939_v32 = vpop.f32.mrf.mxu2  ;;  %v1982_v34 = vpop.f32.mrf.mxu3 }
 0x485   : > { %v7419_v35 = vadd.f32 %v1982_v34, %v1939_v32  ;;  %v7517_v32 = vpop.permute.xlu2 %2367  ;;  %v5519_v34 = vld [vmem:[%s9707_s22] sm:$0xf] }
 0x486   : > { %9706 = vst [vmem:[#allocation20_spill] sm:$0xff] %v7517_v32 }
 0x489   : > { %3105 = vmatmul.bf16.gmra.mxu2 %v7421_v36  ;;  %3194 = vmatmul.bf16.gmra.mxu3 %v7423_v37 }
 0x48c   : > { %v1942_v40 = vpop.f32.mrf.mxu2  ;;  %v1985_v25 = vpop.f32.mrf.mxu3 }
 0x48d   : > { %v7431_v33 = vadd.f32 %v1985_v25, %v1942_v40  ;;  %v6275_v40 = vld [vmem:[%s9707_s22 + $0x4] sm:$0xf0]  ;;  %v6274_v25 = vld [vmem:[%s9707_s22 + $0x4] sm:$0xf] }
 0x48e   : > { %v5520_v21 = vor.u32 %v6275_v40, %v5519_v34  ;;  %v5524_v42 = vor.u32 %v6274_v25, %v5521_v22 }
 0x490   : > { %2067 = vmatpush.bf16.msra.mxu0 %v5520_v21  ;;  %2106 = vmatpush.bf16.msra.mxu1 %v5524_v42  ;;  %v5667_v42 = vld [vmem:[%s9541_s14 + $0x100] sm:$0xf] }
 0x494   : > { %v1944_v44 = vpop.f32.mrf.mxu2  ;;  %v1987_v45 = vpop.f32.mrf.mxu3 }
 0x495   : > { %v7449_v48 = vadd.f32 %v1987_v45, %v1944_v44 }
 0x499   : > { %3110 = vmatmul.bf16.gmra.mxu2 %v7451_v46  ;;  %3199 = vmatmul.bf16.gmra.mxu3 %v7453_v49 }
 0x49c   : > { %v1947_v51 = vpop.f32.mrf.mxu2  ;;  %v1990_v52 = vpop.f32.mrf.mxu3 }
 0x49d   : > { %v7461_v60 = vadd.f32 %v1990_v52, %v1947_v51  ;;  %v7535_v51 = vpop.permute.xlu0 %2427 }
 0x49e   : > { %9708 = vst [vmem:[#allocation21_spill] sm:$0xff] %v7535_v51 }
 0x4a4   : > { %v1949_v0 = vpop.f32.mrf.mxu2  ;;  %v1992_v2 = vpop.f32.mrf.mxu3 }
 0x4a5   : > { %v7479_v7 = vadd.f32 %v1992_v2, %v1949_v0  ;;  %v7549_v0 = vpop.permute.xlu2 %2352  ;;  %v7557_v13 = vpop.permute.xlu0 %2412 }
 0x4a9   : > { %3115 = vmatmul.bf16.gmra.mxu2 %v7481_v3  ;;  %3204 = vmatmul.bf16.gmra.mxu3 %v7483_v55 }
 0x4ac   : > { %v1952_v10 = vpop.f32.mrf.mxu2  ;;  %v1995_v14 = vpop.f32.mrf.mxu3 }
 0x4ad   : > { %v7491_v15 = vadd.f32 %v1995_v14, %v1952_v10  ;;  %v7551_v14 = vpop.permute.xlu1 %2332  ;;  %v7561_v34 = vpop.permute.xlu2 %2437 }
 0x4ae   : > { %9711 = vst [vmem:[#allocation24_spill] sm:$0xff] %v7561_v34  ;;  %v7565_v22 = vpop.permute.xlu0 %2327 }
 0x4b4   : > { %v1954_v26 = vpop.f32.mrf.mxu2  ;;  %v1997_v29 = vpop.f32.mrf.mxu3 }
 0x4b5   : > { %v7511_v30 = vadd.f32 %v1997_v29, %v1954_v26  ;;  %v7563_v25 = vpop.permute.xlu1 %2417 }
 0x4b6   : > { %9712 = vst [vmem:[#allocation25_spill] sm:$0xff] %v7563_v25 }
 0x4b9   : > { %3120 = vmatmul.bf16.gmra.mxu2 %v7513_v1  ;;  %3209 = vmatmul.bf16.gmra.mxu3 %v7515_v31 }
 0x4bc   : > { %v1957_v44 = vpop.f32.mrf.mxu2  ;;  %v2000_v45 = vpop.f32.mrf.mxu3 }
 0x4bd   : > { %v2001_v52 = vadd.f32 %v2000_v45, %v1957_v44  ;;  %v6362_v44 = vld [vmem:[%s9541_s14 + $0x10c] sm:$0xf0]  ;;  %v6360_v45 = vld [vmem:[%s9541_s14 + $0x104] sm:$0xf] }
 0x4be   : > { %v7579_v57 = vor.u32 %v6362_v44, %v5667_v42  ;;  %v7593_v44 = vpop.permute.xlu0 %2312 }
 0x4c0   : > { %9713 = vst [vmem:[#allocation26_spill] sm:$0xff] %v7579_v57 }
 0x4c4   : > { %v1959_v2 = vpop.f32.mrf.mxu2  ;;  %v2002_v10 = vpop.f32.mrf.mxu3 }
 0x4c5   : > { %v2003_v18 = vadd.f32 %v2002_v10, %v1959_v2  ;;  %v7581_v2 = vor.u32 %v6360_v45, %v5669_v62 }
 0x4c7   : > { %9714 = vst [vmem:[#allocation27_spill] sm:$0xff] %v7581_v2 }
 0x4c9   : > { %3125 = vmatmul.bf16.gmra.mxu2 %v7553_v19  ;;  %3214 = vmatmul.bf16.gmra.mxu3 %v7555_v20 }
 0x4cc   : > { %v1962_v26 = vpop.f32.mrf.mxu2  ;;  %v2005_v29 = vpop.f32.mrf.mxu3 }
 0x4cd   : > { %v2006_v40 = vadd.f32 %v2005_v29, %v1962_v26  ;;  %v7583_v26 = vpop.permute.xlu2 %2422 }
 0x4cf   : > { %v2009_v21 = vadd.f32 1e-05, %v2006_v40  ;;  %v7585_v40 = vpop.permute.xlu1 %2402 }
 0x4d1   : > { %6487 = vrcp.f32 %v2009_v21 }
 0x4d4   : > { %v1964_v63 = vpop.f32.mrf.mxu2  ;;  %v2007_v59 = vpop.f32.mrf.mxu3 }
 0x4d7   : > { %v6488_v10 = vpop.eup %6487 }
 0x4d8   : > { %v2011_v29 = vperm.slane %v6488_v10, 0 }
 0x4d9   : > { %3130 = vmatmul.bf16.gmra.mxu2 %v7579_v57  ;;  %3219 = vmatmul.bf16.gmra.mxu3 %v7581_v2 }
 0x4da   : > { %v2012_v21 = vmul.f32 %v2011_v29, %v7381_v56  ;;  %v2013_v6 = vmul.f32 %v2011_v29, %v7395_v4  ;;  %v2014_v63 = vmul.f32 %v2011_v29, %v7403_v27  ;;  %v2015_v42 = vmul.f32 %v2011_v29, %v7419_v35 }
 0x4db   : > { %v2016_v45 = vmul.f32 %v2011_v29, %v7431_v33  ;;  %v2017_v62 = vmul.f32 %v2011_v29, %v7449_v48  ;;  %v2018_v59 = vmul.f32 %v2011_v29, %v7461_v60  ;;  %v2019_v56 = vmul.f32 %v2011_v29, %v7479_v7  ;;  %v7610_v7 = vpop.permute.xlu2 %2337 }
 0x4dc   : > { %v3091_v10 = vpop.f32.mrf.mxu2  ;;  %v2024_v57 = vpack.c.bf16 %v2013_v6, %v2012_v21  ;;  %v3180_v38 = vpop.f32.mrf.mxu3  ;;  %v2025_v2 = vpack.c.bf16 %v2015_v42, %v2014_v63  ;;  %v2020_v4 = vmul.f32 %v2011_v29, %v7491_v15  ;;  %v2021_v35 = vmul.f32 %v2011_v29, %v7511_v30  ;;  %v5683_v15 = vld [vmem:[%s9541_s14 + $0x120] sm:$0xf]  ;;  %v6366_v30 = vld [vmem:[%s9541_s14 + $0x12c] sm:$0xf0] }
 0x4dd   : > { %v3092_v27 = vadd.f32 %v3091_v10, %v7593_v44  ;;  %v2026_v20 = vpack.c.bf16 %v2017_v62, %v2016_v45  ;;  %v2022_v19 = vmul.f32 %v2011_v29, %v2001_v52  ;;  %v2027_v33 = vpack.c.bf16 %v2019_v56, %v2018_v59  ;;  %v6364_v52 = vld [vmem:[%s9541_s14 + $0x124] sm:$0xf] }
 0x4de   : > { %5525 = vmatmul.msk.bf16.vlgmr.msra.gmra.mxu0 %vm754_vm0, %v2024_v57  ;;  %5531 = vmatmul.msk.bf16.vlgmr.msra.gmra.mxu1 %vm754_vm0, %v2024_v57  ;;  %v2023_v48 = vmul.f32 %v2011_v29, %v2003_v18  ;;  %v7606_v6 = vpack.c.bf16 %v2021_v35, %v2020_v4  ;;  %v7624_v18 = vpop.permute.xlu1 %2317  ;;  %v7627_v63 = vor.u32 %v6366_v30, %v5683_v15  ;;  %v6370_v35 = vld [vmem:[%s9541_s14 + $0x14c] sm:$0xf0]  ;;  %v5701_v15 = vld [vmem:[%s9541_s14 + $0x150] sm:$0xf0] }
 0x4df   : > { %v7604_v60 = vadd.f32 %v3180_v38, %v3092_v27  ;;  %v5685_v38 = vld [vmem:[%s9541_s14 + $0x130] sm:$0xf0]  ;;  %v5699_v27 = vld [vmem:[%s9541_s14 + $0x140] sm:$0xf] }
 0x4e0   : > { %v7608_v21 = vpack.c.bf16 %v2023_v48, %v2022_v19  ;;  %v7629_v42 = vor.u32 %v6364_v52, %v5685_v38  ;;  %v6368_v48 = vld [vmem:[%s9541_s14 + $0x144] sm:$0xf]  ;;  %v7655_v38 = vor.u32 %v6370_v35, %v5699_v27  ;;  %v5715_v27 = vld [vmem:[%s9541_s14 + $0x160] sm:$0xf]  ;;  %v6374_v35 = vld [vmem:[%s9541_s14 + $0x16c] sm:$0xf0] }
 0x4e1   : > { %9715 = vst [vmem:[#allocation28_spill] sm:$0xff] %v7604_v60 }
 0x4e3   : > { %v7635_v62 = vpop.permute.xlu2 %2322 }
 0x4e4   : > { %v3093_v19 = vpop.f32.mrf.mxu2  ;;  %v3182_v57 = vpop.f32.mrf.mxu3 }
 0x4e5   : > { %v3094_v29 = vadd.f32 %v3093_v19, %v7624_v18  ;;  %v7657_v19 = vor.u32 %v6368_v48, %v5701_v15  ;;  %v6372_v48 = vld [vmem:[%s9541_s14 + $0x164] sm:$0xf]  ;;  %v5717_v15 = vld [vmem:[%s9541_s14 + $0x170] sm:$0xf0] }
 0x4e7   : > { %v7631_v45 = vadd.f32 %v3182_v57, %v3094_v29 }
 0x4e9   : > { %9716 = vst [vmem:[#allocation29_spill] sm:$0xff] %v7631_v45  ;;  %3135 = vmatmul.bf16.gmra.mxu2 %v7627_v63  ;;  %3224 = vmatmul.bf16.gmra.mxu3 %v7629_v42 }
 0x4ec   : > { %v3096_v59 = vpop.f32.mrf.mxu2  ;;  %v3185_v10 = vpop.f32.mrf.mxu3 }
 0x4ed   : > { %v3097_v56 = vadd.f32 %v3096_v59, %v7635_v62 }
 0x4ee   : > { %5526 = vmatmul.msk.bf16.gmra.mxu0 %vm754_vm0, %v2025_v2  ;;  %5532 = vmatmul.msk.bf16.gmra.mxu1 %vm754_vm0, %v2025_v2 }
 0x4ef   : > { %v7640_v4 = vadd.f32 %v3185_v10, %v3097_v56 }
 0x4f1   : > { %9717 = vst [vmem:[#allocation30_spill] sm:$0xff] %v7640_v4 }
 0x4f4   : > { %v3098_v30 = vpop.f32.mrf.mxu2  ;;  %v3187_v2 = vpop.f32.mrf.mxu3 }
 0x4f5   : > { %v3099_v52 = vadd.f32 %v3098_v30, %v7565_v22 }
 0x4f7   : > { %v7659_v57 = vadd.f32 %v3187_v2, %v3099_v52  ;;  %v7681_v52 = vor.u32 %v6374_v35, %v5715_v27  ;;  %v5731_v27 = vld [vmem:[%s9541_s14 + $0x180] sm:$0xf]  ;;  %v6378_v35 = vld [vmem:[%s9541_s14 + $0x18c] sm:$0xf0] }
 0x4f9   : > { %9718 = vst [vmem:[#allocation31_spill] sm:$0xff] %v7659_v57  ;;  %3140 = vmatmul.bf16.gmra.mxu2 %v7655_v38  ;;  %3229 = vmatmul.bf16.gmra.mxu3 %v7657_v19 }
 0x4fc   : > { %v3101_v29 = vpop.f32.mrf.mxu2  ;;  %v3190_v59 = vpop.f32.mrf.mxu3 }
 0x4fd   : > { %v3102_v10 = vadd.f32 %v3101_v29, %v7551_v14  ;;  %v7683_v29 = vor.u32 %v6372_v48, %v5717_v15  ;;  %v6376_v48 = vld [vmem:[%s9541_s14 + $0x184] sm:$0xf]  ;;  %v5733_v15 = vld [vmem:[%s9541_s14 + $0x190] sm:$0xf0] }
 0x4fe   : > { %5527 = vmatmul.msk.bf16.gmra.mxu0 %vm754_vm0, %v2026_v20  ;;  %5533 = vmatmul.msk.bf16.gmra.mxu1 %vm754_vm0, %v2026_v20 }
 0x4ff   : > { %v7666_v56 = vadd.f32 %v3190_v59, %v3102_v10 }
 0x501   : > { %9719 = vst [vmem:[#allocation32_spill] sm:$0xff] %v7666_v56 }
 0x504   : > { %v3103_v30 = vpop.f32.mrf.mxu2  ;;  %v3192_v20 = vpop.f32.mrf.mxu3 }
 0x505   : > { %v3104_v2 = vadd.f32 %v3103_v30, %v7610_v7 }
 0x507   : > { %v7685_v59 = vadd.f32 %v3192_v20, %v3104_v2  ;;  %v7709_v20 = vor.u32 %v6376_v48, %v5733_v15  ;;  %v6382_v48 = vld [vmem:[%s9541_s14 + $0x1ac] sm:$0xf0]  ;;  %v6380_v15 = vld [vmem:[%s9541_s14 + $0x1a4] sm:$0xf] }
 0x509   : > { %9720 = vst [vmem:[#allocation33_spill] sm:$0xff] %v7685_v59  ;;  %3145 = vmatmul.bf16.gmra.mxu2 %v7681_v52  ;;  %3234 = vmatmul.bf16.gmra.mxu3 %v7683_v29 }
 0x50c   : > { %v3106_v10 = vpop.f32.mrf.mxu2  ;;  %v3195_v56 = vpop.f32.mrf.mxu3 }
 0x50d   : > { %v3107_v57 = vadd.f32 %v3106_v10, %v7509_v54 }
 0x50e   : > { %5528 = vmatmul.msk.bf16.gmra.mxu0 %vm754_vm0, %v2027_v33  ;;  %5534 = vmatmul.msk.bf16.gmra.mxu1 %vm754_vm0, %v2027_v33 }
 0x50f   : > { %v7692_v4 = vadd.f32 %v3195_v56, %v3107_v57  ;;  %v7707_v56 = vor.u32 %v6378_v35, %v5731_v27  ;;  %v5747_v35 = vld [vmem:[%s9541_s14 + $0x1a0] sm:$0xf] }
 0x511   : > { %9721 = vst [vmem:[#allocation34_spill] sm:$0xff] %v7692_v4 }
 0x514   : > { %v3108_v30 = vpop.f32.mrf.mxu2  ;;  %v3197_v33 = vpop.f32.mrf.mxu3 }
 0x515   : > { %v3109_v57 = vadd.f32 %v3108_v30, %v7533_v41  ;;  %v5749_v30 = vld [vmem:[%s9541_s14 + $0x1b0] sm:$0xf0] }
 0x517   : > { %v7711_v2 = vadd.f32 %v3197_v33, %v3109_v57  ;;  %v7737_v57 = vor.u32 %v6380_v15, %v5749_v30  ;;  %v6386_v15 = vld [vmem:[%s9541_s14 + $0x1cc] sm:$0xf0]  ;;  %v5765_v30 = vld [vmem:[%s9541_s14 + $0x1d0] sm:$0xf0] }
 0x519   : > { %9722 = vst [vmem:[#allocation35_spill] sm:$0xff] %v7711_v2  ;;  %3150 = vmatmul.bf16.gmra.mxu2 %v7707_v56  ;;  %3239 = vmatmul.bf16.gmra.mxu3 %v7709_v20 }
 0x51c   : > { %v3111_v10 = vpop.f32.mrf.mxu2  ;;  %v3200_v4 = vpop.f32.mrf.mxu3 }
 0x51d   : > { %v3112_v59 = vadd.f32 %v3111_v10, %v7549_v0 }
 0x51e   : > { %5529 = vmatmul.msk.bf16.gmra.mxu0 %vm754_vm0, %v7606_v6  ;;  %5535 = vmatmul.msk.bf16.gmra.mxu1 %vm754_vm0, %v7606_v6 }
 0x51f   : > { %v7720_v27 = vadd.f32 %v3200_v4, %v3112_v59  ;;  %v7735_v59 = vor.u32 %v6382_v48, %v5747_v35  ;;  %v5763_v48 = vld [vmem:[%s9541_s14 + $0x1c0] sm:$0xf] }
 0x521   : > { %9723 = vst [vmem:[#allocation36_spill] sm:$0xff] %v7720_v27 }
 0x524   : > { %v3113_v33 = vpop.f32.mrf.mxu2  ;;  %v3202_v6 = vpop.f32.mrf.mxu3 }
 0x525   : > { %v3114_v4 = vadd.f32 %v3113_v33, %v7487_v9 }
 0x527   : > { %v7739_v10 = vadd.f32 %v3202_v6, %v3114_v4 }
 0x529   : > { %9724 = vst [vmem:[#allocation37_spill] sm:$0xff] %v7739_v10  ;;  %3155 = vmatmul.bf16.gmra.mxu2 %v7735_v59  ;;  %3244 = vmatmul.bf16.gmra.mxu3 %v7737_v57 }
 0x52c   : > { %v3116_v27 = vpop.f32.mrf.mxu2  ;;  %v3205_v2 = vpop.f32.mrf.mxu3 }
 0x52d   : > { %v3117_v45 = vadd.f32 %v3116_v27, %v7459_v53  ;;  %v6384_v27 = vld [vmem:[%s9541_s14 + $0x1c4] sm:$0xf] }
 0x52e   : > { %5530 = vmatmul.msk.bf16.gmra.mxu0 %vm754_vm0, %v7608_v21  ;;  %5536 = vmatmul.msk.bf16.gmra.mxu1 %vm754_vm0, %v7608_v21  ;;  %v7765_v6 = vor.u32 %v6384_v27, %v5765_v30  ;;  %v5781_v27 = vld [vmem:[%s9541_s14 + $0x1f0] sm:$0xf0] }
 0x52f   : > { %v7748_v35 = vadd.f32 %v3205_v2, %v3117_v45  ;;  %v7763_v2 = vor.u32 %v6386_v15, %v5763_v48  ;;  %v6390_v48 = vld [vmem:[%s9541_s14 + $0x1ec] sm:$0xf0]  ;;  %v6388_v15 = vld [vmem:[%s9541_s14 + $0x1e4] sm:$0xf] }
 0x530   : > { %9727 = vst [vmem:[#allocation40_spill] sm:$0xff] %v7765_v6 }
 0x531   : > { %9725 = vst [vmem:[#allocation38_spill] sm:$0xff] %v7748_v35 }
 0x532   : > { %9726 = vst [vmem:[#allocation39_spill] sm:$0xff] %v7763_v2 }
 0x534   : > { %v3118_v33 = vpop.f32.mrf.mxu2  ;;  %v3207_v21 = vpop.f32.mrf.mxu3 }
 0x535   : > { %v3119_v45 = vadd.f32 %v3118_v33, %v7517_v32  ;;  %v5779_v33 = vld [vmem:[%s9541_s14 + $0x1e0] sm:$0xf] }
 0x537   : > { %v7767_v4 = vadd.f32 %v3207_v21, %v3119_v45  ;;  %v7789_v21 = vor.u32 %v6388_v15, %v5781_v27 }
 0x539   : > { %9728 = vst [vmem:[#allocation41_spill] sm:$0xff] %v7767_v4  ;;  %3160 = vmatmul.bf16.gmra.mxu2 %v7763_v2  ;;  %3249 = vmatmul.bf16.gmra.mxu3 %v7765_v6  ;;  %v7798_v6 = vpop.permute.xlu2 %2407 }
 0x53a   : > { %9731 = vst [vmem:[#allocation44_spill] sm:$0xff] %v7798_v6 }
 0x53c   : > { %v3121_v9 = vpop.f32.mrf.mxu2  ;;  %v3210_v35 = vpop.f32.mrf.mxu3 }
 0x53d   : > { %v3122_v10 = vadd.f32 %v3121_v9, %v7429_v39 }
 0x53f   : > { %v7772_v60 = vadd.f32 %v3210_v35, %v3122_v10  ;;  %v7787_v35 = vor.u32 %v6390_v48, %v5779_v33 }
 0x541   : > { %9729 = vst [vmem:[#allocation42_spill] sm:$0xff] %v7772_v60  ;;  %v7805_v15 = vpop.permute.xlu2 %2392 }
 0x544   : > { %v3123_v30 = vpop.f32.mrf.mxu2  ;;  %v3212_v9 = vpop.f32.mrf.mxu3 }
 0x545   : > { %v3124_v10 = vadd.f32 %v3123_v30, %v7445_v43 }
 0x547   : > { %v7791_v45 = vadd.f32 %v3212_v9, %v3124_v10 }
 0x549   : > { %3165 = vmatmul.bf16.gmra.mxu2 %v7787_v35  ;;  %3254 = vmatmul.bf16.gmra.mxu3 %v7789_v21 }
 0x54c   : > { %v3126_v32 = vpop.f32.mrf.mxu2  ;;  %v3215_v60 = vpop.f32.mrf.mxu3 }
 0x54d   : > { %v3127_v4 = vadd.f32 %v3126_v32, %v7457_v50 }
 0x54f   : > { %v7796_v39 = vadd.f32 %v3215_v60, %v3127_v4 }
 0x551   : > { %9730 = vst [vmem:[#allocation43_spill] sm:$0xff] %v7796_v39  ;;  %v7810_v39 = vpop.permute.xlu0 %2397 }
 0x552   : > { %9734 = vst [vmem:[#allocation47_spill] sm:$0xff] %v7810_v39 }
 0x554   : > { %v3128_v2 = vpop.f32.mrf.mxu2  ;;  %v3217_v30 = vpop.f32.mrf.mxu3 }
 0x555   : > { %v3129_v33 = vadd.f32 %v3128_v2, %v7405_v28 }
 0x557   : > { %v7801_v48 = vadd.f32 %v3217_v30, %v3129_v33 }
 0x559   : > { %9732 = vst [vmem:[#allocation45_spill] sm:$0xff] %v7801_v48  ;;  %3446 = vmatmul.bf16.vlgmr.msrb.gmra.mxu2 %v7357_v5  ;;  %3535 = vmatmul.bf16.vlgmr.msrb.gmra.mxu3 %v7359_v58 }
 0x55b   : > { %v2069_v27 = vpop.f32.mrf.mxu0  ;;  %v2108_v9 = vpop.f32.mrf.mxu1 }
 0x55c   : > { %v2138_v10 = vpack.c.bf16 %v2108_v9, %v2069_v27  ;;  %v3131_v32 = vpop.f32.mrf.mxu2  ;;  %v3220_v60 = vpop.f32.mrf.mxu3 }
 0x55d   : > { %v3132_v4 = vadd.f32 %v3131_v32, %v7805_v15 }
 0x55e   : > { %2150 = vst [vmem:[#allocation2 + $0x140] sm:$0xff] %v2138_v10 }
 0x55f   : > { %v7808_v43 = vadd.f32 %v3220_v60, %v3132_v4 }
 0x561   : > { %9733 = vst [vmem:[#allocation46_spill] sm:$0xff] %v7808_v43 }
 0x563   : > { %v2071_v2 = vpop.f32.mrf.mxu0  ;;  %v2110_v30 = vpop.f32.mrf.mxu1 }
 0x564   : > { %v2139_v33 = vpack.c.bf16 %v2110_v30, %v2071_v2  ;;  %v3133_v5 = vpop.f32.mrf.mxu2  ;;  %v3222_v28 = vpop.f32.mrf.mxu3 }
 0x565   : > { %v3134_v58 = vadd.f32 %v3133_v5, %v7810_v39 }
 0x566   : > { %2151 = vst [vmem:[#allocation2 + $0x148] sm:$0xff] %v2139_v33 }
 0x567   : > { %v7813_v48 = vadd.f32 %v3222_v28, %v3134_v58 }
 0x569   : > { %3451 = vmatmul.bf16.gmra.mxu2 %v7375_v11  ;;  %3540 = vmatmul.bf16.gmra.mxu3 %v7377_v12 }
 0x56b   : > { %v2074_v27 = vpop.f32.mrf.mxu0  ;;  %v2113_v9 = vpop.f32.mrf.mxu1 }
 0x56c   : > { %v2140_v10 = vpack.c.bf16 %v2113_v9, %v2074_v27  ;;  %v3136_v32 = vpop.f32.mrf.mxu2  ;;  %v3225_v60 = vpop.f32.mrf.mxu3 }
 0x56d   : > { %v3137_v4 = vadd.f32 %v3136_v32, %v7585_v40 }
 0x56e   : > { %2152 = vst [vmem:[#allocation2 + $0x150] sm:$0xff] %v2140_v10 }
 0x56f   : > { %v7818_v2 = vadd.f32 %v3225_v60, %v3137_v4 }
 0x573   : > { %v2076_v30 = vpop.f32.mrf.mxu0  ;;  %v2115_v43 = vpop.f32.mrf.mxu1 }
 0x574   : > { %v2141_v5 = vpack.c.bf16 %v2115_v43, %v2076_v30  ;;  %v3138_v33 = vpop.f32.mrf.mxu2  ;;  %v3227_v28 = vpop.f32.mrf.mxu3 }
 0x575   : > { %v3139_v58 = vadd.f32 %v3138_v33, %v7798_v6 }
 0x576   : > { %2153 = vst [vmem:[#allocation2 + $0x158] sm:$0xff] %v2141_v5 }
 0x577   : > { %v7821_v11 = vadd.f32 %v3227_v28, %v3139_v58 }
 0x579   : > { %3456 = vmatmul.bf16.gmra.mxu2 %v7397_v23  ;;  %3545 = vmatmul.bf16.gmra.mxu3 %v7399_v24 }
 0x57b   : > { %v2079_v12 = vpop.f32.mrf.mxu0  ;;  %v2118_v27 = vpop.f32.mrf.mxu1 }
 0x57c   : > { %v2142_v9 = vpack.c.bf16 %v2118_v27, %v2079_v12  ;;  %v3141_v10 = vpop.f32.mrf.mxu2  ;;  %v3230_v32 = vpop.f32.mrf.mxu3 }
 0x57d   : > { %v3142_v60 = vadd.f32 %v3141_v10, %v7557_v13 }
 0x57e   : > { %2154 = vst [vmem:[#allocation2 + $0x160] sm:$0xff] %v2142_v9 }
 0x57f   : > { %v7826_v43 = vadd.f32 %v3230_v32, %v3142_v60 }
 0x583   : > { %v2081_v4 = vpop.f32.mrf.mxu0  ;;  %v2120_v30 = vpop.f32.mrf.mxu1 }
 0x584   : > { %v2143_v33 = vpack.c.bf16 %v2120_v30, %v2081_v4  ;;  %v3143_v5 = vpop.f32.mrf.mxu2  ;;  %v3232_v28 = vpop.f32.mrf.mxu3 }
 0x585   : > { %v3144_v58 = vadd.f32 %v3143_v5, %v7563_v25 }
 0x586   : > { %2155 = vst [vmem:[#allocation2 + $0x168] sm:$0xff] %v2143_v33 }
 0x587   : > { %v7829_v23 = vadd.f32 %v3232_v28, %v3144_v58 }
 0x589   : > { %3461 = vmatmul.bf16.gmra.mxu2 %v7421_v36  ;;  %3550 = vmatmul.bf16.gmra.mxu3 %v7423_v37 }
 0x58b   : > { %v2084_v24 = vpop.f32.mrf.mxu0  ;;  %v2123_v12 = vpop.f32.mrf.mxu1 }
 0x58c   : > { %v2144_v27 = vpack.c.bf16 %v2123_v12, %v2084_v24  ;;  %v3146_v9 = vpop.f32.mrf.mxu2  ;;  %v3235_v10 = vpop.f32.mrf.mxu3 }
 0x58d   : > { %v3147_v32 = vadd.f32 %v3146_v9, %v7583_v26 }
 0x58e   : > { %2156 = vst [vmem:[#allocation2 + $0x170] sm:$0xff] %v2144_v27 }
 0x58f   : > { %v7834_v60 = vadd.f32 %v3235_v10, %v3147_v32 }
 0x593   : > { %v2086_v4 = vpop.f32.mrf.mxu0  ;;  %v2125_v30 = vpop.f32.mrf.mxu1 }
 0x594   : > { %v2145_v5 = vpack.c.bf16 %v2125_v30, %v2086_v4  ;;  %v3148_v33 = vpop.f32.mrf.mxu2  ;;  %v3237_v28 = vpop.f32.mrf.mxu3 }
 0x595   : > { %v3149_v58 = vadd.f32 %v3148_v33, %v7535_v51  ;;  %v5979_v32 = vld [vmem:[#allocation2 + $0x170] sm:$0xf]  ;;  %v5971_v33 = vld [vmem:[#allocation2 + $0x160] sm:$0xf] }
 0x596   : > { %2157 = vst [vmem:[#allocation2 + $0x178] sm:$0xff] %v2145_v5  ;;  %v6321_v5 = vld [vmem:[#allocation2 + $0x164] sm:$0xf0] }
 0x597   : > { %v7837_v36 = vadd.f32 %v3237_v28, %v3149_v58  ;;  %v5972_v28 = vor.u32 %v6321_v5, %v5971_v33  ;;  %v6315_v5 = vld [vmem:[#allocation2 + $0x134] sm:$0xf0] }
 0x599   : > { %3466 = vmatmul.bf16.gmra.mxu2 %v7451_v46  ;;  %3555 = vmatmul.bf16.gmra.mxu3 %v7453_v49  ;;  %v6319_v49 = vld [vmem:[#allocation2 + $0x154] sm:$0xf0] }
 0x59b   : > { %v2089_v37 = vpop.f32.mrf.mxu0  ;;  %v2128_v24 = vpop.f32.mrf.mxu1 }
 0x59c   : > { %v2146_v12 = vpack.c.bf16 %v2128_v24, %v2089_v37  ;;  %v3151_v27 = vpop.f32.mrf.mxu2  ;;  %v3240_v9 = vpop.f32.mrf.mxu3 }
 0x59d   : > { %v3152_v10 = vadd.f32 %v3151_v27, %v7495_v17  ;;  %v6323_v4 = vld [vmem:[#allocation2 + $0x174] sm:$0xf0]  ;;  %v5963_v27 = vld [vmem:[#allocation2 + $0x150] sm:$0xf] }
 0x59e   : > { %2158 = vst [vmem:[#allocation2 + $0x180] sm:$0xff] %v2146_v12  ;;  %v5980_v30 = vor.u32 %v6323_v4, %v5979_v32  ;;  %v5964_v51 = vor.u32 %v6319_v49, %v5963_v27  ;;  %v6311_v27 = vld [vmem:[#allocation2 + $0x114] sm:$0xf0] }
 0x59f   : > { %v7842_v39 = vadd.f32 %v3240_v9, %v3152_v10  ;;  %v6317_v9 = vld [vmem:[#allocation2 + $0x144] sm:$0xf0]  ;;  %v5955_v10 = vld [vmem:[#allocation2 + $0x140] sm:$0xf] }
 0x5a0   : > { %3260 = vmatpush.bf16.msrb.mxu0 %v5980_v30  ;;  %v5956_v32 = vor.u32 %v6317_v9, %v5955_v10 }
 0x5a3   : > { %v2091_v46 = vpop.f32.mrf.mxu0  ;;  %v2130_v58 = vpop.f32.mrf.mxu1 }
 0x5a4   : > { %v2147_v6 = vpack.c.bf16 %v2130_v58, %v2091_v46  ;;  %v3153_v25 = vpop.f32.mrf.mxu2  ;;  %3261 = vmatpush.bf16.msrb.mxu0 %v5972_v28  ;;  %v3242_v37 = vpop.f32.mrf.mxu3  ;;  %v5947_v46 = vld [vmem:[#allocation2 + $0x130] sm:$0xf] }
 0x5a5   : > { %v3154_v24 = vadd.f32 %v3153_v25, %v7561_v34  ;;  %v5948_v58 = vor.u32 %v6315_v5, %v5947_v46  ;;  %v6309_v5 = vld [vmem:[#allocation2 + $0x104] sm:$0xf0]  ;;  %v6331_v46 = vld [vmem:[%s9541_s14 + $0x14] sm:$0xf0] }
 0x5a6   : > { %2159 = vst [vmem:[#allocation2 + $0x188] sm:$0xff] %v2147_v6 }
 0x5a7   : > { %v7845_v12 = vadd.f32 %v3242_v37, %v3154_v24 }
 0x5a8   : > { %3262 = vmatpush.bf16.msrb.mxu0 %v5964_v51  ;;  %v6313_v51 = vld [vmem:[#allocation2 + $0x124] sm:$0xf0] }
 0x5a9   : > { %3471 = vmatmul.bf16.gmra.mxu2 %v7481_v3  ;;  %3560 = vmatmul.bf16.gmra.mxu3 %v7483_v55  ;;  %v5939_v3 = vld [vmem:[#allocation2 + $0x120] sm:$0xf] }
 0x5aa   : > { %v5940_v55 = vor.u32 %v6313_v51, %v5939_v3  ;;  %v6322_v3 = vld [vmem:[#allocation2 + $0x174] sm:$0xf] }
 0x5ab   : > { %v2094_v4 = vpop.f32.mrf.mxu0  ;;  %v2133_v30 = vpop.f32.mrf.mxu1 }
 0x5ac   : > { %v2148_v33 = vpack.c.bf16 %v2133_v30, %v2094_v4  ;;  %v3156_v28 = vpop.f32.mrf.mxu2  ;;  %3263 = vmatpush.bf16.msrb.mxu0 %v5956_v32  ;;  %v3245_v25 = vpop.f32.mrf.mxu3  ;;  %v5931_v30 = vld [vmem:[#allocation2 + $0x110] sm:$0xf] }
 0x5ad   : > { %v3157_v6 = vadd.f32 %v3156_v28, %v7463_v61  ;;  %v5932_v28 = vor.u32 %v6311_v27, %v5931_v30  ;;  %v5989_v34 = vld [vmem:[#allocation2 + $0x188] sm:$0xf0] }
 0x5ae   : > { %2160 = vst [vmem:[#allocation2 + $0x190] sm:$0xff] %v2148_v33 }
 0x5af   : > { %v7850_v49 = vadd.f32 %v3245_v25, %v3157_v6  ;;  %v5981_v25 = vld [vmem:[#allocation2 + $0x178] sm:$0xf0]  ;;  %v5547_v6 = vld [vmem:[%s9541_s14 + $0x8] sm:$0xf] }
 0x5b0   : > { %3264 = vmatpush.bf16.msrb.mxu0 %v5948_v58  ;;  %v5923_v58 = vld [vmem:[#allocation2 + $0x100] sm:$0xf] }
 0x5b1   : > { %v5924_v51 = vor.u32 %v6309_v5, %v5923_v58  ;;  %v6325_v5 = vld [vmem:[#allocation2 + $0x184] sm:$0xf0]  ;;  %v5549_v58 = vld [vmem:[%s9541_s14 + $0x18] sm:$0xf0] }
 0x5b3   : > { %v2096_v37 = vpop.f32.mrf.mxu0  ;;  %v2135_v24 = vpop.f32.mrf.mxu1 }
 0x5b4   : > { %v2149_v9 = vpack.c.bf16 %v2135_v24, %v2096_v37  ;;  %v3158_v10 = vpop.f32.mrf.mxu2  ;;  %3265 = vmatpush.bf16.msrb.mxu0 %v5940_v55  ;;  %v3247_v4 = vpop.f32.mrf.mxu3  ;;  %v5984_v55 = vor.u32 %v6322_v3, %v5981_v25  ;;  %v7863_v37 = vor.u32 %v6331_v46, %v5547_v6  ;;  %v5965_v25 = vld [vmem:[#allocation2 + $0x158] sm:$0xf0]  ;;  %v6329_v46 = vld [vmem:[%s9541_s14 + $0xc] sm:$0xf] }
 0x5b5   : > { %v3159_v32 = vadd.f32 %v3158_v10, %v7485_v8  ;;  %v6316_v8 = vld [vmem:[#allocation2 + $0x144] sm:$0xf] }
 0x5b6   : > { %2161 = vst [vmem:[#allocation2 + $0x198] sm:$0xff] %v2149_v9  ;;  %v5973_v9 = vld [vmem:[#allocation2 + $0x168] sm:$0xf0] }
 0x5b7   : > { %v7853_v33 = vadd.f32 %v3247_v4, %v3159_v32  ;;  %v5995_v4 = vld [vmem:[#allocation2 + $0x190] sm:$0xf] }
 0x5b8   : > { %3266 = vmatpush.bf16.msrb.mxu0 %v5932_v28  ;;  %v6320_v28 = vld [vmem:[#allocation2 + $0x164] sm:$0xf] }
 0x5b9   : > { %3476 = vmatmul.bf16.gmra.mxu2 %v7513_v1  ;;  %3565 = vmatmul.bf16.gmra.mxu3 %v7515_v31  ;;  %v5976_v31 = vor.u32 %v6320_v28, %v5973_v9  ;;  %v7875_v9 = vor.u32 %v6329_v46, %v5549_v58  ;;  %v5563_v46 = vld [vmem:[%s9541_s14 + $0x28] sm:$0xf]  ;;  %v6335_v58 = vld [vmem:[%s9541_s14 + $0x34] sm:$0xf0] }
 0x5bc   : > { %v3161_v24 = vpop.f32.mrf.mxu2  ;;  %3267 = vmatpush.bf16.msrb.mxu0 %v5924_v51  ;;  %v3250_v27 = vpop.f32.mrf.mxu3  ;;  %v5987_v51 = vld [vmem:[#allocation2 + $0x180] sm:$0xf] }
 0x5bd   : > { %v3162_v10 = vadd.f32 %v3161_v24, %v7493_v16  ;;  %v6327_v32 = vld [vmem:[#allocation2 + $0x194] sm:$0xf0]  ;;  %v5997_v6 = vld [vmem:[#allocation2 + $0x198] sm:$0xf0]  ;;  %v5988_v3 = vor.u32 %v6325_v5, %v5987_v51  ;;  %v6326_v24 = vld [vmem:[#allocation2 + $0x194] sm:$0xf] }
 0x5be   : > { %v5996_v30 = vor.u32 %v6327_v32, %v5995_v4  ;;  %v6324_v5 = vld [vmem:[#allocation2 + $0x184] sm:$0xf]  ;;  %v9736_v51 = vld [vmem:[#allocation22_spill] sm:$0xff] }
 0x5bf   : > { %v7866_v1 = vadd.f32 %v3250_v27, %v3162_v10  ;;  %3268 = vmatmul.bf16.vlgmr.msrb.gmra.mxu0 %v7863_v37  ;;  %v6000_v10 = vor.u32 %v6326_v24, %v5997_v6  ;;  %v5949_v6 = vld [vmem:[#allocation2 + $0x138] sm:$0xf0] }
 0x5c0   : > { %3616 = vmatpush.bf16.msra.mxu0 %v5984_v55  ;;  %3355 = vmatpush.bf16.msrb.mxu1 %v5996_v30  ;;  %v6318_v55 = vld [vmem:[#allocation2 + $0x154] sm:$0xf]  ;;  %v5957_v30 = vld [vmem:[#allocation2 + $0x148] sm:$0xf0] }
 0x5c1   : > { %9735 = vst [vmem:[#allocation48_spill] sm:$0xff] %v7866_v1  ;;  %v5968_v27 = vor.u32 %v6318_v55, %v5965_v25  ;;  %v5992_v25 = vor.u32 %v6324_v5, %v5989_v34  ;;  %v6314_v55 = vld [vmem:[#allocation2 + $0x134] sm:$0xf] }
 0x5c2   : > { %v5952_v24 = vor.u32 %v6314_v55, %v5949_v6  ;;  %v5565_v6 = vld [vmem:[%s9541_s14 + $0x38] sm:$0xf0] }
 0x5c4   : > { %3617 = vmatpush.bf16.msra.mxu0 %v5976_v31  ;;  %v3163_v4 = vpop.f32.mrf.mxu2  ;;  %3356 = vmatpush.bf16.msrb.mxu1 %v5988_v3  ;;  %v3252_v32 = vpop.f32.mrf.mxu3  ;;  %v5960_v31 = vor.u32 %v6316_v8, %v5957_v30  ;;  %v9737_v3 = vld [vmem:[#allocation23_spill] sm:$0xff]  ;;  %v7890_v8 = vor.u32 %v6335_v58, %v5563_v46  ;;  %v6312_v30 = vld [vmem:[#allocation2 + $0x124] sm:$0xf]  ;;  %v6310_v46 = vld [vmem:[#allocation2 + $0x114] sm:$0xf] }
 0x5c5   : > { %v3164_v28 = vadd.f32 %v3163_v4, %v7447_v47  ;;  %v9738_v4 = vld [vmem:[#allocation13_spill] sm:$0xff]  ;;  %v9756_v47 = vld [vmem:[#allocation28_spill] sm:$0xff] }
 0x5c7   : > { %v7878_v1 = vadd.f32 %v3252_v32, %v3164_v28  ;;  %6001 = vmatmul.msk.bf16.vlgmr.msrb.gmra.mxu1 %vm888_vm1, %v7875_v9 }
 0x5c8   : > { %3618 = vmatpush.bf16.msra.mxu0 %v5968_v27  ;;  %3711 = vmatpush.bf16.msra.mxu1 %v6000_v10  ;;  %v5941_v10 = vld [vmem:[#allocation2 + $0x128] sm:$0xf0] }
 0x5c9   : > { %3481 = vmatmul.bf16.gmra.mxu2 %v9736_v51  ;;  %3570 = vmatmul.bf16.gmra.mxu3 %v9737_v3  ;;  %v5944_v5 = vor.u32 %v6312_v30, %v5941_v10  ;;  %v6308_v10 = vld [vmem:[#allocation2 + $0x104] sm:$0xf] }
 0x5cc   : > { %3619 = vmatpush.bf16.msra.mxu0 %v5960_v31  ;;  %3712 = vmatpush.bf16.msra.mxu1 %v5992_v25  ;;  %v3166_v34 = vpop.f32.mrf.mxu2  ;;  %v3255_v27 = vpop.f32.mrf.mxu3  ;;  %v5933_v31 = vld [vmem:[#allocation2 + $0x118] sm:$0xf0]  ;;  %v6333_v25 = vld [vmem:[%s9541_s14 + $0x2c] sm:$0xf] }
 0x5cd   : > { %v3167_v32 = vadd.f32 %v3166_v34, %v9738_v4  ;;  %v5936_v58 = vor.u32 %v6310_v46, %v5933_v31  ;;  %v7902_v51 = vor.u32 %v6333_v25, %v5565_v6  ;;  %v9739_v34 = vld [vmem:[#allocation17_spill] sm:$0xff]  ;;  %v6339_v31 = vld [vmem:[%s9541_s14 + $0x54] sm:$0xf0]  ;;  %v9740_v25 = vld [vmem:[#allocation26_spill] sm:$0xff] }
 0x5ce   : > { %v9741_v6 = vld [vmem:[#allocation27_spill] sm:$0xff] }
 0x5cf   : > { %v7893_v28 = vadd.f32 %v3255_v27, %v3167_v32  ;;  %3273 = vmatmul.bf16.gmra.mxu0 %v7890_v8 }
 0x5d0   : > { %3620 = vmatpush.bf16.msra.mxu0 %v5952_v24  ;;  %v5925_v24 = vld [vmem:[#allocation2 + $0x108] sm:$0xf0] }
 0x5d1   : > { %v5928_v30 = vor.u32 %v6308_v10, %v5925_v24  ;;  %v5581_v10 = vld [vmem:[%s9541_s14 + $0x58] sm:$0xf0] }
 0x5d4   : > { %3621 = vmatpush.bf16.msra.mxu0 %v5944_v5  ;;  %v3168_v3 = vpop.f32.mrf.mxu2  ;;  %v3257_v55 = vpop.f32.mrf.mxu3  ;;  %v5579_v5 = vld [vmem:[%s9541_s14 + $0x48] sm:$0xf] }
 0x5d5   : > { %v3169_v27 = vadd.f32 %v3168_v3, %v9739_v34  ;;  %v7917_v46 = vor.u32 %v6339_v31, %v5579_v5 }
 0x5d7   : > { %v7905_v32 = vadd.f32 %v3257_v55, %v3169_v27  ;;  %6002 = vmatmul.msk.bf16.gmra.mxu1 %vm888_vm1, %v7902_v51  ;;  %v6337_v27 = vld [vmem:[%s9541_s14 + $0x4c] sm:$0xf] }
 0x5d8   : > { %3622 = vmatpush.bf16.msra.mxu0 %v5936_v58 }
 0x5d9   : > { %3486 = vmatmul.bf16.gmra.mxu2 %v9740_v25  ;;  %3575 = vmatmul.bf16.gmra.mxu3 %v9741_v6 }
 0x5dc   : > { %3623 = vmatpush.bf16.msra.mxu0 %v5928_v30  ;;  %v3447_v58 = vpop.f32.mrf.mxu2  ;;  %v3536_v3 = vpop.f32.mrf.mxu3  ;;  %v7929_v30 = vor.u32 %v6337_v27, %v5581_v10 }
 0x5dd   : > { %v3448_v55 = vadd.f32 %v3447_v58, %v7593_v44  ;;  %v5595_v44 = vld [vmem:[%s9541_s14 + $0x68] sm:$0xf]  ;;  %v6343_v58 = vld [vmem:[%s9541_s14 + $0x74] sm:$0xf0] }
 0x5df   : > { %v7920_v24 = vadd.f32 %v3536_v3, %v3448_v55  ;;  %3278 = vmatmul.bf16.gmra.mxu0 %v7917_v46  ;;  %v7944_v3 = vor.u32 %v6343_v58, %v5595_v44 }
 0x5e4   : > { %v3449_v5 = vpop.f32.mrf.mxu2  ;;  %v3538_v31 = vpop.f32.mrf.mxu3 }
 0x5e5   : > { %v3450_v25 = vadd.f32 %v3449_v5, %v7624_v18  ;;  %v6341_v5 = vld [vmem:[%s9541_s14 + $0x6c] sm:$0xf] }
 0x5e7   : > { %v7932_v6 = vadd.f32 %v3538_v31, %v3450_v25  ;;  %6003 = vmatmul.msk.bf16.gmra.mxu1 %vm888_vm1, %v7929_v30 }
 0x5e9   : > { %3491 = vmatmul.bf16.gmra.mxu2 %v7627_v63  ;;  %3580 = vmatmul.bf16.gmra.mxu3 %v7629_v42  ;;  %v5597_v63 = vld [vmem:[%s9541_s14 + $0x78] sm:$0xf0] }
 0x5ea   : > { %v7956_v31 = vor.u32 %v6341_v5, %v5597_v63 }
 0x5ec   : > { %v3452_v18 = vpop.f32.mrf.mxu2  ;;  %v3541_v55 = vpop.f32.mrf.mxu3 }
 0x5ed   : > { %v3453_v27 = vadd.f32 %v3452_v18, %v7635_v62  ;;  %v5611_v62 = vld [vmem:[%s9541_s14 + $0x88] sm:$0xf]  ;;  %v6347_v18 = vld [vmem:[%s9541_s14 + $0x94] sm:$0xf0] }
 0x5ef   : > { %v7947_v10 = vadd.f32 %v3541_v55, %v3453_v27  ;;  %3283 = vmatmul.bf16.gmra.mxu0 %v7944_v3  ;;  %v7971_v55 = vor.u32 %v6347_v18, %v5611_v62 }
 0x5f1   : > { %9742 = vst [vmem:[#allocation22_spill] sm:$0xff] %v7947_v10 }
 0x5f4   : > { %v3454_v42 = vpop.f32.mrf.mxu2  ;;  %v3543_v25 = vpop.f32.mrf.mxu3 }
 0x5f5   : > { %v3455_v44 = vadd.f32 %v3454_v42, %v7565_v22  ;;  %v6345_v42 = vld [vmem:[%s9541_s14 + $0x8c] sm:$0xf] }
 0x5f7   : > { %v7959_v58 = vadd.f32 %v3543_v25, %v3455_v44  ;;  %6004 = vmatmul.msk.bf16.gmra.mxu1 %vm888_vm1, %v7956_v31 }
 0x5f9   : > { %9743 = vst [vmem:[#allocation23_spill] sm:$0xff] %v7959_v58  ;;  %3496 = vmatmul.bf16.gmra.mxu2 %v7655_v38  ;;  %3585 = vmatmul.bf16.gmra.mxu3 %v7657_v19  ;;  %v5613_v38 = vld [vmem:[%s9541_s14 + $0x98] sm:$0xf0] }
 0x5fa   : > { %v7983_v25 = vor.u32 %v6345_v42, %v5613_v38 }
 0x5fc   : > { %v3457_v22 = vpop.f32.mrf.mxu2  ;;  %v3546_v27 = vpop.f32.mrf.mxu3 }
 0x5fd   : > { %v3458_v5 = vadd.f32 %v3457_v22, %v7551_v14  ;;  %v5627_v14 = vld [vmem:[%s9541_s14 + $0xa8] sm:$0xf]  ;;  %v6351_v22 = vld [vmem:[%s9541_s14 + $0xb4] sm:$0xf0] }
 0x5ff   : > { %v7974_v63 = vadd.f32 %v3546_v27, %v3458_v5  ;;  %3288 = vmatmul.bf16.gmra.mxu0 %v7971_v55  ;;  %v7998_v27 = vor.u32 %v6351_v22, %v5627_v14 }
 0x601   : > { %9744 = vst [vmem:[#allocation13_spill] sm:$0xff] %v7974_v63 }
 0x604   : > { %v3459_v19 = vpop.f32.mrf.mxu2  ;;  %v3548_v44 = vpop.f32.mrf.mxu3 }
 0x605   : > { %v3460_v62 = vadd.f32 %v3459_v19, %v7610_v7  ;;  %v6349_v19 = vld [vmem:[%s9541_s14 + $0xac] sm:$0xf] }
 0x607   : > { %v7986_v18 = vadd.f32 %v3548_v44, %v3460_v62  ;;  %6005 = vmatmul.msk.bf16.gmra.mxu1 %vm888_vm1, %v7983_v25 }
 0x609   : > { %9745 = vst [vmem:[#allocation26_spill] sm:$0xff] %v7986_v18  ;;  %3501 = vmatmul.bf16.gmra.mxu2 %v7681_v52  ;;  %3590 = vmatmul.bf16.gmra.mxu3 %v7683_v29  ;;  %v5629_v52 = vld [vmem:[%s9541_s14 + $0xb8] sm:$0xf0] }
 0x60a   : > { %v8010_v44 = vor.u32 %v6349_v19, %v5629_v52 }
 0x60c   : > { %v3462_v7 = vpop.f32.mrf.mxu2  ;;  %v3551_v5 = vpop.f32.mrf.mxu3 }
 0x60d   : > { %v3463_v42 = vadd.f32 %v3462_v7, %v7509_v54  ;;  %v5643_v54 = vld [vmem:[%s9541_s14 + $0xc8] sm:$0xf]  ;;  %v6355_v7 = vld [vmem:[%s9541_s14 + $0xd4] sm:$0xf0] }
 0x60f   : > { %v8001_v38 = vadd.f32 %v3551_v5, %v3463_v42  ;;  %3293 = vmatmul.bf16.gmra.mxu0 %v7998_v27  ;;  %v8025_v5 = vor.u32 %v6355_v7, %v5643_v54  ;;  %v6359_v54 = vld [vmem:[%s9541_s14 + $0xf4] sm:$0xf0] }
 0x611   : > { %9746 = vst [vmem:[#allocation27_spill] sm:$0xff] %v8001_v38 }
 0x614   : > { %v3464_v29 = vpop.f32.mrf.mxu2  ;;  %v3553_v62 = vpop.f32.mrf.mxu3 }
 0x615   : > { %v3465_v14 = vadd.f32 %v3464_v29, %v7533_v41  ;;  %v6353_v29 = vld [vmem:[%s9541_s14 + $0xcc] sm:$0xf] }
 0x617   : > { %v8013_v22 = vadd.f32 %v3553_v62, %v3465_v14  ;;  %6006 = vmatmul.msk.bf16.gmra.mxu1 %vm888_vm1, %v8010_v44 }
 0x619   : > { %9747 = vst [vmem:[#allocation49_spill] sm:$0xff] %v8013_v22  ;;  %3506 = vmatmul.bf16.gmra.mxu2 %v7707_v56  ;;  %3595 = vmatmul.bf16.gmra.mxu3 %v7709_v20  ;;  %v5645_v56 = vld [vmem:[%s9541_s14 + $0xd8] sm:$0xf0] }
 0x61a   : > { %v8037_v62 = vor.u32 %v6353_v29, %v5645_v56  ;;  %v6357_v56 = vld [vmem:[%s9541_s14 + $0xec] sm:$0xf] }
 0x61c   : > { %v3467_v41 = vpop.f32.mrf.mxu2  ;;  %v3556_v42 = vpop.f32.mrf.mxu3 }
 0x61d   : > { %v3468_v19 = vadd.f32 %v3467_v41, %v7549_v0  ;;  %v5659_v0 = vld [vmem:[%s9541_s14 + $0xe8] sm:$0xf] }
 0x61e   : > { %v8053_v7 = vor.u32 %v6359_v54, %v5659_v0  ;;  %v6363_v54 = vld [vmem:[%s9541_s14 + $0x114] sm:$0xf0] }
 0x61f   : > { %v8028_v52 = vadd.f32 %v3556_v42, %v3468_v19  ;;  %3298 = vmatmul.bf16.gmra.mxu0 %v8025_v5 }
 0x621   : > { %9748 = vst [vmem:[#allocation50_spill] sm:$0xff] %v8028_v52  ;;  %v6361_v52 = vld [vmem:[%s9541_s14 + $0x10c] sm:$0xf] }
 0x624   : > { %v8039_v20 = vpop.f32.mrf.mxu2  ;;  %v8041_v14 = vpop.f32.mrf.mxu3 }
 0x625   : > { %9749 = vst [vmem:[#allocation51_spill] sm:$0xff] %v8039_v20 }
 0x626   : > { %9750 = vst [vmem:[#allocation52_spill] sm:$0xff] %v8041_v14  ;;  %v9757_v14 = vld [vmem:[#allocation14_spill] sm:$0xff] }
 0x627   : > { %6007 = vmatmul.msk.bf16.gmra.mxu1 %vm888_vm1, %v8037_v62 }
 0x629   : > { %3511 = vmatmul.bf16.gmra.mxu2 %v7735_v59  ;;  %3600 = vmatmul.bf16.gmra.mxu3 %v7737_v57  ;;  %v5661_v59 = vld [vmem:[%s9541_s14 + $0xf8] sm:$0xf0] }
 0x62a   : > { %v8065_v34 = vor.u32 %v6357_v56, %v5661_v59 }
 0x62c   : > { %v3472_v41 = vpop.f32.mrf.mxu2  ;;  %v3561_v42 = vpop.f32.mrf.mxu3 }
 0x62d   : > { %v3473_v19 = vadd.f32 %v3472_v41, %v7459_v53  ;;  %v5675_v53 = vld [vmem:[%s9541_s14 + $0x108] sm:$0xf]  ;;  %v9754_v41 = vld [vmem:[#allocation39_spill] sm:$0xff] }
 0x62f   : > { %v8056_v29 = vadd.f32 %v3561_v42, %v3473_v19  ;;  %3303 = vmatmul.bf16.gmra.mxu0 %v8053_v7  ;;  %v9755_v42 = vld [vmem:[#allocation40_spill] sm:$0xff]  ;;  %v8081_v19 = vor.u32 %v6363_v54, %v5675_v53  ;;  %v5677_v53 = vld [vmem:[%s9541_s14 + $0x118] sm:$0xf0] }
 0x630   : > { %v8094_v54 = vor.u32 %v6361_v52, %v5677_v53  ;;  %v6367_v52 = vld [vmem:[%s9541_s14 + $0x134] sm:$0xf0] }
 0x631   : > { %9751 = vst [vmem:[#allocation53_spill] sm:$0xff] %v8056_v29 }
 0x634   : > { %v8067_v57 = vpop.f32.mrf.mxu2  ;;  %v8069_v0 = vpop.f32.mrf.mxu3 }
 0x635   : > { %9752 = vst [vmem:[#allocation54_spill] sm:$0xff] %v8067_v57 }
 0x636   : > { %9753 = vst [vmem:[#allocation55_spill] sm:$0xff] %v8069_v0 }
 0x637   : > { %6008 = vmatmul.msk.bf16.gmra.mxu1 %vm888_vm1, %v8065_v34 }
 0x639   : > { %3516 = vmatmul.bf16.gmra.mxu2 %v9754_v41  ;;  %3605 = vmatmul.bf16.gmra.mxu3 %v9755_v42 }
 0x63c   : > { %v3269_v56 = vpop.f32.mrf.mxu0  ;;  %v3477_v59 = vpop.f32.mrf.mxu2 }
 0x63d   : > { %v3270_v29 = vadd.f32 %v3269_v56, %v9756_v47  ;;  %v3478_v0 = vadd.f32 %v3477_v59, %v9757_v14  ;;  %v3566_v20 = vpop.f32.mrf.mxu3  ;;  %v9759_v47 = vld [vmem:[#allocation29_spill] sm:$0xff] }
 0x63f   : > { %v8085_v57 = vadd.f32 %v3566_v20, %v3478_v0  ;;  %3308 = vmatmul.bf16.gmra.mxu0 %v8081_v19  ;;  %v5691_v0 = vld [vmem:[%s9541_s14 + $0x128] sm:$0xf] }
 0x641   : > { %9758 = vst [vmem:[#allocation39_spill] sm:$0xff] %v8085_v57 }
 0x644   : > { %v3271_v41 = vpop.f32.mrf.mxu0  ;;  %v3358_v42 = vpop.f32.mrf.mxu1 }
 0x645   : > { %v3272_v56 = vadd.f32 %v3271_v41, %v9759_v47  ;;  %v3359_v14 = vadd.f32 %v3358_v42, %v3270_v29  ;;  %v8097_v59 = vpop.f32.mrf.mxu2  ;;  %v8099_v20 = vpop.f32.mrf.mxu3  ;;  %v8111_v29 = vor.u32 %v6367_v52, %v5691_v0  ;;  %v9763_v42 = vld [vmem:[#allocation30_spill] sm:$0xff] }
 0x646   : > { %9760 = vst [vmem:[#allocation40_spill] sm:$0xff] %v8097_v59 }
 0x647   : > { %9761 = vst [vmem:[#allocation28_spill] sm:$0xff] %v8099_v20  ;;  %6009 = vmatmul.msk.bf16.gmra.mxu1 %vm888_vm1, %v8094_v54  ;;  %v3794_v38 = vmax.f32 %v3359_v14, 0.0  ;;  %v9766_v14 = vld [vmem:[#allocation31_spill] sm:$0xff] }
 0x648   : > { %9762 = vst [vmem:[#allocation14_spill] sm:$0xff] %v8111_v29 }
 0x649   : > { %3521 = vmatmul.bf16.gmra.mxu2 %v7787_v35  ;;  %3610 = vmatmul.bf16.gmra.mxu3 %v7789_v21  ;;  %v6365_v35 = vld [vmem:[%s9541_s14 + $0x12c] sm:$0xf]  ;;  %v5693_v21 = vld [vmem:[%s9541_s14 + $0x138] sm:$0xf0] }
 0x64c   : > { %v3274_v53 = vpop.f32.mrf.mxu0  ;;  %v3360_v41 = vpop.f32.mrf.mxu1 }
 0x64d   : > { %v3275_v47 = vadd.f32 %v3274_v53, %v9763_v42  ;;  %v3361_v57 = vadd.f32 %v3360_v41, %v3272_v56  ;;  %v3482_v20 = vpop.f32.mrf.mxu2  ;;  %v3571_v59 = vpop.f32.mrf.mxu3  ;;  %v8126_v56 = vor.u32 %v6365_v35, %v5693_v21 }
 0x64e   : > { %v3483_v22 = vadd.f32 %v3482_v20, %v7457_v50 }
 0x64f   : > { %v3796_v18 = vmax.f32 %v3361_v57, 0.0  ;;  %3313 = vmatmul.bf16.gmra.mxu0 %v8111_v29  ;;  %9765 = vst [vmem:[#allocation30_spill] sm:$0xff] %v8126_v56 }
 0x650   : > { %v8116_v63 = vadd.f32 %v3571_v59, %v3483_v22  ;;  %v5707_v59 = vld [vmem:[%s9541_s14 + $0x148] sm:$0xf] }
 0x651   : > { %v8124_v0 = vpack.c.bf16 %v3796_v18, %v3794_v38  ;;  %v6371_v18 = vld [vmem:[%s9541_s14 + $0x154] sm:$0xf0] }
 0x652   : > { %9764 = vst [vmem:[#allocation29_spill] sm:$0xff] %v8116_v63  ;;  %v8141_v38 = vor.u32 %v6371_v18, %v5707_v59  ;;  %v6369_v59 = vld [vmem:[%s9541_s14 + $0x14c] sm:$0xf]  ;;  %v5709_v18 = vld [vmem:[%s9541_s14 + $0x158] sm:$0xf0] }
 0x654   : > { %v3276_v52 = vpop.f32.mrf.mxu0  ;;  %v3363_v50 = vpop.f32.mrf.mxu1  ;;  %9769 = vst [vmem:[#allocation57_spill] sm:$0xff] %v8141_v38 }
 0x655   : > { %v3277_v57 = vadd.f32 %v3276_v52, %v9766_v14  ;;  %v3364_v20 = vadd.f32 %v3363_v50, %v3275_v47  ;;  %v8129_v53 = vpop.f32.mrf.mxu2  ;;  %v8131_v22 = vpop.f32.mrf.mxu3  ;;  %v9770_v47 = vld [vmem:[#allocation32_spill] sm:$0xff] }
 0x656   : > { %9767 = vst [vmem:[#allocation31_spill] sm:$0xff] %v8129_v53 }
 0x657   : > { %9768 = vst [vmem:[#allocation56_spill] sm:$0xff] %v8131_v22  ;;  %6010 = vmatmul.msk.bf16.gmra.mxu1 %vm888_vm1, %v8126_v56  ;;  %v3798_v63 = vmax.f32 %v3364_v20, 0.0  ;;  %v9773_v20 = vld [vmem:[#allocation33_spill] sm:$0xff] }
 0x658   : > { %v6381_v56 = vld [vmem:[%s9541_s14 + $0x1ac] sm:$0xf] }
 0x65c   : > { %v3279_v41 = vpop.f32.mrf.mxu0  ;;  %v3365_v42 = vpop.f32.mrf.mxu1 }
 0x65d   : > { %v3280_v35 = vadd.f32 %v3279_v41, %v9770_v47  ;;  %v3366_v21 = vadd.f32 %v3365_v42, %v3277_v57  ;;  %v3487_v52 = vpop.f32.mrf.mxu2  ;;  %v3576_v50 = vpop.f32.mrf.mxu3  ;;  %v8156_v57 = vor.u32 %v6369_v59, %v5709_v18 }
 0x65e   : > { %v3488_v14 = vadd.f32 %v3487_v52, %v7805_v15 }
 0x65f   : > { %v3800_v22 = vmax.f32 %v3366_v21, 0.0  ;;  %3318 = vmatmul.bf16.gmra.mxu0 %v8141_v38  ;;  %9772 = vst [vmem:[#allocation58_spill] sm:$0xff] %v8156_v57 }
 0x660   : > { %v8146_v53 = vadd.f32 %v3576_v50, %v3488_v14  ;;  %v5723_v14 = vld [vmem:[%s9541_s14 + $0x168] sm:$0xf] }
 0x661   : > { %v8154_v41 = vpack.c.bf16 %v3800_v22, %v3798_v63  ;;  %v6375_v63 = vld [vmem:[%s9541_s14 + $0x174] sm:$0xf0] }
 0x662   : > { %9771 = vst [vmem:[#allocation32_spill] sm:$0xff] %v8146_v53  ;;  %v8171_v22 = vor.u32 %v6375_v63, %v5723_v14  ;;  %v6373_v14 = vld [vmem:[%s9541_s14 + $0x16c] sm:$0xf]  ;;  %v5725_v63 = vld [vmem:[%s9541_s14 + $0x178] sm:$0xf0] }
 0x664   : > { %v3281_v42 = vpop.f32.mrf.mxu0  ;;  %v3368_v15 = vpop.f32.mrf.mxu1  ;;  %9776 = vst [vmem:[#allocation60_spill] sm:$0xff] %v8171_v22 }
 0x665   : > { %v3282_v47 = vadd.f32 %v3281_v42, %v9773_v20  ;;  %v3369_v21 = vadd.f32 %v3368_v15, %v3280_v35  ;;  %v8159_v52 = vpop.f32.mrf.mxu2  ;;  %v8161_v50 = vpop.f32.mrf.mxu3  ;;  %v9777_v35 = vld [vmem:[#allocation34_spill] sm:$0xff] }
 0x666   : > { %9774 = vst [vmem:[#allocation33_spill] sm:$0xff] %v8159_v52 }
 0x667   : > { %9775 = vst [vmem:[#allocation59_spill] sm:$0xff] %v8161_v50  ;;  %6011 = vmatmul.msk.bf16.gmra.mxu1 %vm888_vm1, %v8156_v57  ;;  %v3802_v53 = vmax.f32 %v3369_v21, 0.0  ;;  %v9780_v21 = vld [vmem:[#allocation35_spill] sm:$0xff] }
 0x66c   : > { %v3284_v59 = vpop.f32.mrf.mxu0  ;;  %v3370_v18 = vpop.f32.mrf.mxu1 }
 0x66d   : > { %v3285_v42 = vadd.f32 %v3284_v59, %v9777_v35  ;;  %v3371_v15 = vadd.f32 %v3370_v18, %v3282_v47  ;;  %v3492_v20 = vpop.f32.mrf.mxu2  ;;  %v3581_v50 = vpop.f32.mrf.mxu3  ;;  %v8186_v47 = vor.u32 %v6373_v14, %v5725_v63 }
 0x66e   : > { %v3493_v52 = vadd.f32 %v3492_v20, %v7585_v40 }
 0x66f   : > { %v3804_v57 = vmax.f32 %v3371_v15, 0.0  ;;  %3323 = vmatmul.bf16.gmra.mxu0 %v8171_v22  ;;  %9779 = vst [vmem:[#allocation61_spill] sm:$0xff] %v8186_v47 }
 0x670   : > { %v8176_v38 = vadd.f32 %v3581_v50, %v3493_v52  ;;  %v5739_v50 = vld [vmem:[%s9541_s14 + $0x188] sm:$0xf] }
 0x671   : > { %v8184_v59 = vpack.c.bf16 %v3804_v57, %v3802_v53  ;;  %v6379_v53 = vld [vmem:[%s9541_s14 + $0x194] sm:$0xf0] }
 0x672   : > { %9778 = vst [vmem:[#allocation34_spill] sm:$0xff] %v8176_v38  ;;  %v8201_v57 = vor.u32 %v6379_v53, %v5739_v50  ;;  %v6377_v50 = vld [vmem:[%s9541_s14 + $0x18c] sm:$0xf]  ;;  %v5741_v53 = vld [vmem:[%s9541_s14 + $0x198] sm:$0xf0] }
 0x674   : > { %v3286_v18 = vpop.f32.mrf.mxu0  ;;  %v3373_v40 = vpop.f32.mrf.mxu1  ;;  %9783 = vst [vmem:[#allocation63_spill] sm:$0xff] %v8201_v57 }
 0x675   : > { %v3287_v35 = vadd.f32 %v3286_v18, %v9780_v21  ;;  %v3374_v15 = vadd.f32 %v3373_v40, %v3285_v42  ;;  %v8189_v20 = vpop.f32.mrf.mxu2  ;;  %v8191_v52 = vpop.f32.mrf.mxu3  ;;  %v9784_v42 = vld [vmem:[#allocation36_spill] sm:$0xff] }
 0x676   : > { %9781 = vst [vmem:[#allocation35_spill] sm:$0xff] %v8189_v20 }
 0x677   : > { %9782 = vst [vmem:[#allocation62_spill] sm:$0xff] %v8191_v52  ;;  %6012 = vmatmul.msk.bf16.gmra.mxu1 %vm888_vm1, %v8186_v47  ;;  %v3806_v38 = vmax.f32 %v3374_v15, 0.0 }
 0x67c   : > { %v3289_v14 = vpop.f32.mrf.mxu0  ;;  %v3375_v63 = vpop.f32.mrf.mxu1 }
 0x67d   : > { %v3290_v18 = vadd.f32 %v3289_v14, %v9784_v42  ;;  %v3376_v40 = vadd.f32 %v3375_v63, %v3287_v35  ;;  %v3497_v21 = vpop.f32.mrf.mxu2  ;;  %v3586_v52 = vpop.f32.mrf.mxu3  ;;  %v8216_v35 = vor.u32 %v6377_v50, %v5741_v53 }
 0x67e   : > { %v3498_v20 = vadd.f32 %v3497_v21, %v7557_v13 }
 0x67f   : > { %v3808_v47 = vmax.f32 %v3376_v40, 0.0  ;;  %3328 = vmatmul.bf16.gmra.mxu0 %v8201_v57  ;;  %9786 = vst [vmem:[#allocation64_spill] sm:$0xff] %v8216_v35 }
 0x680   : > { %v8206_v22 = vadd.f32 %v3586_v52, %v3498_v20  ;;  %v5755_v20 = vld [vmem:[%s9541_s14 + $0x1a8] sm:$0xf] }
 0x681   : > { %v8214_v14 = vpack.c.bf16 %v3808_v47, %v3806_v38  ;;  %v6383_v38 = vld [vmem:[%s9541_s14 + $0x1b4] sm:$0xf0]  ;;  %v9789_v47 = vld [vmem:[#allocation37_spill] sm:$0xff] }
 0x682   : > { %9785 = vst [vmem:[#allocation36_spill] sm:$0xff] %v8206_v22  ;;  %v8231_v21 = vor.u32 %v6383_v38, %v5755_v20 }
 0x684   : > { %v3291_v63 = vpop.f32.mrf.mxu0  ;;  %v3378_v13 = vpop.f32.mrf.mxu1  ;;  %9790 = vst [vmem:[#allocation37_spill] sm:$0xff] %v8231_v21 }
 0x685   : > { %v3379_v15 = vadd.f32 %v3378_v13, %v3290_v18  ;;  %v8218_v42 = vpop.f32.mrf.mxu2  ;;  %v8220_v40 = vpop.f32.mrf.mxu3  ;;  %v3292_v52 = vadd.f32 %v3291_v63, %v9789_v47  ;;  %v5757_v63 = vld [vmem:[%s9541_s14 + $0x1b8] sm:$0xf0] }
 0x686   : > { %9787 = vst [vmem:[#allocation65_spill] sm:$0xff] %v8218_v42  ;;  %v8245_v38 = vor.u32 %v6381_v56, %v5757_v63 }
 0x687   : > { %9788 = vst [vmem:[#allocation66_spill] sm:$0xff] %v8220_v40  ;;  %6013 = vmatmul.msk.bf16.gmra.mxu1 %vm888_vm1, %v8216_v35  ;;  %v3810_v22 = vmax.f32 %v3379_v15, 0.0 }
 0x688   : > { %9792 = vst [vmem:[#allocation68_spill] sm:$0xff] %v8245_v38 }
 0x68c   : > { %v3294_v18 = vpop.f32.mrf.mxu0  ;;  %v3380_v50 = vpop.f32.mrf.mxu1 }
 0x68d   : > { %v3381_v53 = vadd.f32 %v3380_v50, %v3292_v52  ;;  %v3502_v13 = vpop.f32.mrf.mxu2  ;;  %v3591_v40 = vpop.f32.mrf.mxu3 }
 0x68e   : > { %v3503_v42 = vadd.f32 %v3502_v13, %v7583_v26 }
 0x68f   : > { %v3812_v35 = vmax.f32 %v3381_v53, 0.0  ;;  %3333 = vmatmul.bf16.gmra.mxu0 %v8231_v21 }
 0x690   : > { %v8235_v57 = vadd.f32 %v3591_v40, %v3503_v42  ;;  %v5771_v42 = vld [vmem:[%s9541_s14 + $0x1c8] sm:$0xf] }
 0x691   : > { %v8243_v20 = vpack.c.bf16 %v3812_v35, %v3810_v22  ;;  %v6387_v22 = vld [vmem:[%s9541_s14 + $0x1d4] sm:$0xf0]  ;;  %v9795_v35 = vld [vmem:[#allocation38_spill] sm:$0xff]  ;;  %v9796_v40 = vld [vmem:[#allocation41_spill] sm:$0xff] }
 0x692   : > { %9791 = vst [vmem:[#allocation67_spill] sm:$0xff] %v8235_v57  ;;  %v3295_v56 = vadd.f32 %v3294_v18, %v9795_v35  ;;  %v8261_v13 = vor.u32 %v6387_v22, %v5771_v42  ;;  %v6385_v18 = vld [vmem:[%s9541_s14 + $0x1cc] sm:$0xf] }
 0x694   : > { %v3296_v47 = vpop.f32.mrf.mxu0  ;;  %v3383_v26 = vpop.f32.mrf.mxu1 }
 0x695   : > { %v8247_v15 = vpop.f32.mrf.mxu2  ;;  %v8249_v52 = vpop.f32.mrf.mxu3  ;;  %v3297_v50 = vadd.f32 %v3296_v47, %v9796_v40  ;;  %v3384_v53 = vadd.f32 %v3383_v26, %v3295_v56  ;;  %v5773_v47 = vld [vmem:[%s9541_s14 + $0x1d8] sm:$0xf0] }
 0x696   : > { %9793 = vst [vmem:[#allocation69_spill] sm:$0xff] %v8247_v15 }
 0x697   : > { %9794 = vst [vmem:[#allocation70_spill] sm:$0xff] %v8249_v52  ;;  %6014 = vmatmul.msk.bf16.gmra.mxu1 %vm888_vm1, %v8245_v38  ;;  %v3814_v58 = vmax.f32 %v3384_v53, 0.0 }
 0x69c   : > { %v3299_v63 = vpop.f32.mrf.mxu0  ;;  %v3385_v52 = vpop.f32.mrf.mxu1 }
 0x69d   : > { %v3386_v15 = vadd.f32 %v3385_v52, %v3297_v50  ;;  %v3507_v57 = vpop.f32.mrf.mxu2  ;;  %v3596_v38 = vpop.f32.mrf.mxu3  ;;  %v8273_v52 = vor.u32 %v6385_v18, %v5773_v47 }
 0x69e   : > { %v3508_v21 = vadd.f32 %v3507_v57, %v7495_v17 }
 0x69f   : > { %v3816_v29 = vmax.f32 %v3386_v15, 0.0  ;;  %3338 = vmatmul.bf16.gmra.mxu0 %v8261_v13  ;;  %9798 = vst [vmem:[#allocation41_spill] sm:$0xff] %v8273_v52 }
 0x6a0   : > { %v8265_v10 = vadd.f32 %v3596_v38, %v3508_v21  ;;  %v5787_v21 = vld [vmem:[%s9541_s14 + $0x1e8] sm:$0xf]  ;;  %v6391_v38 = vld [vmem:[%s9541_s14 + $0x1f4] sm:$0xf0] }
 0x6a1   : > { %v3868_v26 = vpack.c.bf16 %v3816_v29, %v3814_v58  ;;  %v9801_v58 = vld [vmem:[#allocation42_spill] sm:$0xff]  ;;  %v8289_v56 = vor.u32 %v6391_v38, %v5787_v21 }
 0x6a2   : > { %9797 = vst [vmem:[#allocation38_spill] sm:$0xff] %v8265_v10  ;;  %v3300_v29 = vadd.f32 %v3299_v63, %v9801_v58  ;;  %v5789_v63 = vld [vmem:[%s9541_s14 + $0x1f8] sm:$0xf0] }
 0x6a3   : > { %9802 = vst [vmem:[#allocation42_spill] sm:$0xff] %v8289_v56 }
 0x6a4   : > { %v3301_v42 = vpop.f32.mrf.mxu0  ;;  %v3388_v22 = vpop.f32.mrf.mxu1 }
 0x6a5   : > { %v8275_v17 = vpop.f32.mrf.mxu2  ;;  %v8277_v57 = vpop.f32.mrf.mxu3  ;;  %v3302_v15 = vadd.f32 %v3301_v42, %v7791_v45  ;;  %v3389_v35 = vadd.f32 %v3388_v22, %v3300_v29  ;;  %v6389_v45 = vld [vmem:[%s9541_s14 + $0x1ec] sm:$0xf] }
 0x6a6   : > { %9799 = vst [vmem:[#allocation71_spill] sm:$0xff] %v8275_v17  ;;  %v8301_v22 = vor.u32 %v6389_v45, %v5789_v63 }
 0x6a7   : > { %9800 = vst [vmem:[#allocation72_spill] sm:$0xff] %v8277_v57  ;;  %6015 = vmatmul.msk.bf16.gmra.mxu1 %vm888_vm1, %v8273_v52  ;;  %v3818_v17 = vmax.f32 %v3389_v35, 0.0 }
 0x6a8   : > { %9804 = vst [vmem:[#allocation74_spill] sm:$0xff] %v8301_v22 }
 0x6ac   : > { %v3304_v40 = vpop.f32.mrf.mxu0  ;;  %v3390_v50 = vpop.f32.mrf.mxu1 }
 0x6ad   : > { %v3391_v53 = vadd.f32 %v3390_v50, %v3302_v15  ;;  %v3512_v18 = vpop.f32.mrf.mxu2  ;;  %v3601_v47 = vpop.f32.mrf.mxu3  ;;  %v9808_v15 = vld [vmem:[#allocation45_spill] sm:$0xff] }
 0x6ae   : > { %v3513_v57 = vadd.f32 %v3512_v18, %v7463_v61 }
 0x6af   : > { %v3820_v10 = vmax.f32 %v3391_v53, 0.0  ;;  %3343 = vmatmul.bf16.gmra.mxu0 %v8289_v56 }
 0x6b0   : > { %v8293_v52 = vadd.f32 %v3601_v47, %v3513_v57  ;;  %v9807_v57 = vld [vmem:[#allocation43_spill] sm:$0xff]  ;;  %v9809_v47 = vld [vmem:[#allocation46_spill] sm:$0xff] }
 0x6b1   : > { %v3870_v42 = vpack.c.bf16 %v3820_v10, %v3818_v17  ;;  %v3305_v29 = vadd.f32 %v3304_v40, %v9807_v57 }
 0x6b2   : > { %9803 = vst [vmem:[#allocation73_spill] sm:$0xff] %v8293_v52 }
 0x6b4   : > { %v3306_v21 = vpop.f32.mrf.mxu0  ;;  %v3393_v38 = vpop.f32.mrf.mxu1 }
 0x6b5   : > { %v8303_v61 = vpop.f32.mrf.mxu2  ;;  %v8305_v58 = vpop.f32.mrf.mxu3  ;;  %v3307_v35 = vadd.f32 %v3306_v21, %v9808_v15  ;;  %v3394_v50 = vadd.f32 %v3393_v38, %v3305_v29 }
 0x6b6   : > { %9805 = vst [vmem:[#allocation75_spill] sm:$0xff] %v8303_v61 }
 0x6b7   : > { %9806 = vst [vmem:[#allocation76_spill] sm:$0xff] %v8305_v58  ;;  %6016 = vmatmul.msk.bf16.gmra.mxu1 %vm888_vm1, %v8301_v22  ;;  %v3822_v61 = vmax.f32 %v3394_v50, 0.0 }
 0x6bc   : > { %v3309_v53 = vpop.f32.mrf.mxu0  ;;  %v3395_v18 = vpop.f32.mrf.mxu1 }
 0x6bd   : > { %v3310_v10 = vadd.f32 %v3309_v53, %v9809_v47  ;;  %v3396_v17 = vadd.f32 %v3395_v18, %v3307_v35  ;;  %v3517_v45 = vpop.f32.mrf.mxu2  ;;  %v3606_v63 = vpop.f32.mrf.mxu3 }
 0x6be   : > { %v3518_v52 = vadd.f32 %v3517_v45, %v7493_v16 }
 0x6bf   : > { %v3824_v56 = vmax.f32 %v3396_v17, 0.0  ;;  %3624 = vmatmul.bf16.vlgmr.msra.gmra.mxu0 %v7863_v37 }
 0x6c0   : > { %v8314_v58 = vadd.f32 %v3606_v63, %v3518_v52 }
 0x6c1   : > { %v3872_v22 = vpack.c.bf16 %v3824_v56, %v3822_v61 }
 0x6c3   : > { %4274 = vmatpush.bf16.msra.mxu2 %v3872_v22 }
 0x6c4   : > { %v3311_v40 = vpop.f32.mrf.mxu0  ;;  %v3398_v21 = vpop.f32.mrf.mxu1 }
 0x6c5   : > { %v3312_v38 = vadd.f32 %v3311_v40, %v7813_v48  ;;  %v3399_v57 = vadd.f32 %v3398_v21, %v3310_v10  ;;  %v8317_v29 = vpop.f32.mrf.mxu2  ;;  %v8319_v15 = vpop.f32.mrf.mxu3 }
 0x6c7   : > { %6017 = vmatmul.msk.bf16.vlgmr.msra.gmra.mxu1 %vm888_vm1, %v7875_v9  ;;  %4275 = vmatpush.bf16.msra.mxu2 %v3870_v42  ;;  %v3826_v48 = vmax.f32 %v3399_v57, 0.0 }
 0x6cb   : > { %4276 = vmatpush.bf16.msra.mxu2 %v3868_v26 }
 0x6cc   : > { %v3314_v16 = vpop.f32.mrf.mxu0  ;;  %v3400_v37 = vpop.f32.mrf.mxu1 }
 0x6cd   : > { %v3315_v52 = vadd.f32 %v3314_v16, %v7818_v2  ;;  %v3401_v56 = vadd.f32 %v3400_v37, %v3312_v38  ;;  %v3522_v22 = vpop.f32.mrf.mxu2  ;;  %v3611_v61 = vpop.f32.mrf.mxu3 }
 0x6ce   : > { %v3523_v35 = vadd.f32 %v3522_v22, %v9738_v4  ;;  %v6393_v4 = vld [vmem:[%s9543_s16 + $0x4] sm:$0xf0] }
 0x6cf   : > { %v3828_v50 = vmax.f32 %v3401_v56, 0.0  ;;  %3629 = vmatmul.bf16.gmra.mxu0 %v7890_v8  ;;  %4277 = vmatpush.bf16.msra.mxu2 %v8243_v20  ;;  %v6035_v8 = vld [vmem:[%s9543_s16] sm:$0xf] }
 0x6d0   : > { %v8327_v53 = vadd.f32 %v3611_v61, %v3523_v35  ;;  %v8344_v10 = vor.u32 %v6393_v4, %v6035_v8 }
 0x6d1   : > { %v8329_v9 = vpack.c.bf16 %v3828_v50, %v3826_v48 }
 0x6d3   : > { %4278 = vmatpush.bf16.msra.mxu2 %v8214_v14 }
 0x6d4   : > { %v3316_v26 = vpop.f32.mrf.mxu0  ;;  %v3403_v42 = vpop.f32.mrf.mxu1 }
 0x6d5   : > { %v3317_v2 = vadd.f32 %v3316_v26, %v7821_v11  ;;  %v3404_v18 = vadd.f32 %v3403_v42, %v3315_v52 }
 0x6d7   : > { %6018 = vmatmul.msk.bf16.gmra.mxu1 %vm888_vm1, %v7902_v51  ;;  %4279 = vmatpush.bf16.msra.mxu2 %v8184_v59  ;;  %v3830_v51 = vmax.f32 %v3404_v18, 0.0 }
 0x6db   : > { %4280 = vmatpush.bf16.msra.mxu2 %v8154_v41 }
 0x6dc   : > { %v3319_v14 = vpop.f32.mrf.mxu0  ;;  %v3405_v20 = vpop.f32.mrf.mxu1 }
 0x6dd   : > { %v3320_v11 = vadd.f32 %v3319_v14, %v7826_v43  ;;  %v3406_v47 = vadd.f32 %v3405_v20, %v3317_v2  ;;  %v6043_v43 = vld [vmem:[%s9543_s16 + $0x10] sm:$0xf] }
 0x6df   : > { %v3832_v17 = vmax.f32 %v3406_v47, 0.0  ;;  %3634 = vmatmul.bf16.gmra.mxu0 %v7917_v46  ;;  %4281 = vmatpush.bf16.msra.mxu2 %v8124_v0  ;;  %v6395_v46 = vld [vmem:[%s9543_s16 + $0x14] sm:$0xf0] }
 0x6e0   : > { %v8361_v16 = vor.u32 %v6395_v46, %v6043_v43  ;;  %v6067_v46 = vld [vmem:[%s9543_s16 + $0x40] sm:$0xf] }
 0x6e1   : > { %v8348_v41 = vpack.c.bf16 %v3832_v17, %v3830_v51 }
 0x6e2   : > { %4282 = vmatmul.bf16.vlgmr.msra.gmra.mxu2 %v8344_v10 }
 0x6e4   : > { %v3321_v59 = vpop.f32.mrf.mxu0  ;;  %v3408_v45 = vpop.f32.mrf.mxu1 }
 0x6e5   : > { %v3322_v63 = vadd.f32 %v3321_v59, %v7829_v23  ;;  %v3409_v40 = vadd.f32 %v3408_v45, %v3320_v11 }
 0x6e7   : > { %6019 = vmatmul.msk.bf16.gmra.mxu1 %vm888_vm1, %v7929_v30  ;;  %v3834_v23 = vmax.f32 %v3409_v40, 0.0 }
 0x6ec   : > { %v3324_v0 = vpop.f32.mrf.mxu0  ;;  %v3410_v21 = vpop.f32.mrf.mxu1 }
 0x6ed   : > { %v3325_v38 = vadd.f32 %v3324_v0, %v7834_v60  ;;  %v3411_v57 = vadd.f32 %v3410_v21, %v3322_v63  ;;  %v6051_v60 = vld [vmem:[%s9543_s16 + $0x20] sm:$0xf] }
 0x6ef   : > { %v3836_v37 = vmax.f32 %v3411_v57, 0.0  ;;  %3639 = vmatmul.bf16.gmra.mxu0 %v7944_v3  ;;  %v6397_v3 = vld [vmem:[%s9543_s16 + $0x24] sm:$0xf0] }
 0x6f0   : > { %v8377_v42 = vor.u32 %v6397_v3, %v6051_v60  ;;  %v6075_v60 = vld [vmem:[%s9543_s16 + $0x50] sm:$0xf] }
 0x6f1   : > { %v8364_v30 = vpack.c.bf16 %v3836_v37, %v3834_v23 }
 0x6f2   : > { %4287 = vmatmul.bf16.gmra.mxu2 %v8361_v16 }
 0x6f4   : > { %v3326_v52 = vpop.f32.mrf.mxu0  ;;  %v3413_v56 = vpop.f32.mrf.mxu1 }
 0x6f5   : > { %v3327_v22 = vadd.f32 %v3326_v52, %v7837_v36  ;;  %v3414_v61 = vadd.f32 %v3413_v56, %v3325_v38  ;;  %v9810_v52 = vld [vmem:[#allocation48_spill] sm:$0xff] }
 0x6f7   : > { %6020 = vmatmul.msk.bf16.gmra.mxu1 %vm888_vm1, %v7956_v31  ;;  %v3838_v36 = vmax.f32 %v3414_v61, 0.0 }
 0x6fc   : > { %v3329_v35 = vpop.f32.mrf.mxu0  ;;  %v3415_v48 = vpop.f32.mrf.mxu1 }
 0x6fd   : > { %v3330_v50 = vadd.f32 %v3329_v35, %v7842_v39  ;;  %v3416_v26 = vadd.f32 %v3415_v48, %v3327_v22  ;;  %v6059_v39 = vld [vmem:[%s9543_s16 + $0x30] sm:$0xf] }
 0x6ff   : > { %v3840_v2 = vmax.f32 %v3416_v26, 0.0  ;;  %3644 = vmatmul.bf16.gmra.mxu0 %v7971_v55  ;;  %v6399_v55 = vld [vmem:[%s9543_s16 + $0x34] sm:$0xf0] }
 0x700   : > { %v8392_v51 = vor.u32 %v6399_v55, %v6059_v39 }
 0x701   : > { %v8380_v31 = vpack.c.bf16 %v3840_v2, %v3838_v36 }
 0x702   : > { %4292 = vmatmul.bf16.gmra.mxu2 %v8377_v42 }
 0x704   : > { %v3331_v18 = vpop.f32.mrf.mxu0  ;;  %v3418_v8 = vpop.f32.mrf.mxu1 }
 0x705   : > { %v3419_v4 = vadd.f32 %v3418_v8, %v3330_v50  ;;  %v3332_v14 = vadd.f32 %v3331_v18, %v7845_v12 }
 0x707   : > { %6021 = vmatmul.msk.bf16.gmra.mxu1 %vm888_vm1, %v7983_v25  ;;  %v3842_v17 = vmax.f32 %v3419_v4, 0.0 }
 0x70c   : > { %v3334_v20 = vpop.f32.mrf.mxu0  ;;  %v3420_v11 = vpop.f32.mrf.mxu1 }
 0x70d   : > { %v3421_v47 = vadd.f32 %v3420_v11, %v3332_v14  ;;  %v3335_v63 = vadd.f32 %v3334_v20, %v7850_v49  ;;  %v6083_v14 = vld [vmem:[%s9543_s16 + $0x60] sm:$0xf] }
 0x70f   : > { %v3844_v59 = vmax.f32 %v3421_v47, 0.0  ;;  %3649 = vmatmul.bf16.gmra.mxu0 %v7998_v27  ;;  %v6401_v27 = vld [vmem:[%s9543_s16 + $0x44] sm:$0xf0] }
 0x710   : > { %v8408_v57 = vor.u32 %v6401_v27, %v6067_v46 }
 0x711   : > { %v8395_v25 = vpack.c.bf16 %v3844_v59, %v3842_v17 }
 0x712   : > { %4297 = vmatmul.bf16.gmra.mxu2 %v8392_v51 }
 0x714   : > { %v3336_v12 = vpop.f32.mrf.mxu0  ;;  %v3423_v45 = vpop.f32.mrf.mxu1 }
 0x715   : > { %v3337_v40 = vadd.f32 %v3336_v12, %v7853_v33  ;;  %v3424_v43 = vadd.f32 %v3423_v45, %v3335_v63 }
 0x717   : > { %6022 = vmatmul.msk.bf16.gmra.mxu1 %vm888_vm1, %v8010_v44  ;;  %v3846_v23 = vmax.f32 %v3424_v43, 0.0  ;;  %v9811_v43 = vld [vmem:[#allocation22_spill] sm:$0xff] }
 0x71c   : > { %v3339_v0 = vpop.f32.mrf.mxu0  ;;  %v3425_v21 = vpop.f32.mrf.mxu1 }
 0x71d   : > { %v3426_v38 = vadd.f32 %v3425_v21, %v3337_v40  ;;  %v3340_v56 = vadd.f32 %v3339_v0, %v9810_v52  ;;  %v9814_v52 = vld [vmem:[#allocation30_spill] sm:$0xff] }
 0x71f   : > { %v3848_v44 = vmax.f32 %v3426_v38, 0.0  ;;  %3654 = vmatmul.bf16.gmra.mxu0 %v8025_v5  ;;  %v6403_v5 = vld [vmem:[%s9543_s16 + $0x54] sm:$0xf0] }
 0x720   : > { %v8422_v50 = vor.u32 %v6403_v5, %v6075_v60  ;;  %v9815_v60 = vld [vmem:[#allocation13_spill] sm:$0xff] }
 0x721   : > { %v3884_v49 = vpack.c.bf16 %v3848_v44, %v3846_v23 }
 0x722   : > { %4302 = vmatmul.bf16.gmra.mxu2 %v8408_v57 }
 0x724   : > { %v3341_v33 = vpop.f32.mrf.mxu0  ;;  %v3428_v37 = vpop.f32.mrf.mxu1 }
 0x725   : > { %v3342_v22 = vadd.f32 %v3341_v33, %v7878_v1  ;;  %v3429_v61 = vadd.f32 %v3428_v37, %v3340_v56  ;;  %v6392_v56 = vld [vmem:[%s9543_s16 + $0x4] sm:$0xf] }
 0x727   : > { %6023 = vmatmul.msk.bf16.gmra.mxu1 %vm888_vm1, %v8037_v62  ;;  %v3850_v26 = vmax.f32 %v3429_v61, 0.0 }
 0x72c   : > { %v3344_v3 = vpop.f32.mrf.mxu0  ;;  %v3430_v35 = vpop.f32.mrf.mxu1 }
 0x72d   : > { %v3431_v48 = vadd.f32 %v3430_v35, %v3342_v22  ;;  %v3345_v18 = vadd.f32 %v3344_v3, %v7893_v28  ;;  %v6037_v22 = vld [vmem:[%s9543_s16 + $0x8] sm:$0xf0] }
 0x72f   : > { %v3852_v62 = vmax.f32 %v3431_v48, 0.0  ;;  %3659 = vmatmul.bf16.gmra.mxu0 %v8053_v7  ;;  %v6405_v7 = vld [vmem:[%s9543_s16 + $0x64] sm:$0xf0] }
 0x730   : > { %v8437_v47 = vor.u32 %v6405_v7, %v6083_v14  ;;  %v9820_v14 = vld [vmem:[#allocation58_spill] sm:$0xff] }
 0x731   : > { %v3886_v36 = vpack.c.bf16 %v3852_v62, %v3850_v26  ;;  %v9818_v62 = vld [vmem:[#allocation57_spill] sm:$0xff]  ;;  %v6107_v7 = vld [vmem:[%s9543_s16 + $0x90] sm:$0xf] }
 0x732   : > { %4307 = vmatmul.bf16.gmra.mxu2 %v8422_v50 }
 0x734   : > { %v3346_v1 = vpop.f32.mrf.mxu0  ;;  %v3433_v2 = vpop.f32.mrf.mxu1 }
 0x735   : > { %v3347_v8 = vadd.f32 %v3346_v1, %v7905_v32  ;;  %v3434_v4 = vadd.f32 %v3433_v2, %v3345_v18  ;;  %v9819_v18 = vld [vmem:[#allocation26_spill] sm:$0xff] }
 0x737   : > { %6024 = vmatmul.msk.bf16.gmra.mxu1 %vm888_vm1, %v8065_v34  ;;  %v3854_v34 = vmax.f32 %v3434_v4, 0.0 }
 0x73c   : > { %v3435_v39 = vpop.f32.mrf.mxu1  ;;  %v3625_v55 = vpop.f32.mrf.mxu0 }
 0x73d   : > { %v3436_v20 = vadd.f32 %v3435_v39, %v3347_v8  ;;  %v3626_v11 = vadd.f32 %v3625_v55, %v7920_v24  ;;  %v6091_v24 = vld [vmem:[%s9543_s16 + $0x70] sm:$0xf]  ;;  %v6394_v39 = vld [vmem:[%s9543_s16 + $0x14] sm:$0xf]  ;;  %v6045_v55 = vld [vmem:[%s9543_s16 + $0x18] sm:$0xf0] }
 0x73f   : > { %v3856_v28 = vmax.f32 %v3436_v20, 0.0  ;;  %3664 = vmatmul.bf16.gmra.mxu0 %v8081_v19  ;;  %v6407_v19 = vld [vmem:[%s9543_s16 + $0x74] sm:$0xf0] }
 0x741   : > { %v3888_v32 = vpack.c.bf16 %v3856_v28, %v3854_v34  ;;  %v9821_v34 = vld [vmem:[#allocation27_spill] sm:$0xff] }
 0x742   : > { %4312 = vmatmul.bf16.gmra.mxu2 %v8437_v47 }
 0x743   : > { %4363 = vmatpush.bf16.msra.mxu3 %v3888_v32 }
 0x744   : > { %v3627_v17 = vpop.f32.mrf.mxu0  ;;  %v3714_v59 = vpop.f32.mrf.mxu1 }
 0x745   : > { %v3628_v12 = vadd.f32 %v3627_v17, %v7932_v6  ;;  %v3715_v45 = vadd.f32 %v3714_v59, %v3626_v11  ;;  %v8451_v6 = vor.u32 %v6407_v19, %v6091_v24  ;;  %v8505_v59 = vor.u32 %v6394_v39, %v6045_v55  ;;  %v9824_v24 = vld [vmem:[#allocation60_spill] sm:$0xff] }
 0x747   : > { %6025 = vmatmul.msk.bf16.gmra.mxu1 %vm888_vm1, %v8094_v54  ;;  %4364 = vmatpush.bf16.msra.mxu3 %v3886_v36  ;;  %v3795_v0 = vmax.f32 %v3715_v45, 0.0  ;;  %v9812_v54 = vld [vmem:[#allocation14_spill] sm:$0xff]  ;;  %9823 = vst [vmem:[#allocation48_spill] sm:$0xff] %v8505_v59 }
 0x74b   : > { %4365 = vmatpush.bf16.msra.mxu3 %v3884_v49  ;;  %v9813_v49 = vld [vmem:[#allocation23_spill] sm:$0xff] }
 0x74c   : > { %v3630_v63 = vpop.f32.mrf.mxu0  ;;  %v3716_v40 = vpop.f32.mrf.mxu1 }
 0x74d   : > { %v3631_v46 = vadd.f32 %v3630_v63, %v9811_v43  ;;  %v3717_v27 = vadd.f32 %v3716_v40, %v3628_v12  ;;  %v9825_v43 = vld [vmem:[#allocation49_spill] sm:$0xff] }
 0x74f   : > { %v3797_v21 = vmax.f32 %v3717_v27, 0.0  ;;  %3669 = vmatmul.bf16.gmra.mxu0 %v9812_v54  ;;  %4366 = vmatpush.bf16.msra.mxu3 %v8395_v25  ;;  %v6099_v25 = vld [vmem:[%s9543_s16 + $0x80] sm:$0xf]  ;;  %v6413_v54 = vld [vmem:[%s9543_s16 + $0xa4] sm:$0xf0] }
 0x751   : > { %v8455_v38 = vpack.c.bf16 %v3797_v21, %v3795_v0  ;;  %v9826_v0 = vld [vmem:[#allocation61_spill] sm:$0xff]  ;;  %v6115_v21 = vld [vmem:[%s9543_s16 + $0xa0] sm:$0xf] }
 0x752   : > { %4317 = vmatmul.bf16.gmra.mxu2 %v8451_v6 }
 0x753   : > { %4367 = vmatpush.bf16.msra.mxu3 %v8380_v31  ;;  %v6409_v31 = vld [vmem:[%s9543_s16 + $0x84] sm:$0xf0] }
 0x754   : > { %v3632_v23 = vpop.f32.mrf.mxu0  ;;  %v3719_v44 = vpop.f32.mrf.mxu1  ;;  %v8477_v35 = vor.u32 %v6409_v31, %v6099_v25  ;;  %v8528_v31 = vor.u32 %v6413_v54, %v6115_v21 }
 0x755   : > { %v3633_v33 = vadd.f32 %v3632_v23, %v9813_v49  ;;  %v3720_v37 = vadd.f32 %v3719_v44, %v3631_v46  ;;  %v6396_v23 = vld [vmem:[%s9543_s16 + $0x24] sm:$0xf]  ;;  %v6053_v44 = vld [vmem:[%s9543_s16 + $0x28] sm:$0xf0] }
 0x756   : > { %9816 = vst [vmem:[#allocation43_spill] sm:$0xff] %v8477_v35 }
 0x757   : > { %6026 = vmatmul.msk.bf16.gmra.mxu1 %vm888_vm1, %v9814_v52  ;;  %4368 = vmatpush.bf16.msra.mxu3 %v8364_v30  ;;  %v3799_v48 = vmax.f32 %v3720_v37, 0.0  ;;  %v9827_v37 = vld [vmem:[#allocation50_spill] sm:$0xff]  ;;  %9828 = vst [vmem:[#allocation22_spill] sm:$0xff] %v8528_v31 }
 0x75b   : > { %4369 = vmatpush.bf16.msra.mxu3 %v8348_v41  ;;  %v8479_v41 = vor.u32 %v6392_v56, %v6037_v22  ;;  %v8530_v56 = vor.u32 %v6396_v23, %v6053_v44 }
 0x75c   : > { %v3635_v61 = vpop.f32.mrf.mxu0  ;;  %v3721_v30 = vpop.f32.mrf.mxu1 }
 0x75d   : > { %v3636_v5 = vadd.f32 %v3635_v61, %v9815_v60  ;;  %v3722_v3 = vadd.f32 %v3721_v30, %v3633_v33  ;;  %9817 = vst [vmem:[#allocation45_spill] sm:$0xff] %v8479_v41  ;;  %v9830_v30 = vld [vmem:[#allocation63_spill] sm:$0xff] }
 0x75e   : > { %9829 = vst [vmem:[#allocation14_spill] sm:$0xff] %v8530_v56 }
 0x75f   : > { %v3801_v26 = vmax.f32 %v3722_v3, 0.0  ;;  %3674 = vmatmul.bf16.gmra.mxu0 %v9818_v62  ;;  %4370 = vmatpush.bf16.msra.mxu3 %v8329_v9  ;;  %v6411_v9 = vld [vmem:[%s9543_s16 + $0x94] sm:$0xf0]  ;;  %v9831_v62 = vld [vmem:[#allocation64_spill] sm:$0xff] }
 0x760   : > { %v8503_v17 = vor.u32 %v6411_v9, %v6107_v7 }
 0x761   : > { %v8483_v36 = vpack.c.bf16 %v3801_v26, %v3799_v48 }
 0x762   : > { %4322 = vmatmul.bf16.gmra.mxu2 %v8477_v35  ;;  %4371 = vmatmul.bf16.vlgmr.msra.gmra.mxu3 %v8479_v41  ;;  %9822 = vst [vmem:[#allocation46_spill] sm:$0xff] %v8503_v17 }
 0x764   : > { %v3637_v1 = vpop.f32.mrf.mxu0  ;;  %v3724_v2 = vpop.f32.mrf.mxu1 }
 0x765   : > { %v3638_v8 = vadd.f32 %v3637_v1, %v9819_v18  ;;  %v3725_v4 = vadd.f32 %v3724_v2, %v3636_v5  ;;  %v8537_v5 = vpop.f32.mrf.mxu2  ;;  %v8545_v1 = vpop.permute.xlu2 %4031  ;;  %v6123_v2 = vld [vmem:[%s9543_s16 + $0xb0] sm:$0xf] }
 0x767   : > { %6027 = vmatmul.msk.bf16.gmra.mxu1 %vm888_vm1, %v9820_v14  ;;  %v3803_v12 = vmax.f32 %v3725_v4, 0.0  ;;  %v6398_v4 = vld [vmem:[%s9543_s16 + $0x34] sm:$0xf]  ;;  %v6061_v14 = vld [vmem:[%s9543_s16 + $0x38] sm:$0xf0] }
 0x768   : > { %v8567_v55 = vor.u32 %v6398_v4, %v6061_v14 }
 0x76a   : > { %9833 = vst [vmem:[#allocation30_spill] sm:$0xff] %v8567_v55 }
 0x76c   : > { %v3640_v20 = vpop.f32.mrf.mxu0  ;;  %v3726_v11 = vpop.f32.mrf.mxu1 }
 0x76d   : > { %v3641_v28 = vadd.f32 %v3640_v20, %v9821_v34  ;;  %v3727_v32 = vadd.f32 %v3726_v11, %v3638_v8  ;;  %v8550_v18 = vpop.f32.mrf.mxu2  ;;  %v6415_v8 = vld [vmem:[%s9543_s16 + $0xb4] sm:$0xf0]  ;;  %v9834_v20 = vld [vmem:[#allocation37_spill] sm:$0xff]  ;;  %v8570_v11 = vpop.permute.xlu0 %4106 }
 0x76e   : > { %v8565_v39 = vor.u32 %v6415_v8, %v6123_v2  ;;  %9835 = vst [vmem:[#allocation13_spill] sm:$0xff] %v8570_v11  ;;  %v8574_v34 = vpop.permute.xlu2 %4016  ;;  %v9856_v11 = vld [vmem:[#allocation54_spill] sm:$0xff] }
 0x76f   : > { %v3805_v45 = vmax.f32 %v3727_v32, 0.0  ;;  %3679 = vmatmul.bf16.gmra.mxu0 %v9824_v24  ;;  %v6131_v24 = vld [vmem:[%s9543_s16 + $0xc0] sm:$0xf] }
 0x770   : > { %9832 = vst [vmem:[#allocation23_spill] sm:$0xff] %v8565_v39 }
 0x771   : > { %v8508_v19 = vpack.c.bf16 %v3805_v45, %v3803_v12  ;;  %v9836_v45 = vld [vmem:[#allocation68_spill] sm:$0xff] }
 0x772   : > { %4327 = vmatmul.bf16.gmra.mxu2 %v8503_v17  ;;  %4376 = vmatmul.bf16.gmra.mxu3 %v8505_v59 }
 0x774   : > { %v3642_v63 = vpop.f32.mrf.mxu0  ;;  %v3729_v40 = vpop.f32.mrf.mxu1 }
 0x775   : > { %v3643_v46 = vadd.f32 %v3642_v63, %v9825_v43  ;;  %v3730_v27 = vadd.f32 %v3729_v40, %v3641_v28  ;;  %v8580_v12 = vpop.f32.mrf.mxu2  ;;  %v8587_v63 = vpop.permute.xlu0 %4021  ;;  %v6417_v40 = vld [vmem:[%s9543_s16 + $0xc4] sm:$0xf0]  ;;  %v6400_v43 = vld [vmem:[%s9543_s16 + $0x44] sm:$0xf] }
 0x776   : > { %v8600_v21 = vpop.permute.xlu2 %4101  ;;  %v8602_v54 = vor.u32 %v6417_v40, %v6131_v24  ;;  %v9847_v24 = vld [vmem:[#allocation42_spill] sm:$0xff] }
 0x777   : > { %6028 = vmatmul.msk.bf16.gmra.mxu1 %vm888_vm1, %v9826_v0  ;;  %v3807_v22 = vmax.f32 %v3730_v27, 0.0  ;;  %9837 = vst [vmem:[#allocation57_spill] sm:$0xff] %v8600_v21 }
 0x778   : > { %9838 = vst [vmem:[#allocation26_spill] sm:$0xff] %v8602_v54 }
 0x77c   : > { %v3645_v49 = vpop.f32.mrf.mxu0  ;;  %v3731_v33 = vpop.f32.mrf.mxu1 }
 0x77d   : > { %v3646_v52 = vadd.f32 %v3645_v49, %v9827_v37  ;;  %v3732_v25 = vadd.f32 %v3731_v33, %v3643_v46  ;;  %v6069_v46 = vld [vmem:[%s9543_s16 + $0x48] sm:$0xf0]  ;;  %v8606_v44 = vpop.f32.mrf.mxu2  ;;  %v8611_v49 = vpop.permute.xlu1 %4026 }
 0x77e   : > { %v8604_v23 = vor.u32 %v6400_v43, %v6069_v46 }
 0x77f   : > { %v3809_v61 = vmax.f32 %v3732_v25, 0.0  ;;  %3684 = vmatmul.bf16.gmra.mxu0 %v9830_v30  ;;  %v8615_v25 = vpop.permute.xlu2 %4086  ;;  %v6419_v30 = vld [vmem:[%s9543_s16 + $0xd4] sm:$0xf0] }
 0x780   : > { %9839 = vst [vmem:[#allocation58_spill] sm:$0xff] %v8604_v23 }
 0x781   : > { %v8533_v60 = vpack.c.bf16 %v3809_v61, %v3807_v22  ;;  %9841 = vst [vmem:[#allocation60_spill] sm:$0xff] %v8615_v25  ;;  %v9842_v22 = vld [vmem:[#allocation41_spill] sm:$0xff]  ;;  %v9849_v25 = vld [vmem:[#allocation15_spill] sm:$0xff] }
 0x782   : > { %4332 = vmatmul.bf16.gmra.mxu2 %v8528_v31  ;;  %4381 = vmatmul.bf16.gmra.mxu3 %v8530_v56  ;;  %v9860_v56 = vld [vmem:[#allocation29_spill] sm:$0xff] }
 0x784   : > { %v8539_v3 = vpop.f32.mrf.mxu0  ;;  %v3734_v48 = vpop.f32.mrf.mxu1 }
 0x785   : > { %v8541_v26 = vadd.f32 %v3734_v48, %v3646_v52  ;;  %v8613_v52 = vpop.permute.xlu0 %4006  ;;  %v8619_v61 = vpop.f32.mrf.mxu2  ;;  %v6402_v48 = vld [vmem:[%s9543_s16 + $0x54] sm:$0xf] }
 0x786   : > { %9840 = vst [vmem:[#allocation27_spill] sm:$0xff] %v8613_v52  ;;  %v8633_v4 = vpop.permute.xlu1 %4111 }
 0x787   : > { %6029 = vmatmul.msk.bf16.gmra.mxu1 %vm888_vm1, %v9831_v62  ;;  %v6077_v62 = vld [vmem:[%s9543_s16 + $0x58] sm:$0xf0]  ;;  %9843 = vst [vmem:[#allocation49_spill] sm:$0xff] %v8633_v4  ;;  %v8642_v40 = vpop.permute.xlu2 %4001  ;;  %v9850_v4 = vld [vmem:[#allocation40_spill] sm:$0xff] }
 0x788   : > { %9848 = vst [vmem:[#allocation64_spill] sm:$0xff] %v8642_v40 }
 0x78c   : > { %v8561_v7 = vpop.f32.mrf.mxu0  ;;  %v8563_v9 = vpop.f32.mrf.mxu1 }
 0x78d   : > { %v8646_v43 = vpop.f32.mrf.mxu2 }
 0x78e   : > { %v8652_v21 = vpop.permute.xlu1 %4096 }
 0x78f   : > { %3689 = vmatmul.bf16.gmra.mxu0 %v9834_v20  ;;  %v8637_v20 = vor.u32 %v6402_v48, %v6077_v62  ;;  %v9852_v48 = vld [vmem:[#allocation31_spill] sm:$0xff]  ;;  %9853 = vst [vmem:[#allocation37_spill] sm:$0xff] %v8652_v21 }
 0x791   : > { %9845 = vst [vmem:[#allocation50_spill] sm:$0xff] %v8637_v20 }
 0x792   : > { %4337 = vmatmul.bf16.gmra.mxu2 %v8565_v39  ;;  %4386 = vmatmul.bf16.gmra.mxu3 %v8567_v55  ;;  %v9859_v55 = vld [vmem:[#allocation56_spill] sm:$0xff] }
 0x794   : > { %v8576_v28 = vpop.f32.mrf.mxu0  ;;  %v8578_v32 = vpop.f32.mrf.mxu1 }
 0x795   : > { %v8682_v59 = vpop.f32.mrf.mxu2 }
 0x796   : > { %v8690_v52 = vpop.permute.xlu1 %4011 }
 0x797   : > { %6030 = vmatmul.msk.bf16.gmra.mxu1 %vm888_vm1, %v9836_v45  ;;  %v8639_v45 = vpop.permute.xlu0 %4091 }
 0x798   : > { %9846 = vst [vmem:[#allocation63_spill] sm:$0xff] %v8639_v45  ;;  %v9854_v45 = vld [vmem:[#allocation74_spill] sm:$0xff] }
 0x79c   : > { %v3655_v27 = vpop.f32.mrf.mxu0  ;;  %v8598_v0 = vpop.f32.mrf.mxu1 }
 0x79f   : > { %3694 = vmatmul.bf16.gmra.mxu0 %v8261_v13  ;;  %v6139_v13 = vld [vmem:[%s9543_s16 + $0xd0] sm:$0xf] }
 0x7a0   : > { %v8635_v14 = vor.u32 %v6419_v30, %v6139_v13  ;;  %v3480_v13 = vadd.f32 %v9850_v4, %v9849_v25  ;;  %v9851_v30 = vld [vmem:[#allocation12_spill] sm:$0xff]  ;;  %v8666_v4 = vpop.permute.xlu2 %3986 }
 0x7a1   : > { %v3485_v62 = vadd.f32 %v9852_v48, %v9851_v30  ;;  %v6147_v25 = vld [vmem:[%s9543_s16 + $0xe0] sm:$0xf]  ;;  %9861 = vst [vmem:[#allocation41_spill] sm:$0xff] %v8666_v4 }
 0x7a2   : > { %4342 = vmatmul.bf16.gmra.mxu2 %v8602_v54  ;;  %4391 = vmatmul.bf16.gmra.mxu3 %v8604_v23  ;;  %9844 = vst [vmem:[#allocation61_spill] sm:$0xff] %v8635_v14  ;;  %v8658_v23 = vpop.permute.xlu0 %4076 }
 0x7a3   : > { %9857 = vst [vmem:[#allocation68_spill] sm:$0xff] %v8658_v23  ;;  %v3574_v39 = vadd.f32 %v9859_v55, %v3485_v62  ;;  %v9862_v55 = vld [vmem:[#allocation19_spill] sm:$0xff] }
 0x7a4   : > { %v3657_v33 = vpop.f32.mrf.mxu0  ;;  %v3744_v37 = vpop.f32.mrf.mxu1  ;;  %v9864_v62 = vld [vmem:[#allocation55_spill] sm:$0xff] }
 0x7a7   : > { %6031 = vmatmul.msk.bf16.gmra.mxu1 %vm888_vm1, %v9842_v22 }
 0x7ac   : > { %v3660_v2 = vpop.f32.mrf.mxu0  ;;  %v3746_v8 = vpop.f32.mrf.mxu1 }
 0x7ad   : > { %v3661_v31 = vadd.f32 %v3660_v2, %v9860_v56  ;;  %v6085_v56 = vld [vmem:[%s9543_s16 + $0x68] sm:$0xf0]  ;;  %v9863_v2 = vld [vmem:[#allocation51_spill] sm:$0xff] }
 0x7af   : > { %3699 = vmatmul.bf16.gmra.mxu0 %v9847_v24  ;;  %v9855_v24 = vld [vmem:[#allocation20_spill] sm:$0xff] }
 0x7b2   : > { %4347 = vmatmul.bf16.gmra.mxu2 %v8635_v14  ;;  %4396 = vmatmul.bf16.gmra.mxu3 %v8637_v20  ;;  %v3475_v14 = vadd.f32 %v9856_v11, %v9855_v24  ;;  %v9858_v20 = vld [vmem:[#allocation28_spill] sm:$0xff]  ;;  %v6421_v11 = vld [vmem:[%s9543_s16 + $0xe4] sm:$0xf0] }
 0x7b3   : > { %v3569_v54 = vadd.f32 %v9858_v20, %v3480_v13  ;;  %v6404_v20 = vld [vmem:[%s9543_s16 + $0x64] sm:$0xf]  ;;  %v3470_v13 = vadd.f32 %v9863_v2, %v9862_v55  ;;  %v8684_v17 = vor.u32 %v6421_v11, %v6147_v25  ;;  %v8697_v25 = vpop.permute.xlu0 %3991 }
 0x7b4   : > { %v3662_v46 = vpop.f32.mrf.mxu0  ;;  %v3749_v22 = vpop.f32.mrf.mxu1  ;;  %v3564_v24 = vadd.f32 %v9864_v62, %v3475_v14  ;;  %v8686_v40 = vor.u32 %v6404_v20, %v6085_v56  ;;  %v9869_v14 = vld [vmem:[#allocation52_spill] sm:$0xff]  ;;  %9871 = vst [vmem:[#allocation40_spill] sm:$0xff] %v8697_v25 }
 0x7b5   : > { %v3658_v30 = vadd.f32 %v3657_v33, %v3569_v54  ;;  %v3663_v48 = vadd.f32 %v3662_v46, %v3574_v39  ;;  %9867 = vst [vmem:[#allocation42_spill] sm:$0xff] %v8684_v17  ;;  %v3559_v62 = vadd.f32 %v9869_v14, %v3470_v13 }
 0x7b6   : > { %9868 = vst [vmem:[#allocation15_spill] sm:$0xff] %v8686_v40  ;;  %v3653_v41 = vadd.f32 %v8576_v28, %v3564_v24  ;;  %v8708_v24 = vpop.f32.mrf.mxu2 }
 0x7b7   : > { %6032 = vmatmul.msk.bf16.gmra.mxu1 %vm888_vm1, %v9854_v45  ;;  %v3750_v45 = vadd.f32 %v3749_v22, %v3661_v31  ;;  %v9865_v31 = vld [vmem:[#allocation39_spill] sm:$0xff]  ;;  %v3747_v46 = vadd.f32 %v3746_v8, %v3658_v30  ;;  %v9866_v22 = vld [vmem:[#allocation32_spill] sm:$0xff]  ;;  %v3648_v28 = vadd.f32 %v8539_v3, %v3559_v62 }
 0x7b8   : > { %v3656_v33 = vadd.f32 %v3655_v27, %v9865_v31  ;;  %v9870_v27 = vld [vmem:[#allocation53_spill] sm:$0xff]  ;;  %v3742_v30 = vadd.f32 %v8598_v0, %v3653_v41  ;;  %v8714_v31 = vpop.permute.xlu1 %3996 }
 0x7b9   : > { %v3823_v55 = vmax.f32 %v3750_v45, 0.0  ;;  %v3651_v8 = vadd.f32 %v8561_v7, %v9870_v27  ;;  %v8703_v7 = vpop.permute.xlu2 %4071  ;;  %v3737_v41 = vadd.f32 %v8563_v9, %v3648_v28  ;;  %9873 = vst [vmem:[#allocation31_spill] sm:$0xff] %v8714_v31  ;;  %v6423_v9 = vld [vmem:[%s9543_s16 + $0xf4] sm:$0xf0] }
 0x7ba   : > { %v3745_v35 = vadd.f32 %v3744_v37, %v3656_v33  ;;  %9872 = vst [vmem:[#allocation12_spill] sm:$0xff] %v8703_v7  ;;  %v3817_v0 = vmax.f32 %v3742_v30, 0.0  ;;  %v6093_v33 = vld [vmem:[%s9543_s16 + $0x78] sm:$0xf0] }
 0x7bb   : > { %v3813_v3 = vmax.f32 %v3737_v41, 0.0  ;;  %v6408_v41 = vld [vmem:[%s9543_s16 + $0x84] sm:$0xf] }
 0x7bc   : > { %v3665_v54 = vpop.f32.mrf.mxu0  ;;  %v3751_v39 = vpop.f32.mrf.mxu1  ;;  %v3819_v37 = vmax.f32 %v3745_v35, 0.0  ;;  %v3811_v35 = vmax.f32 %v8541_v26, 0.0 }
 0x7bd   : > { %v3666_v21 = vadd.f32 %v3665_v54, %v9866_v22  ;;  %v3752_v23 = vadd.f32 %v3751_v39, %v3663_v48  ;;  %v3821_v48 = vmax.f32 %v3747_v46, 0.0  ;;  %v8727_v22 = vpop.permute.xlu0 %3976 }
 0x7be   : > { %9874 = vst [vmem:[#allocation74_spill] sm:$0xff] %v8727_v22  ;;  %v3867_v14 = vpack.c.bf16 %v3813_v3, %v3811_v35  ;;  %v8736_v30 = vpop.f32.mrf.mxu2  ;;  %v9882_v3 = vld [vmem:[#allocation36_spill] sm:$0xff] }
 0x7bf   : > { %v3825_v2 = vmax.f32 %v3752_v23, 0.0  ;;  %v3740_v23 = vadd.f32 %v8578_v32, %v3651_v8  ;;  %v3871_v56 = vpack.c.bf16 %v3821_v48, %v3819_v37  ;;  %v6155_v32 = vld [vmem:[%s9543_s16 + $0xf0] sm:$0xf] }
 0x7c0   : > { %v8730_v62 = vor.u32 %v6423_v9, %v6155_v32  ;;  %v8743_v28 = vpop.permute.xlu1 %4081 }
 0x7c1   : > { %v3873_v54 = vpack.c.bf16 %v3825_v2, %v3823_v55  ;;  %v3815_v13 = vmax.f32 %v3740_v23, 0.0  ;;  %v9875_v55 = vld [vmem:[#allocation34_spill] sm:$0xff]  ;;  %v8734_v8 = vpop.permute.xlu2 %4056  ;;  %9879 = vst [vmem:[#allocation56_spill] sm:$0xff] %v8743_v28 }
 0x7c2   : > { %4352 = vmatmul.bf16.gmra.mxu2 %v8684_v17  ;;  %4401 = vmatmul.bf16.gmra.mxu3 %v8686_v40  ;;  %9876 = vst [vmem:[#allocation20_spill] sm:$0xff] %v8730_v62  ;;  %v9904_v17 = vld [vmem:[#allocation18_spill] sm:$0xff] }
 0x7c3   : > { %4452 = vmatpush.bf16.msrb.mxu0 %v3873_v54  ;;  %v3869_v39 = vpack.c.bf16 %v3817_v0, %v3815_v13  ;;  %9878 = vst [vmem:[#allocation28_spill] sm:$0xff] %v8734_v8  ;;  %v8761_v13 = vpop.f32.mrf.mxu3 }
 0x7c4   : > { %v8701_v45 = vpop.f32.mrf.mxu0  ;;  %v3754_v11 = vpop.f32.mrf.mxu1 }
 0x7c5   : > { %v8706_v20 = vadd.f32 %v3754_v11, %v3666_v21  ;;  %v6406_v21 = vld [vmem:[%s9543_s16 + $0x74] sm:$0xf]  ;;  %v8747_v37 = vpop.permute.xlu0 %4061 }
 0x7c6   : > { %v8732_v27 = vor.u32 %v6406_v21, %v6093_v33  ;;  %9880 = vst [vmem:[#allocation29_spill] sm:$0xff] %v8747_v37 }
 0x7c7   : > { %4453 = vmatpush.bf16.msrb.mxu0 %v3871_v56 }
 0x7c8   : > { %9877 = vst [vmem:[#allocation54_spill] sm:$0xff] %v8732_v27  ;;  %v8766_v35 = vpop.permute.xlu1 %4066 }
 0x7c9   : > { %v8750_v11 = vpop.permute.xlu2 %3971  ;;  %9884 = vst [vmem:[#allocation55_spill] sm:$0xff] %v8766_v35  ;;  %v9905_v35 = vld [vmem:[#allocation75_spill] sm:$0xff] }
 0x7ca   : > { %9881 = vst [vmem:[#allocation19_spill] sm:$0xff] %v8750_v11 }
 0x7cb   : > { %4454 = vmatpush.bf16.msrb.mxu0 %v3869_v39 }
 0x7cc   : > { %v3670_v26 = vpop.f32.mrf.mxu0  ;;  %v8725_v46 = vpop.f32.mrf.mxu1 }
 0x7cd   : > { %v3671_v2 = vadd.f32 %v3670_v26, %v9875_v55 }
 0x7cf   : > { %4455 = vmatpush.bf16.msrb.mxu0 %v3867_v14 }
 0x7d0   : > { %v8781_v14 = vpop.permute.xlu1 %3981 }
 0x7d1   : > { %v8773_v32 = vpop.permute.xlu2 %3956  ;;  %9887 = vst [vmem:[#allocation52_spill] sm:$0xff] %v8781_v14 }
 0x7d2   : > { %4357 = vmatmul.bf16.gmra.mxu2 %v8730_v62  ;;  %4406 = vmatmul.bf16.gmra.mxu3 %v8732_v27  ;;  %9886 = vst [vmem:[#allocation32_spill] sm:$0xff] %v8773_v32  ;;  %v4284_v9 = vadd.f32 %v8550_v18, %v8773_v32 }
 0x7d3   : > { %4456 = vmatpush.bf16.msrb.mxu0 %v8533_v60  ;;  %v6101_v60 = vld [vmem:[%s9543_s16 + $0x88] sm:$0xf0] }
 0x7d4   : > { %v8741_v48 = vpop.f32.mrf.mxu0  ;;  %v3759_v54 = vpop.f32.mrf.mxu1 }
 0x7d5   : > { %v8745_v23 = vadd.f32 %v3759_v54, %v3671_v2  ;;  %v6109_v54 = vld [vmem:[%s9543_s16 + $0x98] sm:$0xf0] }
 0x7d7   : > { %4457 = vmatpush.bf16.msrb.mxu0 %v8508_v19  ;;  %v8764_v19 = vor.u32 %v6408_v41, %v6101_v60 }
 0x7d8   : > { %v8802_v28 = vpop.permute.xlu1 %3966 }
 0x7d9   : > { %9883 = vst [vmem:[#allocation51_spill] sm:$0xff] %v8764_v19 }
 0x7db   : > { %4458 = vmatpush.bf16.msrb.mxu0 %v8483_v36  ;;  %v8769_v36 = vpop.permute.xlu0 %4046 }
 0x7dc   : > { %v3675_v0 = vpop.f32.mrf.mxu0  ;;  %v8759_v56 = vpop.f32.mrf.mxu1  ;;  %9885 = vst [vmem:[#allocation39_spill] sm:$0xff] %v8769_v36 }
 0x7dd   : > { %v3676_v39 = vadd.f32 %v3675_v0, %v9882_v3  ;;  %v9889_v0 = vld [vmem:[#allocation67_spill] sm:$0xff] }
 0x7de   : > { %9892 = vst [vmem:[#allocation67_spill] sm:$0xff] %v8802_v28 }
 0x7df   : > { %4459 = vmatpush.bf16.msrb.mxu0 %v8455_v38 }
 0x7e2   : > { %4411 = vmatmul.bf16.gmra.mxu3 %v8764_v19  ;;  %4460 = vmatmul.bf16.vlgmr.msrb.gmra.mxu0 %v8344_v10  ;;  %v6410_v10 = vld [vmem:[%s9543_s16 + $0x94] sm:$0xf] }
 0x7e3   : > { %v8783_v38 = vpop.permute.xlu0 %3961 }
 0x7e4   : > { %v8777_v21 = vpop.f32.mrf.mxu0  ;;  %v3764_v33 = vpop.f32.mrf.mxu1  ;;  %9888 = vst [vmem:[#allocation53_spill] sm:$0xff] %v8783_v38  ;;  %v4286_v18 = vadd.f32 %v8580_v12, %v8783_v38  ;;  %v4289_v38 = vadd.f32 %v8606_v44, %v8802_v28 }
 0x7e5   : > { %v8779_v26 = vadd.f32 %v3764_v33, %v3676_v39  ;;  %v4372_v55 = vpop.f32.mrf.mxu3  ;;  %v8796_v33 = vor.u32 %v6410_v10, %v6109_v54  ;;  %v4303_v12 = vpop.f32.mrf.mxu2  ;;  %v6412_v54 = vld [vmem:[%s9543_s16 + $0xa4] sm:$0xf] }
 0x7e6   : > { %v4373_v2 = vadd.f32 %v4372_v55, %v4284_v9 }
 0x7e7   : > { %9890 = vst [vmem:[#allocation34_spill] sm:$0xff] %v8796_v33 }
 0x7e8   : > { %v4630_v55 = vmax.f32 %v4373_v2, 0.0 }
 0x7ec   : > { %v3680_v41 = vpop.f32.mrf.mxu0  ;;  %v8793_v60 = vpop.f32.mrf.mxu1 }
 0x7ed   : > { %v3681_v3 = vadd.f32 %v3680_v41, %v9889_v0  ;;  %v4374_v39 = vpop.f32.mrf.mxu3 }
 0x7ee   : > { %v4375_v9 = vadd.f32 %v4374_v39, %v4286_v18  ;;  %v8820_v39 = vpop.f32.mrf.mxu2 }
 0x7f0   : > { %v4632_v37 = vmax.f32 %v4375_v9, 0.0 }
 0x7f2   : > { %4416 = vmatmul.bf16.gmra.mxu3 %v8796_v33  ;;  %4465 = vmatmul.bf16.gmra.mxu0 %v8361_v16  ;;  %v8800_v7 = vpack.c.bf16 %v4632_v37, %v4630_v55  ;;  %v6117_v16 = vld [vmem:[%s9543_s16 + $0xa8] sm:$0xf0]  ;;  %v4291_v37 = vadd.f32 %v8619_v61, %v8750_v11  ;;  %v4294_v61 = vadd.f32 %v8646_v43, %v8727_v22 }
 0x7f3   : > { %v4296_v43 = vadd.f32 %v8682_v59, %v8781_v14  ;;  %v4299_v59 = vadd.f32 %v8708_v24, %v8666_v4  ;;  %v4304_v4 = vadd.f32 %v4303_v12, %v8714_v31 }
 0x7f4   : > { %9891 = vst [vmem:[#allocation36_spill] sm:$0xff] %v8800_v7  ;;  %v8806_v19 = vpop.f32.mrf.mxu0  ;;  %v3769_v41 = vpop.f32.mrf.mxu1 }
 0x7f5   : > { %v8808_v18 = vadd.f32 %v3769_v41, %v3681_v3  ;;  %v4377_v10 = vpop.f32.mrf.mxu3  ;;  %v9893_v3 = vld [vmem:[#allocation38_spill] sm:$0xff]  ;;  %v8823_v41 = vor.u32 %v6412_v54, %v6117_v16 }
 0x7f6   : > { %v4378_v2 = vadd.f32 %v4377_v10, %v4289_v38  ;;  %v8835_v54 = vpop.f32.mrf.mxu2 }
 0x7f7   : > { %9894 = vst [vmem:[#allocation38_spill] sm:$0xff] %v8823_v41 }
 0x7f8   : > { %v4634_v10 = vmax.f32 %v4378_v2, 0.0  ;;  %v6414_v2 = vld [vmem:[%s9543_s16 + $0xb4] sm:$0xf] }
 0x7fc   : > { %v3685_v0 = vpop.f32.mrf.mxu0  ;;  %v8818_v44 = vpop.f32.mrf.mxu1 }
 0x7fd   : > { %v3686_v9 = vadd.f32 %v3685_v0, %v9893_v3  ;;  %v4379_v55 = vpop.f32.mrf.mxu3 }
 0x7fe   : > { %v4380_v38 = vadd.f32 %v4379_v55, %v4291_v37 }
 0x800   : > { %v4636_v33 = vmax.f32 %v4380_v38, 0.0 }
 0x802   : > { %4421 = vmatmul.bf16.gmra.mxu3 %v8823_v41  ;;  %4470 = vmatmul.bf16.gmra.mxu0 %v8377_v42  ;;  %v8827_v28 = vpack.c.bf16 %v4636_v33, %v4634_v10  ;;  %v6125_v42 = vld [vmem:[%s9543_s16 + $0xb8] sm:$0xf0]  ;;  %v8851_v10 = vpop.f32.mrf.mxu2 }
 0x804   : > { %9895 = vst [vmem:[#allocation77_spill] sm:$0xff] %v8827_v28  ;;  %v8831_v11 = vpop.f32.mrf.mxu0  ;;  %v3774_v32 = vpop.f32.mrf.mxu1 }
 0x805   : > { %v8833_v27 = vadd.f32 %v3774_v32, %v3686_v9  ;;  %v4382_v0 = vpop.f32.mrf.mxu3  ;;  %v8849_v9 = vor.u32 %v6414_v2, %v6125_v42  ;;  %v4301_v42 = vadd.f32 %v8736_v30, %v8697_v25 }
 0x806   : > { %v4383_v37 = vadd.f32 %v4382_v0, %v4294_v61 }
 0x807   : > { %9896 = vst [vmem:[#allocation78_spill] sm:$0xff] %v8849_v9 }
 0x808   : > { %v4638_v55 = vmax.f32 %v4383_v37, 0.0  ;;  %v6416_v37 = vld [vmem:[%s9543_s16 + $0xc4] sm:$0xf] }
 0x80a   : > { %v8861_v2 = vpop.f32.mrf.mxu2 }
 0x80c   : > { %v8845_v33 = vpop.f32.mrf.mxu0  ;;  %v8847_v16 = vpop.f32.mrf.mxu1 }
 0x80d   : > { %v4384_v32 = vpop.f32.mrf.mxu3 }
 0x80e   : > { %v4385_v3 = vadd.f32 %v4384_v32, %v4296_v43 }
 0x810   : > { %v4640_v38 = vmax.f32 %v4385_v3, 0.0 }
 0x812   : > { %4426 = vmatmul.bf16.gmra.mxu3 %v8849_v9  ;;  %4475 = vmatmul.bf16.gmra.mxu0 %v8392_v51  ;;  %v8855_v61 = vpack.c.bf16 %v4640_v38, %v4638_v55  ;;  %v6133_v51 = vld [vmem:[%s9543_s16 + $0xc8] sm:$0xf0]  ;;  %v8878_v40 = vpop.f32.mrf.mxu2 }
 0x813   : > { %v8871_v38 = vor.u32 %v6416_v37, %v6133_v51  ;;  %v6141_v37 = vld [vmem:[%s9543_s16 + $0xd8] sm:$0xf0] }
 0x814   : > { %9897 = vst [vmem:[#allocation79_spill] sm:$0xff] %v8855_v61  ;;  %v3692_v0 = vpop.f32.mrf.mxu0  ;;  %v8859_v14 = vpop.f32.mrf.mxu1  ;;  %v9909_v61 = vld [vmem:[#allocation21_spill] sm:$0xff] }
 0x815   : > { %v4387_v41 = vpop.f32.mrf.mxu3  ;;  %9898 = vst [vmem:[#allocation80_spill] sm:$0xff] %v8871_v38 }
 0x816   : > { %v4388_v43 = vadd.f32 %v4387_v41, %v4299_v59 }
 0x818   : > { %v4642_v41 = vmax.f32 %v4388_v43, 0.0  ;;  %v6418_v43 = vld [vmem:[%s9543_s16 + $0xd4] sm:$0xf] }
 0x819   : > { %v8890_v12 = vor.u32 %v6418_v43, %v6141_v37  ;;  %v3515_v43 = vadd.f32 %v9905_v35, %v9904_v17  ;;  %v9906_v17 = vld [vmem:[#allocation24_spill] sm:$0xff]  ;;  %v9907_v35 = vld [vmem:[#allocation71_spill] sm:$0xff] }
 0x81b   : > { %9901 = vst [vmem:[#allocation83_spill] sm:$0xff] %v8890_v12 }
 0x81c   : > { %v3695_v32 = vpop.f32.mrf.mxu0  ;;  %v3781_v24 = vpop.f32.mrf.mxu1 }
 0x81d   : > { %v4389_v3 = vpop.f32.mrf.mxu3 }
 0x81e   : > { %v4390_v55 = vadd.f32 %v4389_v3, %v4301_v42  ;;  %v8892_v3 = vpop.f32.mrf.mxu2 }
 0x820   : > { %v4644_v59 = vmax.f32 %v4390_v55, 0.0  ;;  %v9902_v55 = vld [vmem:[#allocation16_spill] sm:$0xff] }
 0x822   : > { %4431 = vmatmul.bf16.gmra.mxu3 %v8871_v38  ;;  %4480 = vmatmul.bf16.gmra.mxu0 %v8408_v57  ;;  %v8875_v9 = vpack.c.bf16 %v4644_v59, %v4642_v41  ;;  %v3520_v41 = vadd.f32 %v8317_v29, %v9902_v55  ;;  %v9903_v59 = vld [vmem:[#allocation17_spill] sm:$0xff] }
 0x823   : > { %v6149_v55 = vld [vmem:[%s9543_s16 + $0xe8] sm:$0xf0] }
 0x824   : > { %9899 = vst [vmem:[#allocation81_spill] sm:$0xff] %v8875_v9  ;;  %v3697_v22 = vpop.f32.mrf.mxu0  ;;  %v3784_v62 = vpop.f32.mrf.mxu1  ;;  %v3609_v37 = vadd.f32 %v8319_v15, %v3520_v41  ;;  %v3510_v15 = vadd.f32 %v9907_v35, %v9906_v17  ;;  %v9910_v9 = vld [vmem:[#allocation69_spill] sm:$0xff] }
 0x825   : > { %v4392_v30 = vpop.f32.mrf.mxu3  ;;  %v3505_v36 = vadd.f32 %v9910_v9, %v9909_v61  ;;  %v9912_v35 = vld [vmem:[#allocation73_spill] sm:$0xff] }
 0x826   : > { %v8880_v25 = vadd.f32 %v4392_v30, %v4304_v4  ;;  %v3525_v30 = vadd.f32 %v8537_v5, %v9903_v59  ;;  %v3698_v7 = vadd.f32 %v3697_v22, %v3609_v37  ;;  %v6420_v5 = vld [vmem:[%s9543_s16 + $0xe4] sm:$0xf]  ;;  %v9913_v9 = vld [vmem:[#allocation25_spill] sm:$0xff] }
 0x828   : > { %9900 = vst [vmem:[#allocation82_spill] sm:$0xff] %v8880_v25  ;;  %v3614_v8 = vadd.f32 %v8761_v13, %v3525_v30  ;;  %v9908_v13 = vld [vmem:[#allocation76_spill] sm:$0xff]  ;;  %v3696_v30 = vadd.f32 %v3695_v32, %v8314_v58 }
 0x829   : > { %v3604_v59 = vadd.f32 %v9908_v13, %v3515_v43  ;;  %v9911_v25 = vld [vmem:[#allocation72_spill] sm:$0xff]  ;;  %v3691_v43 = vadd.f32 %v8845_v33, %v9912_v35  ;;  %v9921_v35 = vld [vmem:[#allocation62_spill] sm:$0xff] }
 0x82a   : > { %v3599_v17 = vadd.f32 %v9911_v25, %v3510_v15  ;;  %v9914_v25 = vld [vmem:[#allocation65_spill] sm:$0xff] }
 0x82b   : > { %v3500_v61 = vadd.f32 %v9914_v25, %v9913_v9 }
 0x82c   : > { %v3786_v57 = vpop.f32.mrf.mxu1  ;;  %v3700_v42 = vpop.f32.mrf.mxu0 }
 0x82d   : > { %v8888_v51 = vpop.f32.mrf.mxu3 }
 0x832   : > { %4436 = vmatmul.bf16.gmra.mxu3 %v8890_v12  ;;  %4485 = vmatmul.bf16.gmra.mxu0 %v8422_v50  ;;  %v8906_v12 = vpop.f32.mrf.mxu2  ;;  %v3701_v50 = vadd.f32 %v3700_v42, %v8327_v53  ;;  %v3787_v53 = vadd.f32 %v3786_v57, %v3698_v7  ;;  %v3693_v42 = vadd.f32 %v3692_v0, %v3604_v59  ;;  %v9915_v57 = vld [vmem:[#allocation70_spill] sm:$0xff] }
 0x833   : > { %v3780_v0 = vadd.f32 %v8859_v14, %v3691_v43  ;;  %v3594_v33 = vadd.f32 %v9915_v57, %v3505_v36  ;;  %v9918_v14 = vld [vmem:[#allocation66_spill] sm:$0xff] }
 0x834   : > { %v3789_v4 = vpop.f32.mrf.mxu1  ;;  %v3702_v31 = vpop.f32.mrf.mxu0  ;;  %v3782_v13 = vadd.f32 %v3781_v24, %v3693_v42  ;;  %v3853_v58 = vmax.f32 %v3787_v53, 0.0 }
 0x835   : > { %v8900_v38 = vpop.f32.mrf.mxu3  ;;  %v3703_v28 = vadd.f32 %v3702_v31, %v3614_v8  ;;  %v3790_v29 = vadd.f32 %v3789_v4, %v3701_v50  ;;  %v8921_v8 = vor.u32 %v6420_v5, %v6149_v55  ;;  %v3785_v4 = vadd.f32 %v3784_v62, %v3696_v30 }
 0x836   : > { %v3688_v62 = vadd.f32 %v8831_v11, %v3599_v17  ;;  %v3847_v15 = vmax.f32 %v3780_v0, 0.0  ;;  %v9917_v11 = vld [vmem:[#allocation35_spill] sm:$0xff]  ;;  %v3589_v30 = vadd.f32 %v9918_v14, %v3500_v61  ;;  %v3839_v0 = vmax.f32 %v8808_v18, 0.0 }
 0x837   : > { %v3855_v37 = vmax.f32 %v3790_v29, 0.0  ;;  %v3851_v32 = vmax.f32 %v3785_v4, 0.0  ;;  %v3849_v29 = vmax.f32 %v3782_v13, 0.0  ;;  %v6157_v4 = vld [vmem:[%s9543_s16 + $0xf8] sm:$0xf0]  ;;  %v4314_v14 = vadd.f32 %v8861_v2, %v8574_v34  ;;  %v9925_v2 = vld [vmem:[#allocation45_spill] sm:$0xff] }
 0x838   : > { %v3777_v24 = vadd.f32 %v8847_v16, %v3688_v62  ;;  %v3678_v36 = vadd.f32 %v8777_v21, %v3589_v30  ;;  %v3843_v16 = vmax.f32 %v8833_v27, 0.0 }
 0x839   : > { %v3887_v55 = vpack.c.bf16 %v3853_v58, %v3851_v32  ;;  %v3885_v42 = vpack.c.bf16 %v3849_v29, %v3847_v15  ;;  %v9922_v32 = vld [vmem:[#allocation59_spill] sm:$0xff] }
 0x83a   : > { %v3767_v43 = vadd.f32 %v8793_v60, %v3678_v36 }
 0x83c   : > { %v3791_v41 = vpop.f32.mrf.mxu1  ;;  %v3837_v61 = vmax.f32 %v3767_v43, 0.0 }
 0x83d   : > { %v3792_v22 = vadd.f32 %v3791_v41, %v3703_v28  ;;  %v8919_v31 = vpop.f32.mrf.mxu3  ;;  %v8930_v28 = vpop.f32.mrf.mxu2  ;;  %v9916_v41 = vld [vmem:[#allocation44_spill] sm:$0xff] }
 0x83e   : > { %v3495_v59 = vadd.f32 %v9917_v11, %v9916_v41 }
 0x83f   : > { %v3857_v50 = vmax.f32 %v3792_v22, 0.0  ;;  %v3845_v22 = vmax.f32 %v3777_v24, 0.0 }
 0x841   : > { %v3889_v7 = vpack.c.bf16 %v3857_v50, %v3855_v37  ;;  %v9919_v37 = vld [vmem:[#allocation47_spill] sm:$0xff]  ;;  %v9920_v50 = vld [vmem:[#allocation33_spill] sm:$0xff]  ;;  %v3883_v58 = vpack.c.bf16 %v3845_v22, %v3843_v16 }
 0x842   : > { %4441 = vmatmul.bf16.gmra.mxu3 %v8921_v8  ;;  %4490 = vmatmul.bf16.gmra.mxu0 %v8437_v47  ;;  %v3683_v47 = vadd.f32 %v8806_v19, %v3594_v33  ;;  %v6422_v19 = vld [vmem:[%s9543_s16 + $0xf4] sm:$0xf]  ;;  %v3490_v17 = vadd.f32 %v9920_v50, %v9919_v37  ;;  %v3835_v33 = vmax.f32 %v8779_v26, 0.0  ;;  %v4321_v26 = vadd.f32 %v8906_v12, %v8545_v1  ;;  %v9924_v37 = vld [vmem:[#allocation43_spill] sm:$0xff] }
 0x843   : > { %4541 = vmatpush.bf16.msrb.mxu1 %v3889_v7  ;;  %v8957_v7 = vor.u32 %v6422_v19, %v6157_v4 }
 0x844   : > { %v3772_v53 = vadd.f32 %v8818_v44, %v3683_v47  ;;  %v3584_v44 = vadd.f32 %v9921_v35, %v3495_v59  ;;  %v3579_v9 = vadd.f32 %v9922_v32, %v3490_v17  ;;  %v3879_v29 = vpack.c.bf16 %v3837_v61, %v3835_v33  ;;  %v9927_v17 = vld [vmem:[#allocation64_spill] sm:$0xff] }
 0x845   : > { %v4402_v5 = vpop.f32.mrf.mxu3  ;;  %v8955_v13 = vpop.f32.mrf.mxu2  ;;  %v9930_v61 = vld [vmem:[#allocation48_spill] sm:$0xff] }
 0x846   : > { %v3841_v21 = vmax.f32 %v3772_v53, 0.0  ;;  %v3673_v62 = vadd.f32 %v8741_v48, %v3584_v44  ;;  %v3668_v60 = vadd.f32 %v8701_v45, %v3579_v9  ;;  %v3827_v45 = vmax.f32 %v8706_v20, 0.0 }
 0x847   : > { %4542 = vmatpush.bf16.msrb.mxu1 %v3887_v55  ;;  %v3831_v55 = vmax.f32 %v8745_v23, 0.0  ;;  %v4403_v20 = vadd.f32 %v4402_v5, %v4314_v14 }
 0x848   : > { %v3762_v25 = vadd.f32 %v8759_v56, %v3673_v62  ;;  %v3881_v57 = vpack.c.bf16 %v3841_v21, %v3839_v0  ;;  %v3757_v48 = vadd.f32 %v8725_v46, %v3668_v60  ;;  %v8969_v56 = vpop.permute.xlu1 %4051  ;;  %v4316_v46 = vadd.f32 %v8878_v40, %v8587_v63  ;;  %v9923_v40 = vld [vmem:[#allocation27_spill] sm:$0xff]  ;;  %v9932_v60 = vld [vmem:[#allocation81_spill] sm:$0xff] }
 0x849   : > { %v4309_v12 = vadd.f32 %v8835_v54, %v9923_v40  ;;  %v4654_v44 = vmax.f32 %v4403_v20, 0.0  ;;  %v6427_v20 = vld [vmem:[%s9545_s18 + $0x14] sm:$0xf0] }
 0x84a   : > { %v3833_v24 = vmax.f32 %v3762_v25, 0.0  ;;  %v3829_v15 = vmax.f32 %v3757_v48, 0.0  ;;  %v9929_v25 = vld [vmem:[#allocation46_spill] sm:$0xff] }
 0x84b   : > { %4543 = vmatpush.bf16.msrb.mxu1 %v3885_v42  ;;  %v4398_v35 = vadd.f32 %v8900_v38, %v4309_v12  ;;  %v9941_v12 = vld [vmem:[#allocation23_spill] sm:$0xff] }
 0x84c   : > { %v3877_v41 = vpack.c.bf16 %v3833_v24, %v3831_v55  ;;  %v3875_v59 = vpack.c.bf16 %v3829_v15, %v3827_v45  ;;  %v6163_v55 = vld [vmem:[%s9545_s18] sm:$0xf]  ;;  %v6425_v15 = vld [vmem:[%s9545_s18 + $0x4] sm:$0xf0] }
 0x84d   : > { %v4404_v27 = vpop.f32.mrf.mxu3  ;;  %v4328_v47 = vpop.f32.mrf.mxu2  ;;  %v9936_v45 = vld [vmem:[#allocation36_spill] sm:$0xff] }
 0x84e   : > { %v4405_v30 = vadd.f32 %v4404_v27, %v4316_v46  ;;  %v9937_v46 = vld [vmem:[#allocation22_spill] sm:$0xff] }
 0x84f   : > { %4544 = vmatpush.bf16.msrb.mxu1 %v3883_v58  ;;  %v4650_v58 = vmax.f32 %v4398_v35, 0.0  ;;  %v6179_v35 = vld [vmem:[%s9545_s18 + $0x20] sm:$0xf] }
 0x850   : > { %v4656_v19 = vmax.f32 %v4405_v30, 0.0  ;;  %v8989_v50 = vpop.permute.xlu1 %4036 }
 0x851   : > { %9926 = vst [vmem:[#allocation16_spill] sm:$0xff] %v8989_v50  ;;  %v4324_v5 = vadd.f32 %v8930_v28, %v8989_v50 }
 0x852   : > { %4446 = vmatmul.bf16.gmra.mxu3 %v8957_v7  ;;  %4495 = vmatmul.bf16.gmra.mxu0 %v8451_v6  ;;  %v4319_v6 = vadd.f32 %v8892_v3, %v8611_v49  ;;  %v4311_v3 = vadd.f32 %v8851_v10, %v8690_v52  ;;  %v4306_v10 = vadd.f32 %v8820_v39, %v9927_v17  ;;  %v9928_v39 = vld [vmem:[#allocation82_spill] sm:$0xff] }
 0x853   : > { %4545 = vmatpush.bf16.msrb.mxu1 %v3881_v57  ;;  %v4706_v27 = vpack.c.bf16 %v4656_v19, %v4654_v44  ;;  %v4646_v9 = vmax.f32 %v9928_v39, 0.0  ;;  %v6429_v44 = vld [vmem:[%s9545_s18 + $0x24] sm:$0xf0] }
 0x854   : > { %v4400_v16 = vadd.f32 %v8919_v31, %v4311_v3  ;;  %v4395_v31 = vadd.f32 %v8888_v51, %v4306_v10  ;;  %v9931_v51 = vld [vmem:[#allocation39_spill] sm:$0xff]  ;;  %v6171_v3 = vld [vmem:[%s9545_s18 + $0x10] sm:$0xf] }
 0x855   : > { %v4407_v18 = vpop.f32.mrf.mxu3  ;;  %v8982_v36 = vpop.f32.mrf.mxu2  ;;  %v4329_v57 = vadd.f32 %v4328_v47, %v9931_v51 }
 0x856   : > { %v4408_v11 = vadd.f32 %v4407_v18, %v4319_v6  ;;  %v4652_v43 = vmax.f32 %v4400_v16, 0.0  ;;  %v4648_v62 = vmax.f32 %v4395_v31, 0.0  ;;  %v9933_v18 = vld [vmem:[#allocation79_spill] sm:$0xff]  ;;  %v9020_v6 = vor.u32 %v6425_v15, %v6163_v55  ;;  %v9942_v16 = vld [vmem:[#allocation30_spill] sm:$0xff] }
 0x857   : > { %4546 = vmatpush.bf16.msrb.mxu1 %v3879_v29  ;;  %v9934_v29 = vld [vmem:[#allocation77_spill] sm:$0xff]  ;;  %v9950_v55 = vld [vmem:[#allocation50_spill] sm:$0xff] }
 0x858   : > { %v4658_v22 = vmax.f32 %v4408_v11, 0.0  ;;  %v4704_v0 = vpack.c.bf16 %v4652_v43, %v4650_v58  ;;  %v4702_v38 = vpack.c.bf16 %v4648_v62, %v4646_v9  ;;  %9935 = vst [vmem:[#allocation17_spill] sm:$0xff] %v9020_v6  ;;  %v9939_v11 = vld [vmem:[#allocation28_spill] sm:$0xff]  ;;  %v9061_v43 = vor.u32 %v6429_v44, %v6179_v35  ;;  %v9945_v58 = vld [vmem:[#allocation26_spill] sm:$0xff]  ;;  %v6435_v35 = vld [vmem:[%s9545_s18 + $0x54] sm:$0xf0] }
 0x859   : > { %v9946_v62 = vld [vmem:[#allocation58_spill] sm:$0xff] }
 0x85a   : > { %9944 = vst [vmem:[#allocation75_spill] sm:$0xff] %v9061_v43 }
 0x85b   : > { %4547 = vmatpush.bf16.msrb.mxu1 %v3877_v41 }
 0x85d   : > { %v4409_v23 = vpop.f32.mrf.mxu3  ;;  %v4333_v32 = vpop.f32.mrf.mxu2 }
 0x85e   : > { %v4410_v53 = vadd.f32 %v4409_v23, %v4321_v26  ;;  %v9938_v26 = vld [vmem:[#allocation14_spill] sm:$0xff]  ;;  %v4334_v23 = vadd.f32 %v4333_v32, %v9939_v11  ;;  %v9963_v11 = vld [vmem:[#allocation60_spill] sm:$0xff] }
 0x85f   : > { %4548 = vmatpush.bf16.msrb.mxu1 %v3875_v59 }
 0x860   : > { %v4660_v42 = vmax.f32 %v4410_v53, 0.0  ;;  %v9031_v53 = vpop.f32.mrf.mxu0 }
 0x862   : > { %v4708_v4 = vpack.c.bf16 %v4660_v42, %v4658_v22  ;;  %4500 = vmatmul.bf16.gmra.mxu0 %v9924_v37  ;;  %4549 = vmatmul.bf16.vlgmr.msrb.gmra.mxu1 %v9925_v2  ;;  %v9041_v42 = vor.u32 %v6427_v20, %v6171_v3  ;;  %v9952_v20 = vld [vmem:[#allocation42_spill] sm:$0xff] }
 0x864   : > { %4918 = vmatpush.bf16.msrb.mxu2 %v4708_v4  ;;  %9940 = vst [vmem:[#allocation18_spill] sm:$0xff] %v9041_v42  ;;  %v9943_v4 = vld [vmem:[#allocation55_spill] sm:$0xff] }
 0x865   : > { %v4412_v54 = vpop.f32.mrf.mxu3  ;;  %v9006_v33 = vpop.f32.mrf.mxu2 }
 0x866   : > { %v8997_v21 = vadd.f32 %v4412_v54, %v4324_v5 }
 0x868   : > { %4919 = vmatpush.bf16.msrb.mxu2 %v4706_v27  ;;  %v9047_v10 = vpop.f32.mrf.mxu0 }
 0x86c   : > { %4920 = vmatpush.bf16.msrb.mxu2 %v4704_v0  ;;  %v9947_v0 = vld [vmem:[#allocation68_spill] sm:$0xff] }
 0x86d   : > { %v9000_v28 = vpop.f32.mrf.mxu3  ;;  %v4338_v41 = vpop.f32.mrf.mxu2 }
 0x86e   : > { %v4339_v37 = vadd.f32 %v4338_v41, %v9943_v4 }
 0x870   : > { %4921 = vmatpush.bf16.msrb.mxu2 %v4702_v38  ;;  %v9063_v27 = vpop.f32.mrf.mxu0 }
 0x872   : > { %4505 = vmatmul.bf16.gmra.mxu0 %v9929_v25  ;;  %4554 = vmatmul.bf16.gmra.mxu1 %v9930_v61  ;;  %v6187_v61 = vld [vmem:[%s9545_s18 + $0x30] sm:$0xf] }
 0x874   : > { %4922 = vmatpush.bf16.msrb.mxu2 %v9932_v60 }
 0x875   : > { %v4417_v48 = vpop.f32.mrf.mxu3  ;;  %v9029_v30 = vpop.f32.mrf.mxu2 }
 0x876   : > { %v9008_v24 = vadd.f32 %v4417_v48, %v4329_v57  ;;  %v6431_v57 = vld [vmem:[%s9545_s18 + $0x34] sm:$0xf0] }
 0x877   : > { %v9079_v48 = vor.u32 %v6431_v57, %v6187_v61  ;;  %v9956_v61 = vld [vmem:[#allocation54_spill] sm:$0xff] }
 0x878   : > { %4923 = vmatpush.bf16.msrb.mxu2 %v9933_v18  ;;  %v9071_v25 = vpop.f32.mrf.mxu0 }
 0x879   : > { %9948 = vst [vmem:[#allocation24_spill] sm:$0xff] %v9079_v48 }
 0x87c   : > { %4924 = vmatpush.bf16.msrb.mxu2 %v9934_v29  ;;  %v9949_v29 = vld [vmem:[#allocation61_spill] sm:$0xff] }
 0x87d   : > { %v9018_v47 = vpop.f32.mrf.mxu3  ;;  %v4343_v19 = vpop.f32.mrf.mxu2 }
 0x87e   : > { %v4344_v32 = vadd.f32 %v4343_v19, %v9947_v0  ;;  %v9961_v0 = vld [vmem:[#allocation32_spill] sm:$0xff] }
 0x880   : > { %4925 = vmatpush.bf16.msrb.mxu2 %v9936_v45  ;;  %v9084_v15 = vpop.f32.mrf.mxu0 }
 0x882   : > { %4510 = vmatmul.bf16.gmra.mxu0 %v9937_v46  ;;  %4559 = vmatmul.bf16.gmra.mxu1 %v9938_v26  ;;  %v6195_v46 = vld [vmem:[%s9545_s18 + $0x40] sm:$0xf]  ;;  %v6433_v26 = vld [vmem:[%s9545_s18 + $0x44] sm:$0xf0] }
 0x883   : > { %4926 = vmatmul.bf16.vlgmr.msrb.gmra.mxu2 %v9020_v6  ;;  %v9094_v3 = vor.u32 %v6433_v26, %v6195_v46  ;;  %v9958_v26 = vld [vmem:[#allocation57_spill] sm:$0xff] }
 0x885   : > { %v4422_v59 = vpop.f32.mrf.mxu3  ;;  %v9057_v54 = vpop.f32.mrf.mxu2  ;;  %9951 = vst [vmem:[#allocation71_spill] sm:$0xff] %v9094_v3 }
 0x886   : > { %v9027_v14 = vadd.f32 %v4422_v59, %v4334_v23 }
 0x888   : > { %v9092_v59 = vpop.f32.mrf.mxu0 }
 0x88d   : > { %v9039_v22 = vpop.f32.mrf.mxu3  ;;  %v4348_v38 = vpop.f32.mrf.mxu2 }
 0x88e   : > { %v4349_v6 = vadd.f32 %v4348_v38, %v9963_v11  ;;  %v9967_v38 = vld [vmem:[#allocation12_spill] sm:$0xff] }
 0x892   : > { %4515 = vmatmul.bf16.gmra.mxu0 %v9941_v12  ;;  %4564 = vmatmul.bf16.gmra.mxu1 %v9942_v16  ;;  %v9953_v12 = vld [vmem:[#allocation15_spill] sm:$0xff] }
 0x893   : > { %4931 = vmatmul.bf16.gmra.mxu2 %v9041_v42 }
 0x895   : > { %v4427_v2 = vpop.f32.mrf.mxu3  ;;  %v4350_v18 = vpop.f32.mrf.mxu2 }
 0x896   : > { %v9049_v5 = vadd.f32 %v4427_v2, %v4339_v37  ;;  %v9099_v37 = vpop.f32.mrf.mxu0  ;;  %v6203_v2 = vld [vmem:[%s9545_s18 + $0x50] sm:$0xf] }
 0x89d   : > { %v9059_v31 = vpop.f32.mrf.mxu3  ;;  %v4353_v45 = vpop.f32.mrf.mxu2 }
 0x8a2   : > { %4520 = vmatmul.bf16.gmra.mxu0 %v9945_v58  ;;  %4569 = vmatmul.bf16.gmra.mxu1 %v9946_v62  ;;  %v9107_v62 = vor.u32 %v6435_v35, %v6203_v2  ;;  %v6211_v2 = vld [vmem:[%s9545_s18 + $0x60] sm:$0xf]  ;;  %v6437_v35 = vld [vmem:[%s9545_s18 + $0x64] sm:$0xf0] }
 0x8a3   : > { %4936 = vmatmul.bf16.gmra.mxu2 %v9061_v43  ;;  %v4462_v43 = vadd.f32 %v9031_v53, %v9961_v0  ;;  %v9965_v53 = vld [vmem:[#allocation56_spill] sm:$0xff] }
 0x8a4   : > { %9954 = vst [vmem:[#allocation76_spill] sm:$0xff] %v9107_v62  ;;  %v4346_v0 = vadd.f32 %v9057_v54, %v9965_v53 }
 0x8a5   : > { %v4432_v39 = vpop.f32.mrf.mxu3  ;;  %v4355_v16 = vpop.f32.mrf.mxu2 }
 0x8a6   : > { %v9069_v9 = vadd.f32 %v4432_v39, %v4344_v32  ;;  %v9109_v32 = vpop.f32.mrf.mxu0  ;;  %v9955_v39 = vld [vmem:[#allocation20_spill] sm:$0xff] }
 0x8ad   : > { %v4434_v60 = vpop.f32.mrf.mxu3  ;;  %v4358_v58 = vpop.f32.mrf.mxu2 }
 0x8b2   : > { %4525 = vmatmul.bf16.gmra.mxu0 %v9949_v29  ;;  %4574 = vmatmul.bf16.gmra.mxu1 %v9950_v55  ;;  %v9957_v55 = vld [vmem:[#allocation13_spill] sm:$0xff] }
 0x8b3   : > { %4941 = vmatmul.bf16.gmra.mxu2 %v9079_v48  ;;  %v4359_v46 = vadd.f32 %v4358_v58, %v9957_v55 }
 0x8b5   : > { %v4437_v41 = vpop.f32.mrf.mxu3  ;;  %v4360_v29 = vpop.f32.mrf.mxu2 }
 0x8bd   : > { %v4439_v23 = vpop.f32.mrf.mxu3 }
 0x8c2   : > { %4530 = vmatmul.bf16.gmra.mxu0 %v9952_v20  ;;  %4579 = vmatmul.bf16.gmra.mxu1 %v9953_v12  ;;  %v4356_v20 = vadd.f32 %v4355_v16, %v9958_v26  ;;  %v9959_v12 = vld [vmem:[#allocation49_spill] sm:$0xff]  ;;  %v9962_v16 = vld [vmem:[#allocation63_spill] sm:$0xff] }
 0x8c3   : > { %4946 = vmatmul.bf16.gmra.mxu2 %v9094_v3  ;;  %v4361_v3 = vadd.f32 %v4360_v29, %v9959_v12  ;;  %v4351_v26 = vadd.f32 %v4350_v18, %v9962_v16  ;;  %v4438_v18 = vadd.f32 %v4437_v41, %v4349_v6 }
 0x8c5   : > { %v4442_v19 = vpop.f32.mrf.mxu3  ;;  %v4440_v51 = vadd.f32 %v4439_v23, %v4351_v26  ;;  %v4341_v23 = vadd.f32 %v9029_v30, %v9967_v38 }
 0x8cd   : > { %v4444_v44 = vpop.f32.mrf.mxu3 }
 0x8ce   : > { %v4445_v58 = vadd.f32 %v4444_v44, %v4356_v20  ;;  %v9966_v44 = vld [vmem:[#allocation53_spill] sm:$0xff]  ;;  %v4430_v20 = vadd.f32 %v9059_v31, %v4341_v23  ;;  %v9150_v31 = vpop.f32.mrf.mxu0 }
 0x8d0   : > { %v4688_v50 = vmax.f32 %v4445_v58, 0.0 }
 0x8d2   : > { %4535 = vmatmul.bf16.gmra.mxu0 %v9955_v39  ;;  %4584 = vmatmul.bf16.gmra.mxu1 %v9956_v61  ;;  %v9960_v61 = vld [vmem:[#allocation37_spill] sm:$0xff] }
 0x8d3   : > { %4951 = vmatmul.bf16.gmra.mxu2 %v9107_v62  ;;  %v4354_v62 = vadd.f32 %v4353_v45, %v9960_v61  ;;  %v9964_v45 = vld [vmem:[#allocation51_spill] sm:$0xff] }
 0x8d5   : > { %v4447_v57 = vpop.f32.mrf.mxu3 }
 0x8d6   : > { %v4448_v48 = vadd.f32 %v4447_v57, %v4359_v46  ;;  %v9127_v57 = vor.u32 %v6437_v35, %v6211_v2  ;;  %v4443_v46 = vadd.f32 %v4442_v19, %v4354_v62  ;;  %v4435_v19 = vadd.f32 %v4434_v60, %v4346_v0 }
 0x8d7   : > { %v4676_v35 = vmax.f32 %v4430_v20, 0.0 }
 0x8d8   : > { %v4690_v12 = vmax.f32 %v4448_v48, 0.0  ;;  %v4464_v48 = vadd.f32 %v9047_v10, %v9966_v44  ;;  %v4678_v10 = vmax.f32 %v9069_v9, 0.0  ;;  %v9162_v44 = vpop.permute.xlu2 %4041 }
 0x8dd   : > { %v4449_v39 = vpop.f32.mrf.mxu3 }
 0x8de   : > { %v4450_v55 = vadd.f32 %v4449_v39, %v4361_v3  ;;  %v4686_v3 = vmax.f32 %v4443_v46, 0.0  ;;  %v4674_v46 = vmax.f32 %v9049_v5, 0.0  ;;  %v9971_v5 = vld [vmem:[#allocation19_spill] sm:$0xff] }
 0x8df   : > { %v4550_v29 = vpop.f32.mrf.mxu1 }
 0x8e0   : > { %v4692_v4 = vmax.f32 %v4450_v55, 0.0  ;;  %v4551_v42 = vadd.f32 %v4550_v29, %v4462_v43  ;;  %v4684_v43 = vmax.f32 %v4440_v51, 0.0  ;;  %v4722_v62 = vpack.c.bf16 %v4688_v50, %v4686_v3  ;;  %v6219_v50 = vld [vmem:[%s9545_s18 + $0x70] sm:$0xf]  ;;  %v6439_v51 = vld [vmem:[%s9545_s18 + $0x74] sm:$0xf0] }
 0x8e1   : > { %v4682_v55 = vmax.f32 %v4438_v18, 0.0  ;;  %v9155_v58 = vor.u32 %v6439_v51, %v6219_v50  ;;  %v4331_v29 = vadd.f32 %v8982_v36, %v8969_v56  ;;  %v9970_v3 = vld [vmem:[#allocation34_spill] sm:$0xff] }
 0x8e2   : > { %v4724_v17 = vpack.c.bf16 %v4692_v4, %v4690_v12  ;;  %4589 = vmatmul.bf16.gmra.mxu1 %v9964_v45  ;;  %v4680_v12 = vmax.f32 %v4435_v19, 0.0  ;;  %v4631_v6 = vmax.f32 %v4551_v42, 0.0  ;;  %v9969_v42 = vld [vmem:[#allocation67_spill] sm:$0xff]  ;;  %v4469_v19 = vadd.f32 %v9071_v25, %v9971_v5  ;;  %v6165_v25 = vld [vmem:[%s9545_s18 + $0x8] sm:$0xf0]  ;;  %v9973_v51 = vld [vmem:[#allocation38_spill] sm:$0xff] }
 0x8e3   : > { %4956 = vmatmul.bf16.gmra.mxu2 %v9127_v57  ;;  %v4720_v54 = vpack.c.bf16 %v4684_v43, %v4682_v55  ;;  %v4467_v60 = vadd.f32 %v9063_v27, %v9969_v42  ;;  %v4420_v0 = vadd.f32 %v9018_v47, %v4331_v29  ;;  %v4716_v27 = vpack.c.bf16 %v4676_v35, %v4674_v46  ;;  %v9974_v42 = vld [vmem:[#allocation52_spill] sm:$0xff]  ;;  %v6426_v29 = vld [vmem:[%s9545_s18 + $0x14] sm:$0xf]  ;;  %v6173_v46 = vld [vmem:[%s9545_s18 + $0x18] sm:$0xf0] }
 0x8e4   : > { %4967 = vmatpush.bf16.msrb.mxu3 %v4724_v17  ;;  %v9968_v17 = vld [vmem:[#allocation29_spill] sm:$0xff]  ;;  %v4718_v9 = vpack.c.bf16 %v4680_v12, %v4678_v10 }
 0x8e5   : > { %v4336_v2 = vadd.f32 %v9006_v33, %v9968_v17  ;;  %v4668_v47 = vmax.f32 %v4420_v0, 0.0  ;;  %v9975_v0 = vld [vmem:[#allocation41_spill] sm:$0xff] }
 0x8e7   : > { %v4552_v4 = vpop.f32.mrf.mxu1  ;;  %v4425_v33 = vadd.f32 %v9039_v22, %v4336_v2  ;;  %v4326_v22 = vadd.f32 %v8955_v13, %v9162_v44 }
 0x8e8   : > { %v4553_v26 = vadd.f32 %v4552_v4, %v4464_v48  ;;  %4968 = vmatpush.bf16.msrb.mxu3 %v4722_v62  ;;  %v4670_v48 = vmax.f32 %v9027_v14, 0.0  ;;  %v9171_v62 = vpop.f32.mrf.mxu0  ;;  %v4666_v4 = vmax.f32 %v9008_v24, 0.0  ;;  %v4662_v14 = vmax.f32 %v8997_v21, 0.0  ;;  %v9972_v24 = vld [vmem:[#allocation74_spill] sm:$0xff] }
 0x8e9   : > { %v4672_v18 = vmax.f32 %v4425_v33, 0.0  ;;  %v4415_v36 = vadd.f32 %v9000_v28, %v4326_v22  ;;  %v6424_v28 = vld [vmem:[%s9545_s18 + $0x4] sm:$0xf]  ;;  %v9977_v22 = vld [vmem:[#allocation78_spill] sm:$0xff] }
 0x8ea   : > { %v4633_v41 = vmax.f32 %v4553_v26, 0.0  ;;  %v4712_v12 = vpack.c.bf16 %v4668_v47, %v4666_v4  ;;  %v9185_v10 = vor.u32 %v6424_v28, %v6165_v25  ;;  %v6181_v4 = vld [vmem:[%s9545_s18 + $0x28] sm:$0xf0]  ;;  %v9981_v28 = vld [vmem:[#allocation80_spill] sm:$0xff] }
 0x8eb   : > { %v4714_v43 = vpack.c.bf16 %v4672_v18, %v4670_v48  ;;  %v4664_v26 = vmax.f32 %v4415_v36, 0.0  ;;  %v4477_v18 = vadd.f32 %v9099_v37, %v9975_v0  ;;  %v9978_v36 = vld [vmem:[#allocation40_spill] sm:$0xff]  ;;  %v6434_v0 = vld [vmem:[%s9545_s18 + $0x54] sm:$0xf] }
 0x8ec   : > { %4969 = vmatpush.bf16.msrb.mxu3 %v4720_v54  ;;  %v9148_v30 = vpack.c.bf16 %v4633_v41, %v4631_v6  ;;  %v4472_v6 = vadd.f32 %v9084_v15, %v9972_v24  ;;  %v4479_v5 = vadd.f32 %v9109_v32, %v9978_v36  ;;  %v6428_v37 = vld [vmem:[%s9545_s18 + $0x24] sm:$0xf] }
 0x8ed   : > { %v4710_v41 = vpack.c.bf16 %v4664_v26, %v4662_v14  ;;  %v9979_v26 = vld [vmem:[#allocation31_spill] sm:$0xff]  ;;  %v9219_v32 = vor.u32 %v6428_v37, %v6181_v4  ;;  %v9261_v4 = vpop.permute.xlu0 %4830 }
 0x8ef   : > { %v4555_v39 = vpop.f32.mrf.mxu1  ;;  %9980 = vst [vmem:[#allocation69_spill] sm:$0xff] %v9219_v32 }
 0x8f0   : > { %v4556_v45 = vadd.f32 %v4555_v39, %v4467_v60  ;;  %4970 = vmatpush.bf16.msrb.mxu3 %v4718_v9  ;;  %v9187_v21 = vpop.f32.mrf.mxu0  ;;  %v4474_v60 = vadd.f32 %v9092_v59, %v9974_v42  ;;  %v9203_v59 = vor.u32 %v6426_v29, %v6173_v46 }
 0x8f2   : > { %4594 = vmatmul.bf16.gmra.mxu1 %v9970_v3  ;;  %v4635_v20 = vmax.f32 %v4556_v45, 0.0  ;;  %9976 = vst [vmem:[#allocation21_spill] sm:$0xff] %v9203_v59 }
 0x8f3   : > { %4961 = vmatmul.bf16.gmra.mxu2 %v9155_v58 }
 0x8f4   : > { %4971 = vmatpush.bf16.msrb.mxu3 %v4716_v27 }
 0x8f7   : > { %v4557_v23 = vpop.f32.mrf.mxu1 }
 0x8f8   : > { %v4558_v55 = vadd.f32 %v4557_v23, %v4469_v19  ;;  %4972 = vmatpush.bf16.msrb.mxu3 %v4714_v43  ;;  %v4488_v15 = vpop.f32.mrf.mxu0 }
 0x8fa   : > { %v4637_v13 = vmax.f32 %v4558_v55, 0.0 }
 0x8fc   : > { %4973 = vmatpush.bf16.msrb.mxu3 %v4712_v12  ;;  %v9181_v54 = vpack.c.bf16 %v4637_v13, %v4635_v20  ;;  %v4482_v20 = vadd.f32 %v9150_v31, %v9979_v26  ;;  %v6189_v31 = vld [vmem:[%s9545_s18 + $0x38] sm:$0xf0]  ;;  %v4489_v26 = vadd.f32 %v4488_v15, %v8690_v52  ;;  %v6213_v52 = vld [vmem:[%s9545_s18 + $0x68] sm:$0xf0]  ;;  %v9986_v15 = vld [vmem:[#allocation64_spill] sm:$0xff] }
 0x8ff   : > { %v4560_v2 = vpop.f32.mrf.mxu1 }
 0x900   : > { %v4561_v50 = vadd.f32 %v4560_v2, %v4472_v6  ;;  %4974 = vmatpush.bf16.msrb.mxu3 %v4710_v41  ;;  %v4491_v48 = vpop.f32.mrf.mxu0  ;;  %v6430_v6 = vld [vmem:[%s9545_s18 + $0x34] sm:$0xf] }
 0x901   : > { %v9231_v2 = vor.u32 %v6430_v6, %v6189_v31  ;;  %v9987_v6 = vld [vmem:[#allocation16_spill] sm:$0xff] }
 0x902   : > { %4599 = vmatmul.bf16.gmra.mxu1 %v9973_v51  ;;  %v4639_v9 = vmax.f32 %v4561_v50, 0.0  ;;  %v9983_v50 = vld [vmem:[#allocation83_spill] sm:$0xff] }
 0x903   : > { %4975 = vmatmul.bf16.vlgmr.msrb.gmra.mxu3 %v9185_v10  ;;  %9982 = vst [vmem:[#allocation72_spill] sm:$0xff] %v9231_v2 }
 0x907   : > { %v4562_v33 = vpop.f32.mrf.mxu1 }
 0x908   : > { %v4563_v35 = vadd.f32 %v4562_v33, %v4474_v60  ;;  %v4493_v13 = vpop.f32.mrf.mxu0  ;;  %v6432_v60 = vld [vmem:[%s9545_s18 + $0x44] sm:$0xf]  ;;  %v6197_v33 = vld [vmem:[%s9545_s18 + $0x48] sm:$0xf0] }
 0x909   : > { %v4494_v36 = vadd.f32 %v4493_v13, %v8587_v63 }
 0x90a   : > { %v4641_v39 = vmax.f32 %v4563_v35, 0.0 }
 0x90c   : > { %v9199_v45 = vpack.c.bf16 %v4641_v39, %v4639_v9  ;;  %v9241_v39 = vor.u32 %v6432_v60, %v6197_v33 }
 0x90e   : > { %9984 = vst [vmem:[#allocation73_spill] sm:$0xff] %v9241_v39 }
 0x90f   : > { %v4565_v3 = vpop.f32.mrf.mxu1 }
 0x910   : > { %v4566_v27 = vadd.f32 %v4565_v3, %v4477_v18  ;;  %v4496_v24 = vpop.f32.mrf.mxu0  ;;  %v6205_v18 = vld [vmem:[%s9545_s18 + $0x58] sm:$0xf0] }
 0x912   : > { %4604 = vmatmul.bf16.gmra.mxu1 %v9977_v22  ;;  %v4643_v43 = vmax.f32 %v4566_v27, 0.0  ;;  %v9253_v27 = vor.u32 %v6434_v0, %v6205_v18  ;;  %v9284_v0 = vpop.permute.xlu0 %4825 }
 0x913   : > { %4980 = vmatmul.bf16.gmra.mxu3 %v9203_v59 }
 0x914   : > { %9985 = vst [vmem:[#allocation25_spill] sm:$0xff] %v9253_v27 }
 0x917   : > { %v4567_v19 = vpop.f32.mrf.mxu1 }
 0x918   : > { %v4568_v47 = vadd.f32 %v4567_v19, %v4479_v5  ;;  %v4498_v51 = vpop.f32.mrf.mxu0 }
 0x919   : > { %v4499_v5 = vadd.f32 %v4498_v51, %v8545_v1  ;;  %v4487_v1 = vadd.f32 %v9187_v21, %v9923_v40 }
 0x91a   : > { %v4645_v23 = vmax.f32 %v4568_v47, 0.0 }
 0x91c   : > { %v9215_v55 = vpack.c.bf16 %v4645_v23, %v4643_v43  ;;  %v4492_v43 = vadd.f32 %v4491_v48, %v8574_v34  ;;  %v6436_v34 = vld [vmem:[%s9545_s18 + $0x64] sm:$0xf]  ;;  %v4484_v48 = vadd.f32 %v9171_v62, %v9986_v15  ;;  %v4927_v62 = vpop.f32.mrf.mxu2 }
 0x91d   : > { %v9279_v21 = vor.u32 %v6436_v34, %v6213_v52  ;;  %v9995_v34 = vld [vmem:[#allocation17_spill] sm:$0xff] }
 0x91f   : > { %v4570_v12 = vpop.f32.mrf.mxu1  ;;  %9988 = vst [vmem:[#allocation65_spill] sm:$0xff] %v9279_v21 }
 0x920   : > { %v9221_v14 = vadd.f32 %v4570_v12, %v4482_v20  ;;  %v4501_v35 = vpop.f32.mrf.mxu0 }
 0x921   : > { %v4502_v31 = vadd.f32 %v4501_v35, %v9987_v6 }
 0x922   : > { %4609 = vmatmul.bf16.gmra.mxu1 %v9981_v28 }
 0x923   : > { %4985 = vmatmul.bf16.gmra.mxu3 %v9219_v32 }
 0x927   : > { %v4572_v25 = vpop.f32.mrf.mxu1 }
 0x928   : > { %v9245_v29 = vpop.f32.mrf.mxu0 }
 0x92f   : > { %v4575_v41 = vpop.f32.mrf.mxu1 }
 0x930   : > { %v4506_v22 = vpop.f32.mrf.mxu0 }
 0x932   : > { %4614 = vmatmul.bf16.gmra.mxu1 %v9983_v50  ;;  %v4576_v50 = vadd.f32 %v4575_v41, %v4487_v1  ;;  %v9311_v1 = vpop.permute.xlu1 %4835 }
 0x933   : > { %4990 = vmatmul.bf16.gmra.mxu3 %v9231_v2 }
 0x937   : > { %v4577_v42 = vpop.f32.mrf.mxu1 }
 0x938   : > { %v9264_v28 = vpop.f32.mrf.mxu0  ;;  %v4578_v63 = vadd.f32 %v4577_v42, %v4489_v26  ;;  %v4573_v42 = vadd.f32 %v4572_v25, %v4484_v48 }
 0x93a   : > { %v4653_v60 = vmax.f32 %v4578_v63, 0.0  ;;  %v4649_v18 = vmax.f32 %v4573_v42, 0.0  ;;  %v9322_v52 = vpop.permute.xlu1 %4810 }
 0x93f   : > { %v4580_v9 = vpop.f32.mrf.mxu1 }
 0x940   : > { %v4581_v20 = vadd.f32 %v4580_v9, %v4492_v43  ;;  %v4511_v41 = vpop.f32.mrf.mxu0  ;;  %v9990_v43 = vld [vmem:[#allocation39_spill] sm:$0xff] }
 0x942   : > { %4619 = vmatmul.bf16.gmra.mxu1 %v8921_v8  ;;  %v4497_v8 = vadd.f32 %v4496_v24, %v8611_v49  ;;  %v9266_v49 = vpop.permute.xlu2 %4820  ;;  %v4655_v51 = vmax.f32 %v4581_v20, 0.0 }
 0x943   : > { %4995 = vmatmul.bf16.gmra.mxu3 %v9241_v39  ;;  %v10010_v39 = vld [vmem:[#allocation71_spill] sm:$0xff] }
 0x947   : > { %v4582_v46 = vpop.f32.mrf.mxu1 }
 0x948   : > { %v4583_v23 = vadd.f32 %v4582_v46, %v4494_v36  ;;  %v4651_v46 = vmax.f32 %v4576_v50, 0.0 }
 0x94a   : > { %v4657_v13 = vmax.f32 %v4583_v23, 0.0  ;;  %v4705_v35 = vpack.c.bf16 %v4653_v60, %v4651_v46  ;;  %v4507_v23 = vadd.f32 %v4506_v22, %v9990_v43 }
 0x94c   : > { %v4707_v9 = vpack.c.bf16 %v4657_v13, %v4655_v51 }
 0x94f   : > { %v4585_v3 = vpop.f32.mrf.mxu1 }
 0x950   : > { %v4586_v19 = vadd.f32 %v4585_v3, %v4497_v8  ;;  %v9286_v3 = vpop.permute.xlu2 %4815  ;;  %v4647_v8 = vmax.f32 %v9221_v14, 0.0  ;;  %v9301_v14 = vpop.f32.mrf.mxu0 }
 0x952   : > { %4624 = vmatmul.bf16.gmra.mxu1 %v8957_v7  ;;  %v4659_v7 = vmax.f32 %v4586_v19, 0.0  ;;  %v4703_v36 = vpack.c.bf16 %v4649_v18, %v4647_v8  ;;  %v6221_v19 = vld [vmem:[%s9545_s18 + $0x78] sm:$0xf0]  ;;  %v10000_v8 = vld [vmem:[#allocation18_spill] sm:$0xff] }
 0x953   : > { %5000 = vmatmul.bf16.gmra.mxu3 %v9253_v27 }
 0x957   : > { %v4587_v47 = vpop.f32.mrf.mxu1 }
 0x958   : > { %v4588_v37 = vadd.f32 %v4587_v47, %v4499_v5  ;;  %v6438_v5 = vld [vmem:[%s9545_s18 + $0x74] sm:$0xf]  ;;  %v9297_v47 = vpop.permute.xlu0 %4800  ;;  %v4516_v13 = vpop.f32.mrf.mxu0 }
 0x959   : > { %9989 = vst [vmem:[#allocation70_spill] sm:$0xff] %v9297_v47  ;;  %v9303_v20 = vor.u32 %v6438_v5, %v6221_v19 }
 0x95a   : > { %v4661_v12 = vmax.f32 %v4588_v37, 0.0  ;;  %v4929_v37 = vpop.f32.mrf.mxu2 }
 0x95b   : > { %9991 = vst [vmem:[#allocation44_spill] sm:$0xff] %v9303_v20 }
 0x95c   : > { %v4709_v24 = vpack.c.bf16 %v4661_v12, %v4659_v7  ;;  %v9305_v7 = vpop.permute.xlu2 %4790 }
 0x95d   : > { %9992 = vst [vmem:[#allocation35_spill] sm:$0xff] %v9305_v7 }
 0x95e   : > { %5016 = vmatpush.bf16.msra.mxu0 %v4709_v24 }
 0x95f   : > { %v4590_v40 = vpop.f32.mrf.mxu1 }
 0x960   : > { %v9281_v33 = vadd.f32 %v4590_v40, %v4502_v31  ;;  %v9329_v50 = vpop.f32.mrf.mxu0 }
 0x962   : > { %5017 = vmatpush.bf16.msra.mxu0 %v4707_v9  ;;  %v4932_v63 = vpop.f32.mrf.mxu2  ;;  %v9336_v9 = vpop.permute.xlu1 %4805 }
 0x963   : > { %5005 = vmatmul.bf16.gmra.mxu3 %v9279_v21 }
 0x964   : > { %v9318_v24 = vpop.permute.xlu2 %4785 }
 0x965   : > { %9994 = vst [vmem:[#allocation47_spill] sm:$0xff] %v9318_v24 }
 0x966   : > { %5018 = vmatpush.bf16.msra.mxu0 %v4705_v35 }
 0x967   : > { %v9289_v25 = vpop.f32.mrf.mxu1 }
 0x96a   : > { %5019 = vmatpush.bf16.msra.mxu0 %v4703_v36  ;;  %v4934_v31 = vpop.f32.mrf.mxu2  ;;  %v10001_v36 = vld [vmem:[#allocation55_spill] sm:$0xff] }
 0x96b   : > { %v4517_v5 = vadd.f32 %v4516_v13, %v10001_v36  ;;  %v10005_v36 = vld [vmem:[#allocation75_spill] sm:$0xff] }
 0x96c   : > { %v9331_v51 = vpop.permute.xlu2 %4760 }
 0x96d   : > { %9998 = vst [vmem:[#allocation62_spill] sm:$0xff] %v9331_v51  ;;  %v4928_v40 = vadd.f32 %v4927_v62, %v9331_v51 }
 0x96e   : > { %5020 = vmatpush.bf16.msra.mxu0 %v9215_v55  ;;  %v9316_v55 = vpop.permute.xlu0 %4795 }
 0x96f   : > { %v4595_v26 = vpop.f32.mrf.mxu1  ;;  %9993 = vst [vmem:[#allocation66_spill] sm:$0xff] %v9316_v55 }
 0x970   : > { %v9307_v12 = vadd.f32 %v4595_v26, %v4507_v23 }
 0x972   : > { %5021 = vmatpush.bf16.msra.mxu0 %v9199_v45  ;;  %v9996_v45 = vld [vmem:[#allocation28_spill] sm:$0xff]  ;;  %v4937_v18 = vpop.f32.mrf.mxu2 }
 0x973   : > { %5010 = vmatmul.bf16.gmra.mxu3 %v9303_v20  ;;  %v4512_v15 = vadd.f32 %v4511_v41, %v9996_v45  ;;  %v4521_v41 = vpop.f32.mrf.mxu0  ;;  %v9345_v45 = vpop.permute.xlu1 %4780 }
 0x974   : > { %10002 = vst [vmem:[#allocation27_spill] sm:$0xff] %v9345_v45 }
 0x976   : > { %5022 = vmatpush.bf16.msra.mxu0 %v9181_v54  ;;  %v9327_v54 = vpop.permute.xlu0 %4770 }
 0x977   : > { %v9314_v22 = vpop.f32.mrf.mxu1  ;;  %9997 = vst [vmem:[#allocation33_spill] sm:$0xff] %v9327_v54 }
 0x97a   : > { %5023 = vmatpush.bf16.msra.mxu0 %v9148_v30 }
 0x97b   : > { %v9354_v13 = vpop.permute.xlu1 %4775 }
 0x97c   : > { %10004 = vst [vmem:[#allocation45_spill] sm:$0xff] %v9354_v13 }
 0x97d   : > { %5024 = vmatmul.bf16.vlgmr.msra.gmra.mxu0 %v9995_v34 }
 0x97e   : > { %v9338_v46 = vpop.permute.xlu0 %4765 }
 0x97f   : > { %v4600_v48 = vpop.f32.mrf.mxu1  ;;  %9999 = vst [vmem:[#allocation59_spill] sm:$0xff] %v9338_v46  ;;  %v4930_v35 = vadd.f32 %v4929_v37, %v9338_v46 }
 0x980   : > { %v9325_v6 = vadd.f32 %v4600_v48, %v4512_v15  ;;  %v4933_v48 = vadd.f32 %v4932_v63, %v9327_v54 }
 0x986   : > { %v4976_v42 = vpop.f32.mrf.mxu3 }
 0x987   : > { %v4977_v30 = vadd.f32 %v4976_v42, %v4928_v40  ;;  %v9334_v60 = vpop.f32.mrf.mxu1  ;;  %v4939_v40 = vpop.f32.mrf.mxu2 }
 0x988   : > { %v9350_v42 = vpop.f32.mrf.mxu0 }
 0x989   : > { %v5114_v26 = vmax.f32 %v4977_v30, 0.0  ;;  %v10006_v30 = vld [vmem:[#allocation68_spill] sm:$0xff] }
 0x98d   : > { %5029 = vmatmul.bf16.gmra.mxu0 %v10000_v8 }
 0x98e   : > { %v4978_v19 = vpop.f32.mrf.mxu3 }
 0x98f   : > { %v4979_v43 = vadd.f32 %v4978_v19, %v4930_v35  ;;  %v4605_v23 = vpop.f32.mrf.mxu1  ;;  %v4935_v35 = vadd.f32 %v4934_v31, %v9354_v13 }
 0x990   : > { %v9343_v62 = vadd.f32 %v4605_v23, %v4517_v5  ;;  %v4522_v5 = vadd.f32 %v4521_v41, %v10006_v30  ;;  %v4940_v41 = vadd.f32 %v4939_v40, %v9318_v24  ;;  %v10008_v30 = vld [vmem:[#allocation24_spill] sm:$0xff] }
 0x991   : > { %v5116_v34 = vmax.f32 %v4979_v43, 0.0 }
 0x993   : > { %v9347_v15 = vpack.c.bf16 %v5116_v34, %v5114_v26  ;;  %v4942_v26 = vpop.f32.mrf.mxu2  ;;  %v4526_v34 = vpop.f32.mrf.mxu0 }
 0x995   : > { %10003 = vst [vmem:[#allocation43_spill] sm:$0xff] %v9347_v15 }
 0x996   : > { %v4981_v37 = vpop.f32.mrf.mxu3 }
 0x997   : > { %v4982_v8 = vadd.f32 %v4981_v37, %v4933_v48  ;;  %v9352_v46 = vpop.f32.mrf.mxu1  ;;  %v4938_v37 = vadd.f32 %v4937_v18, %v9345_v45 }
 0x999   : > { %v5118_v54 = vmax.f32 %v4982_v8, 0.0 }
 0x99b   : > { %v4944_v13 = vpop.f32.mrf.mxu2 }
 0x99c   : > { %v4945_v45 = vadd.f32 %v4944_v13, %v9316_v55 }
 0x99d   : > { %5034 = vmatmul.bf16.gmra.mxu0 %v10005_v36  ;;  %v4528_v36 = vpop.f32.mrf.mxu0 }
 0x99e   : > { %v4983_v19 = vpop.f32.mrf.mxu3 }
 0x99f   : > { %v4984_v43 = vadd.f32 %v4983_v19, %v4935_v35  ;;  %v4610_v23 = vpop.f32.mrf.mxu1 }
 0x9a0   : > { %v9359_v63 = vadd.f32 %v4610_v23, %v4522_v5 }
 0x9a1   : > { %v5120_v51 = vmax.f32 %v4984_v43, 0.0 }
 0x9a3   : > { %v9361_v48 = vpack.c.bf16 %v5120_v51, %v5118_v54  ;;  %v4947_v54 = vpop.f32.mrf.mxu2  ;;  %v4943_v51 = vadd.f32 %v4942_v26, %v9305_v7 }
 0x9a4   : > { %v4948_v26 = vadd.f32 %v4947_v54, %v9297_v47  ;;  %v10017_v54 = vld [vmem:[#allocation49_spill] sm:$0xff] }
 0x9a5   : > { %10007 = vst [vmem:[#allocation82_spill] sm:$0xff] %v9361_v48  ;;  %v4531_v18 = vpop.f32.mrf.mxu0 }
 0x9a6   : > { %v4986_v20 = vpop.f32.mrf.mxu3  ;;  %v4532_v48 = vadd.f32 %v4531_v18, %v9960_v61 }
 0x9a7   : > { %v4987_v21 = vadd.f32 %v4986_v20, %v4938_v37  ;;  %v4612_v31 = vpop.f32.mrf.mxu1 }
 0x9a9   : > { %v5122_v23 = vmax.f32 %v4987_v21, 0.0 }
 0x9ab   : > { %v9371_v40 = vpop.f32.mrf.mxu2 }
 0x9ad   : > { %5039 = vmatmul.bf16.gmra.mxu0 %v10008_v30 }
 0x9ae   : > { %v4988_v35 = vpop.f32.mrf.mxu3 }
 0x9af   : > { %v4989_v19 = vadd.f32 %v4988_v35, %v4940_v41  ;;  %v4615_v5 = vpop.f32.mrf.mxu1  ;;  %v4533_v41 = vpop.f32.mrf.mxu0 }
 0x9b1   : > { %v5124_v27 = vmax.f32 %v4989_v19, 0.0 }
 0x9b3   : > { %v9366_v8 = vpack.c.bf16 %v5124_v27, %v5122_v23 }
 0x9b5   : > { %10009 = vst [vmem:[#allocation46_spill] sm:$0xff] %v9366_v8  ;;  %v4529_v8 = vadd.f32 %v4528_v36, %v9962_v16 }
 0x9b6   : > { %v4991_v43 = vpop.f32.mrf.mxu3 }
 0x9b7   : > { %v4992_v20 = vadd.f32 %v4991_v43, %v4943_v51  ;;  %v4617_v37 = vpop.f32.mrf.mxu1  ;;  %v9378_v43 = vpop.f32.mrf.mxu2 }
 0x9b8   : > { %v4536_v13 = vpop.f32.mrf.mxu0 }
 0x9b9   : > { %v5126_v19 = vmax.f32 %v4992_v20, 0.0 }
 0x9bd   : > { %5044 = vmatmul.bf16.gmra.mxu0 %v10010_v39  ;;  %v10013_v39 = vld [vmem:[#allocation76_spill] sm:$0xff] }
 0x9be   : > { %v4993_v30 = vpop.f32.mrf.mxu3 }
 0x9bf   : > { %v4994_v35 = vadd.f32 %v4993_v30, %v4945_v45  ;;  %v4620_v21 = vpop.f32.mrf.mxu1  ;;  %v9383_v45 = vpop.f32.mrf.mxu2  ;;  %v10015_v30 = vld [vmem:[#allocation13_spill] sm:$0xff] }
 0x9c0   : > { %v4538_v20 = vpop.f32.mrf.mxu0 }
 0x9c1   : > { %v5128_v27 = vmax.f32 %v4994_v35, 0.0  ;;  %v4537_v35 = vadd.f32 %v4536_v13, %v10015_v30  ;;  %v4539_v47 = vadd.f32 %v4538_v20, %v10017_v54  ;;  %v4618_v30 = vadd.f32 %v4617_v37, %v4529_v8 }
 0x9c3   : > { %v9373_v23 = vpack.c.bf16 %v5128_v27, %v5126_v19  ;;  %v10016_v19 = vld [vmem:[#allocation57_spill] sm:$0xff]  ;;  %v4685_v16 = vmax.f32 %v4618_v30, 0.0 }
 0x9c4   : > { %v4534_v27 = vadd.f32 %v4533_v41, %v10016_v19 }
 0x9c5   : > { %10011 = vst [vmem:[#allocation48_spill] sm:$0xff] %v9373_v23  ;;  %v4621_v23 = vadd.f32 %v4620_v21, %v4532_v48  ;;  %v4519_v48 = vadd.f32 %v9329_v50, %v9967_v38  ;;  %v4509_v38 = vadd.f32 %v9264_v28, %v8969_v56  ;;  %v4675_v50 = vmax.f32 %v9343_v62, 0.0 }
 0x9c6   : > { %v4996_v7 = vpop.f32.mrf.mxu3  ;;  %v4667_v62 = vmax.f32 %v9307_v12, 0.0 }
 0x9c7   : > { %v9376_v24 = vadd.f32 %v4996_v7, %v4948_v26  ;;  %v4622_v51 = vpop.f32.mrf.mxu1  ;;  %v4957_v13 = vpop.f32.mrf.mxu2  ;;  %v4687_v61 = vmax.f32 %v4621_v23, 0.0  ;;  %v4663_v23 = vmax.f32 %v9281_v33, 0.0  ;;  %v4955_v33 = vadd.f32 %v9383_v45, %v9286_v3 }
 0x9c8   : > { %v4623_v32 = vadd.f32 %v4622_v51, %v4534_v27  ;;  %v4958_v27 = vadd.f32 %v4957_v13, %v9266_v49 }
 0x9c9   : > { %10012 = vst [vmem:[#allocation81_spill] sm:$0xff] %v9376_v24 }
 0x9ca   : > { %v4689_v41 = vmax.f32 %v4623_v32, 0.0  ;;  %v4608_v32 = vadd.f32 %v9352_v46, %v4519_v48  ;;  %v4598_v46 = vadd.f32 %v9314_v22, %v4509_v38  ;;  %v10028_v38 = vld [vmem:[#allocation25_spill] sm:$0xff] }
 0x9cc   : > { %v4669_v56 = vmax.f32 %v4598_v46, 0.0  ;;  %v10029_v46 = vld [vmem:[#allocation65_spill] sm:$0xff] }
 0x9cd   : > { %5049 = vmatmul.bf16.gmra.mxu0 %v10013_v39 }
 0x9ce   : > { %v9381_v55 = vpop.f32.mrf.mxu3  ;;  %v4713_v21 = vpack.c.bf16 %v4669_v56, %v4667_v62  ;;  %v10032_v62 = vld [vmem:[#allocation59_spill] sm:$0xff] }
 0x9cf   : > { %10014 = vst [vmem:[#allocation79_spill] sm:$0xff] %v9381_v55  ;;  %v4625_v2 = vpop.f32.mrf.mxu1  ;;  %v4527_v55 = vadd.f32 %v4526_v34, %v9963_v11 }
 0x9d0   : > { %v4626_v7 = vadd.f32 %v4625_v2, %v4537_v35  ;;  %v4524_v2 = vadd.f32 %v9350_v42, %v9965_v53  ;;  %v4959_v53 = vpop.f32.mrf.mxu2 }
 0x9d1   : > { %v4616_v20 = vadd.f32 %v4615_v5, %v4527_v55  ;;  %v4679_v55 = vmax.f32 %v9359_v63, 0.0 }
 0x9d2   : > { %v4691_v59 = vmax.f32 %v4626_v7, 0.0 }
 0x9d3   : > { %v4683_v11 = vmax.f32 %v4616_v20, 0.0 }
 0x9d6   : > { %v9388_v26 = vpop.f32.mrf.mxu3 }
 0x9d7   : > { %v4627_v15 = vpop.f32.mrf.mxu1 }
 0x9d8   : > { %v4628_v39 = vadd.f32 %v4627_v15, %v4539_v47  ;;  %v4613_v47 = vadd.f32 %v4612_v31, %v4524_v2  ;;  %v4723_v15 = vpack.c.bf16 %v4689_v41, %v4687_v61  ;;  %v4677_v31 = vmax.f32 %v4608_v32, 0.0  ;;  %v4962_v37 = vpop.f32.mrf.mxu2 }
 0x9da   : > { %v4693_v24 = vmax.f32 %v4628_v39, 0.0  ;;  %v4717_v8 = vpack.c.bf16 %v4677_v31, %v4675_v50  ;;  %v10026_v31 = vld [vmem:[#allocation72_spill] sm:$0xff] }
 0x9dc   : > { %v4725_v19 = vpack.c.bf16 %v4693_v24, %v4691_v59  ;;  %v4681_v59 = vmax.f32 %v4613_v47, 0.0  ;;  %v4721_v24 = vpack.c.bf16 %v4685_v16, %v4683_v11  ;;  %v10018_v16 = vld [vmem:[#allocation79_spill] sm:$0xff] }
 0x9dd   : > { %5054 = vmatmul.bf16.gmra.mxu0 %v9127_v57  ;;  %v4514_v57 = vadd.f32 %v9301_v14, %v9968_v17  ;;  %v4504_v17 = vadd.f32 %v9245_v29, %v9162_v44  ;;  %v4671_v14 = vmax.f32 %v9325_v6, 0.0  ;;  %v4963_v29 = vadd.f32 %v4962_v37, %v9261_v4 }
 0x9de   : > { %v5003_v18 = vpop.f32.mrf.mxu3  ;;  %5065 = vmatpush.bf16.msra.mxu1 %v4725_v19  ;;  %v4719_v36 = vpack.c.bf16 %v4681_v59, %v4679_v55  ;;  %v4960_v6 = vadd.f32 %v4959_v53, %v9284_v0  ;;  %v4953_v19 = vadd.f32 %v9378_v43, %v9322_v52  ;;  %v10023_v53 = vld [vmem:[#allocation69_spill] sm:$0xff]  ;;  %v10024_v55 = vld [vmem:[#allocation82_spill] sm:$0xff] }
 0x9df   : > { %v4603_v34 = vadd.f32 %v9334_v60, %v4514_v57  ;;  %v4593_v63 = vadd.f32 %v9289_v25, %v4504_v17  ;;  %v5004_v2 = vadd.f32 %v5003_v18, %v4955_v33  ;;  %v10020_v18 = vld [vmem:[#allocation21_spill] sm:$0xff]  ;;  %v10030_v17 = vld [vmem:[#allocation44_spill] sm:$0xff] }
 0x9e0   : > { %v4964_v44 = vpop.f32.mrf.mxu2  ;;  %v5002_v47 = vadd.f32 %v9388_v26, %v4953_v19  ;;  %v10022_v26 = vld [vmem:[#allocation46_spill] sm:$0xff] }
 0x9e1   : > { %v4673_v5 = vmax.f32 %v4603_v34, 0.0  ;;  %v4665_v22 = vmax.f32 %v4593_v63, 0.0  ;;  %v4965_v25 = vadd.f32 %v4964_v44, %v9311_v1  ;;  %v5136_v48 = vmax.f32 %v5004_v2, 0.0  ;;  %v10025_v34 = vld [vmem:[#allocation43_spill] sm:$0xff] }
 0x9e2   : > { %5066 = vmatpush.bf16.msra.mxu1 %v4723_v15  ;;  %v5134_v11 = vmax.f32 %v5002_v47, 0.0  ;;  %v10035_v2 = vld [vmem:[#allocation27_spill] sm:$0xff] }
 0x9e3   : > { %v4715_v28 = vpack.c.bf16 %v4673_v5, %v4671_v14  ;;  %v4711_v51 = vpack.c.bf16 %v4665_v22, %v4663_v23 }
 0x9e4   : > { %v5156_v59 = vpack.c.bf16 %v5136_v48, %v5134_v11  ;;  %v9456_v48 = vld [vmem:[%s7312_s2] sm:$0xf]  ;;  %s9468_s2 = scalar_lea.vmem [#allocation3], %s5318_s5  ;;  %s5239_s5 = sshll.u32 %s5236_s29, 4  ;;  %s5240_s5 = int_to_ptr.hbm [resolvable:$true] %s5239_s5 }
 0x9e5   : > { %s5237_s0 = sshll.u32 %s9468_s2, 4  ;;  %s6504_s7 = sshra.s32 %s5240_s5, 4  ;;  %s5238_s0 = int_to_ptr.vmem [resolvable:$true] %s5237_s0  ;;  %s6505_s7 = int_to_ptr.hbm [resolvable:$true] %s6504_s7 }
 0x9e6   : > { %v5006_v42 = vpop.f32.mrf.mxu3  ;;  %5067 = vmatpush.bf16.msra.mxu1 %v4721_v24  ;;  %v10019_v24 = vld [vmem:[#allocation81_spill] sm:$0xff]  ;;  %s6506_s4 = scalar_lea.hbm %s6505_s7, 32  ;;  %p6511_p0 = scmp.lt.s32.totalorder %s6505_s7, %s10041_s27 }
 0x9e7   : > { %v5007_v39 = vadd.f32 %v5006_v42, %v4958_v27  ;;  %v5130_v43 = vmax.f32 %v10019_v24, 0.0  ;;  %v9436_v42 = vld [vmem:[%s9547_s20] sm:$0xff]  ;;  %v10034_v27 = vld [vmem:[#allocation45_spill] sm:$0xff]  ;;  %p6507_p11 = scmp.ne.s32.totalorder %s6505_s7, %s6506_s4  ;;  %p6512_p1 = scmp.lt.s32.totalorder %s6510_s3, %s6506_s4 }
 0x9e9   : > { %v5138_v13 = vmax.f32 %v5007_v39, 0.0  ;;  %p6508_p12 = pnand %p6507_p11, %p6710_p5  ;;  %p6513_p2 = por %p6512_p1, %p6511_p0 }
 0x9ea   : > { %5068 = vmatpush.bf16.msra.mxu1 %v4719_v36  ;;  %v10027_v36 = vld [vmem:[#allocation73_spill] sm:$0xff] }
 0x9eb   : > { %p6509_p13 = pneg %p6508_p12 }
 0x9ed   : > { %5059 = vmatmul.bf16.gmra.mxu0 %v9155_v58  ;;  %p6514_p3 = pnand %p6513_p2, %p6509_p13 }
 0x9ee   : > { %v5008_v60 = vpop.f32.mrf.mxu3  ;;  %5069 = vmatpush.bf16.msra.mxu1 %v4717_v8 }
 0x9ef   : > { %v5009_v54 = vadd.f32 %v5008_v60, %v4960_v6  ;;  %v10031_v60 = vld [vmem:[#allocation62_spill] sm:$0xff] }
 0x9f1   : > { %v5140_v20 = vmax.f32 %v5009_v54, 0.0 }
 0x9f2   : > { %5070 = vmatpush.bf16.msra.mxu1 %v4715_v28 }
 0x9f3   : > { %v5158_v45 = vpack.c.bf16 %v5140_v20, %v5138_v13  ;;  %v10036_v13 = vld [vmem:[#allocation47_spill] sm:$0xff] }
 0x9f6   : > { %v5011_v58 = vpop.f32.mrf.mxu3  ;;  %5071 = vmatpush.bf16.msra.mxu1 %v4713_v21 }
 0x9f7   : > { %v5012_v35 = vadd.f32 %v5011_v58, %v4963_v29  ;;  %v10033_v29 = vld [vmem:[#allocation33_spill] sm:$0xff] }
 0x9f9   : > { %v5142_v30 = vmax.f32 %v5012_v35, 0.0 }
 0x9fa   : > { %5072 = vmatpush.bf16.msra.mxu1 %v4711_v51  ;;  %v5025_v50 = vpop.f32.mrf.mxu0 }
 0x9fb   : > { %v5026_v63 = vadd.f32 %v5025_v50, %v10031_v60 }
 0x9fd   : > { %5073 = vmatmul.bf16.vlgmr.msra.gmra.mxu1 %v9185_v10  ;;  %v4950_v10 = vadd.f32 %v9371_v40, %v9336_v9  ;;  %v10021_v40 = vld [vmem:[#allocation48_spill] sm:$0xff] }
 0x9fe   : > { %v5013_v12 = vpop.f32.mrf.mxu3 }
 0x9ff   : > { %v5014_v7 = vadd.f32 %v5013_v12, %v4965_v25  ;;  %v4999_v15 = vadd.f32 %v10018_v16, %v4950_v10 }
 0xa01   : > { %v5144_v41 = vmax.f32 %v5014_v7, 0.0  ;;  %v5132_v32 = vmax.f32 %v4999_v15, 0.0 }
 0xa02   : > { %v5027_v5 = vpop.f32.mrf.mxu0 }
 0xa03   : > { %v5160_v61 = vpack.c.bf16 %v5144_v41, %v5142_v30  ;;  %v5154_v57 = vpack.c.bf16 %v5132_v32, %v5130_v43  ;;  %v5028_v22 = vadd.f32 %v5027_v5, %v10032_v62  ;;  %v9462_v43 = vpop.permute.xlu1 %5168  ;;  %v10038_v5 = vld [vmem:[#allocation66_spill] sm:$0xff] }
 0xa04   : > { %v10039_v62 = vld [vmem:[#allocation70_spill] sm:$0xff] }
 0xa05   : > { %5182 = vmatpush.bf16.msra.mxu2 %v5160_v61 }
 0xa09   : > { %5183 = vmatpush.bf16.msra.mxu2 %v5158_v45  ;;  %v5210_v45 = vperm.slane %v9456_v48, 1 }
 0xa0a   : > { %v5030_v8 = vpop.f32.mrf.mxu0 }
 0xa0b   : > { %v5031_v6 = vadd.f32 %v5030_v8, %v10033_v29  ;;  %v5214_v24 = vperm.slane %v5210_v45, 1 }
 0xa0d   : > { %5078 = vmatmul.bf16.gmra.mxu1 %v10020_v18  ;;  %5184 = vmatpush.bf16.msra.mxu2 %v5156_v59 }
 0xa11   : > { %5185 = vmatpush.bf16.msra.mxu2 %v5154_v57 }
 0xa12   : > { %v5032_v14 = vpop.f32.mrf.mxu0 }
 0xa13   : > { %v5033_v54 = vadd.f32 %v5032_v14, %v10034_v27 }
 0xa15   : > { %5186 = vmatpush.bf16.msra.mxu2 %v10021_v40 }
 0xa19   : > { %5187 = vmatpush.bf16.msra.mxu2 %v10022_v26 }
 0xa1a   : > { %v5035_v28 = vpop.f32.mrf.mxu0 }
 0xa1b   : > { %v5036_v20 = vadd.f32 %v5035_v28, %v10035_v2 }
 0xa1d   : > { %5083 = vmatmul.bf16.gmra.mxu1 %v10023_v53  ;;  %5188 = vmatpush.bf16.msra.mxu2 %v10024_v55  ;;  %v10037_v53 = vld [vmem:[#allocation35_spill] sm:$0xff] }
 0xa21   : > { %5189 = vmatpush.bf16.msra.mxu2 %v10025_v34 }
 0xa22   : > { %v5037_v25 = vpop.f32.mrf.mxu0 }
 0xa23   : > { %v5038_v16 = vadd.f32 %v5037_v25, %v10036_v13 }
 0xa24   : > { %5190 = vmatmul.bf16.vlgmr.msra.gmra.mxu2 %v9436_v42 }
 0xa2a   : > { %v5040_v39 = vpop.f32.mrf.mxu0 }
 0xa2b   : > { %v5041_v55 = vadd.f32 %v5040_v39, %v10037_v53 }
 0xa2d   : > { %5088 = vmatmul.bf16.gmra.mxu1 %v10026_v31 }
 0xa32   : > { %v5042_v47 = vpop.f32.mrf.mxu0 }
 0xa33   : > { %v5043_v8 = vadd.f32 %v5042_v47, %v10038_v5 }
 0xa3a   : > { %v5045_v40 = vpop.f32.mrf.mxu0 }
 0xa3d   : > { %5093 = vmatmul.bf16.gmra.mxu1 %v10027_v36 }
 0xa4d   : > { %5098 = vmatmul.bf16.gmra.mxu1 %v10028_v38  ;;  %v9471_v38 = vpop.permute.xlu2 %5173 }
 0xa5d   : > { %5103 = vmatmul.bf16.gmra.mxu1 %v10029_v46 }
 0xa6d   : > { %5108 = vmatmul.bf16.gmra.mxu1 %v10030_v17  ;;  %v5047_v17 = vpop.f32.mrf.mxu0 }
 0xa7a   : > { %v5074_v37 = vpop.f32.mrf.mxu1 }
 0xa7b   : > { %v5075_v56 = vadd.f32 %v5074_v37, %v5026_v63 }
 0xa7d   : > { %v5115_v58 = vmax.f32 %v5075_v56, 0.0 }
 0xa82   : > { %v5076_v21 = vpop.f32.mrf.mxu1 }
 0xa83   : > { %v5077_v23 = vadd.f32 %v5076_v21, %v5028_v22  ;;  %v5046_v22 = vadd.f32 %v5045_v40, %v10039_v62 }
 0xa85   : > { %v5117_v51 = vmax.f32 %v5077_v23, 0.0 }
 0xa87   : > { %v9447_v44 = vpack.c.bf16 %v5117_v51, %v5115_v58  ;;  %v5050_v58 = vpop.f32.mrf.mxu0 }
 0xa8a   : > { %v5079_v35 = vpop.f32.mrf.mxu1 }
 0xa8b   : > { %v5080_v12 = vadd.f32 %v5079_v35, %v5031_v6 }
 0xa8d   : > { %v5119_v30 = vmax.f32 %v5080_v12, 0.0 }
 0xa8f   : > { %v5052_v29 = vpop.f32.mrf.mxu0 }
 0xa92   : > { %v5081_v7 = vpop.f32.mrf.mxu1 }
 0xa93   : > { %v5082_v33 = vadd.f32 %v5081_v7, %v5033_v54 }
 0xa95   : > { %v5121_v41 = vmax.f32 %v5082_v33, 0.0 }
 0xa97   : > { %v9451_v19 = vpack.c.bf16 %v5121_v41, %v5119_v30  ;;  %v5055_v25 = vpop.f32.mrf.mxu0 }
 0xa9a   : > { %v5084_v61 = vpop.f32.mrf.mxu1 }
 0xa9b   : > { %v5085_v10 = vadd.f32 %v5084_v61, %v5036_v20 }
 0xa9d   : > { %v5123_v32 = vmax.f32 %v5085_v10, 0.0  ;;  %v5056_v10 = vadd.f32 %v5055_v25, %v9266_v49 }
 0xa9f   : > { %v5057_v12 = vpop.f32.mrf.mxu0 }
 0xaa0   : > { %v5058_v41 = vadd.f32 %v5057_v12, %v9284_v0  ;;  %v5048_v0 = vadd.f32 %v5047_v17, %v9336_v9  ;;  %v5211_v9 = vperm.slane %v9456_v48, 3 }
 0xaa2   : > { %v5086_v15 = vpop.f32.mrf.mxu1 }
 0xaa3   : > { %v5087_v11 = vadd.f32 %v5086_v15, %v5038_v16  ;;  %v5053_v16 = vadd.f32 %v5052_v29, %v9286_v3 }
 0xaa5   : > { %v5125_v59 = vmax.f32 %v5087_v11, 0.0 }
 0xaa7   : > { %v9464_v18 = vpack.c.bf16 %v5125_v59, %v5123_v32  ;;  %v5191_v57 = vpop.f32.mrf.mxu2  ;;  %v5060_v7 = vpop.f32.mrf.mxu0  ;;  %v5051_v32 = vadd.f32 %v5050_v58, %v9322_v52 }
 0xaa8   : > { %v5192_v26 = vadd.f32 %v5191_v57, %v9462_v43  ;;  %v5061_v30 = vadd.f32 %v5060_v7, %v9261_v4 }
 0xaaa   : > { %v5216_v34 = vmul.f32 %v5214_v24, %v5192_v26  ;;  %v5089_v31 = vpop.f32.mrf.mxu1 }
 0xaab   : > { %v5090_v36 = vadd.f32 %v5089_v31, %v5041_v55  ;;  %v5215_v31 = vperm.slane %v5211_v9, 1 }
 0xaac   : > { %5220 = vst [vmem:[%s9468_s2] sm:$0xff] %v5216_v34 }
 0xaad   : > { %v5127_v37 = vmax.f32 %v5090_v36, 0.0 }
 0xaaf   : > { %v5193_v50 = vpop.f32.mrf.mxu2  ;;  %v5062_v39 = vpop.f32.mrf.mxu0 }
 0xab0   : > { %v5194_v46 = vadd.f32 %v5193_v50, %v9471_v38  ;;  %v5063_v2 = vadd.f32 %v5062_v39, %v9311_v1 }
 0xab2   : > { %v5218_v14 = vmul.f32 %v5214_v24, %v5194_v46  ;;  %v5091_v60 = vpop.f32.mrf.mxu1 }
 0xab3   : > { %v5092_v63 = vadd.f32 %v5091_v60, %v5043_v8 }
 0xab4   : > { %5222 = vst [vmem:[%s9468_s2 + $0x10] sm:$0xff] %v5218_v14 }
 0xab5   : > { %v5129_v56 = vmax.f32 %v5092_v63, 0.0 }
 0xab7   : > { %v5153_v28 = vpack.c.bf16 %v5129_v56, %v5127_v37 }
 0xaba   : > { %v5094_v21 = vpop.f32.mrf.mxu1 }
 0xabb   : > { %v5095_v23 = vadd.f32 %v5094_v21, %v5046_v22 }
 0xabd   : > { %v5131_v34 = vmax.f32 %v5095_v23, 0.0 }
 0xac2   : > { %v5096_v51 = vpop.f32.mrf.mxu1 }
 0xac3   : > { %v5097_v40 = vadd.f32 %v5096_v51, %v5048_v0 }
 0xac5   : > { %v5133_v3 = vmax.f32 %v5097_v40, 0.0 }
 0xac7   : > { %v5155_v52 = vpack.c.bf16 %v5133_v3, %v5131_v34 }
 0xaca   : > { %v5099_v6 = vpop.f32.mrf.mxu1 }
 0xacb   : > { %v5100_v57 = vadd.f32 %v5099_v6, %v5051_v32 }
 0xacd   : > { %v5135_v53 = vmax.f32 %v5100_v57, 0.0 }
 0xad2   : > { %v5101_v35 = vpop.f32.mrf.mxu1 }
 0xad3   : > { %v5102_v59 = vadd.f32 %v5101_v35, %v5053_v16 }
 0xad5   : > { %v5137_v26 = vmax.f32 %v5102_v59, 0.0 }
 0xad7   : > { %v5157_v55 = vpack.c.bf16 %v5137_v26, %v5135_v53 }
 0xada   : > { %v5104_v27 = vpop.f32.mrf.mxu1 }
 0xadb   : > { %v5105_v15 = vadd.f32 %v5104_v27, %v5056_v10 }
 0xadd   : > { %v5139_v1 = vmax.f32 %v5105_v15, 0.0 }
 0xae2   : > { %v5106_v54 = vpop.f32.mrf.mxu1 }
 0xae3   : > { %v5107_v47 = vadd.f32 %v5106_v54, %v5058_v41 }
 0xae5   : > { %v5141_v24 = vmax.f32 %v5107_v47, 0.0 }
 0xae7   : > { %v5159_v49 = vpack.c.bf16 %v5141_v24, %v5139_v1 }
 0xaea   : > { %v5109_v33 = vpop.f32.mrf.mxu1 }
 0xaeb   : > { %v5110_v20 = vadd.f32 %v5109_v33, %v5061_v30 }
 0xaed   : > { %v5143_v45 = vmax.f32 %v5110_v20, 0.0 }
 0xaf2   : > { %v5111_v61 = vpop.f32.mrf.mxu1 }
 0xaf3   : > { %v5112_v13 = vadd.f32 %v5111_v61, %v5063_v2 }
 0xaf5   : > { %v5145_v11 = vmax.f32 %v5112_v13, 0.0 }
 0xaf7   : > { %v5161_v4 = vpack.c.bf16 %v5145_v11, %v5143_v45 }
 0xaf9   : > { %5196 = vmatpush.bf16.msra.mxu3 %v5161_v4 }
 0xafd   : > { %5197 = vmatpush.bf16.msra.mxu3 %v5159_v49 }
 0xb01   : > { %5198 = vmatpush.bf16.msra.mxu3 %v5157_v55 }
 0xb05   : > { %5199 = vmatpush.bf16.msra.mxu3 %v5155_v52 }
 0xb09   : > { %5200 = vmatpush.bf16.msra.mxu3 %v5153_v28 }
 0xb0d   : > { %5201 = vmatpush.bf16.msra.mxu3 %v9464_v18 }
 0xb11   : > { %5202 = vmatpush.bf16.msra.mxu3 %v9451_v19 }
 0xb15   : > { %5203 = vmatpush.bf16.msra.mxu3 %v9447_v44 }
 0xb18   : > { %5204 = vmatmul.bf16.vlgmr.msra.gmra.mxu3 %v9436_v42 }
 0xb9b   : > { %v5205_v36 = vpop.f32.mrf.mxu3 }
 0xb9c   : > { %v5206_v50 = vadd.f32 %v5205_v36, %v9462_v43 }
 0xb9e   : > { %v5217_v46 = vmul.f32 %v5215_v31, %v5206_v50 }
 0xba0   : > { %5221 = vst [vmem:[%s9468_s2 + $0x8] sm:$0xff] %v5217_v46 }
 0xba3   : > { %v5207_v44 = vpop.f32.mrf.mxu3 }
 0xba4   : > { %v5208_v42 = vadd.f32 %v5207_v44, %v9471_v38 }
 0xba6   : > { %v5219_v19 = vmul.f32 %v5215_v31, %v5208_v42 }
 0xba8   : > { %5223 = vst [vmem:[%s9468_s2 + $0x18] sm:$0xff] %v5219_v19 }
 0xba9   : > { %6517 = shalt.err (!%p6514_p3)
}
 0xbaa   : > { %s6555_s24 = smov 256   ;;  %s6556_s2 = smov 16  }
 0xbab   : > { %6442 = dma.vmem_to_hbm [thread:$0]  (%p6710_p5), %s5238_s0, 512, %s5240_s5, %s5225_s1, %s6555_s24, %s6555_s24, %s6556_s2  }
 0xbac PF: > { %s10042_s8 = sld [smem:[#allocation8_spill]] }
 0xbad   : > { %s10043_s9 = sld [smem:[#allocation6_spill]] }
 0xbb2   : > { %p6448_p4 = scmp.ge.s32.totalorder %s10042_s8, 2 }
 0xbb3   : > { %s5254_s26 = sand.u32 1, %s10043_s9  }
 0xbb4   : > { %p6445_p7 = pnand %p6448_p4, %p6714_p6  ;;  %s5255_s23 = scalar_lea.sflag [#allocation4], %s5254_s26 }
 0xbb6   : > { %p6446_p8 = pneg %p6445_p7 }
 0xbb8   : > { %6535 = dma.done.wait (%p6446_p8), %s5255_s23, 512  }
 0xbb9   : > { %6537 = vsyncadd (%p6446_p8), %s5255_s23, 4294966784  ;;  %s10045_s30 = sld [smem:[#allocation9_spill]]  ;;  %s10048_s3 = smov %s6544_s28 }
 0xbba   : > { %s10046_s7 = sld [smem:[#allocation7_spill]] }
 0xbbb   : > { %s10047_s29 = sld [smem:[#allocation10_spill]] }
 0xbbf   : > { %p32_p9 = scmp.ge.s32.totalorder %s10045_s30, 4  }
 0xbc0   : > { %s10049_s28 = smov %s10046_s7 }
 0xbc1   :  { %34 = sbr.rel (!%p32_p9) target bundleno = 16 (0x10), region = 146 }
 0xbc6   :  { %5261 = vsyncpa [#allocation4], 1 }
 0xbc7   :  { %5263 = vsyncpa [#allocation4 + $0x1], 1 }

</bundles_post_ra>
